<compile_context>
chip_gen: v7x
topology: tpu7x:2x2x1
jax: 0.10.0
libtpu: 0.0.40
codegen_flags: <defaults>
</compile_context>

<pallas_src>
import math

import jax
import jax.numpy as jnp
from jax import lax
from jax.experimental import pallas as pl
from jax.experimental.pallas import tpu as pltpu

# ---- model hyper-parameters (match the PyTorch module defaults) -------------
EMBED_DIM = 8
NUM_HEADS = 2
HEAD_DIM = EMBED_DIM // NUM_HEADS
NUM_LAYERS = 2
MAX_AGENTS = 10
NUM_TOKENS = 2 + MAX_AGENTS          # ego token + agents + speed-limit token
DIM_FF = 2048                        # nn.TransformerEncoderLayer default
LN_EPS = 1e-5
NEG_INF = -1e30

# ---- raw-feature slab layout (wrapper-side layout plumbing) ------------------
RAW_COLS = 16
COL_BID = 10                         # batch-id column (hits zero weight rows)

# ---- packed small-parameter slab layout -------------------------------------
P_COLS = 16
ROW_WIN = 0                          # rows 0:16  fused input proj (W + biases)
LAYER0_BASE = 16
LAYER_ROWS = 40                      # per layer: wq(8) wk(8) wvp(8*H) vecs(8)
OFF_WQ, OFF_WK, OFF_WVP, OFF_VEC = 0, 8, 16, 32
# vec rows: +0 bq (scaled), +1 b_attn, +2 ln1w, +3 ln1b, +4 ln2w, +5 ln2b, +6 b2
REG_BASE = LAYER0_BASE + NUM_LAYERS * LAYER_ROWS          # 96
# regressor: +0:8 r1w(8,16), +8:24 r2w(16,8), +24:32 r3w(8,2),
#            +32 r1b, +33 r2b, +34 r3b
P_ROWS = REG_BASE + 40                                     # 136


def _layer_norm(x, w, b):
    mu = jnp.mean(x, axis=-1, keepdims=True)
    xc = x - mu
    var = jnp.mean(xc * xc, axis=-1, keepdims=True)
    return xc * lax.rsqrt(var + LN_EPS) * w + b


def transformer_kernel(raw_ref, aux_ref, pslab_ref, wff_ref, b1_ref, out_ref):
    f32 = jnp.float32
    bf16 = jnp.bfloat16
    N = raw_ref.shape[0]
    B = out_ref.shape[0]
    D = EMBED_DIM

    raw = raw_ref[...]                                   # (N, 16)

    # ---- additive attention mask built in-kernel (block-diag + key padding) -
    kpm_row = aux_ref[0:1, :]                            # (1, N) {0, -1e30}
    bid_row = aux_ref[1:2, :]                            # (1, N) batch id (key)
    bid_col = raw_ref[:, COL_BID:COL_BID + 1]            # (N, 1) batch id (query)
    amask = jnp.where(bid_col == bid_row, kpm_row, NEG_INF)          # (N, N)

    # ---- fused input projection (ego/agent/speed weights + biases) ----------
    x = jnp.dot(raw, pslab_ref[ROW_WIN:ROW_WIN + 16, 0:D],
                preferred_element_type=f32)              # (N, D)

    # per-head lane masks (avoid sub-128 lane slicing of q / k)
    lane = lax.broadcasted_iota(jnp.int32, (1, D), 1)
    head_masks = [
        jnp.logical_and(lane >= h * HEAD_DIM, lane < (h + 1) * HEAD_DIM)
        .astype(f32)
        for h in range(NUM_HEADS)
    ]

    # ---------------- transformer encoder layers -----------------------------
    for l in range(NUM_LAYERS):
        base = LAYER0_BASE + l * LAYER_ROWS
        wq = pslab_ref[base + OFF_WQ:base + OFF_WQ + 8, 0:D]     # scale folded
        wk = pslab_ref[base + OFF_WK:base + OFF_WK + 8, 0:D]
        vec = base + OFF_VEC
        bq = pslab_ref[vec + 0:vec + 1, 0:D]
        b_attn = pslab_ref[vec + 1:vec + 2, 0:D]                 # bo + bv@Wo^T
        ln1w = pslab_ref[vec + 2:vec + 3, 0:D]
        ln1b = pslab_ref[vec + 3:vec + 4, 0:D]
        ln2w = pslab_ref[vec + 4:vec + 5, 0:D]
        ln2b = pslab_ref[vec + 5:vec + 6, 0:D]
        b2 = pslab_ref[vec + 6:vec + 7, 0:D]

        q = jnp.dot(x, wq, preferred_element_type=f32) + bq      # (N, D)
        k = jnp.dot(x, wk, preferred_element_type=f32)           # bk dropped

        attn = jnp.zeros((N, D), f32)
        for h in range(NUM_HEADS):
            wvp = pslab_ref[base + OFF_WVP + 8 * h:
                            base + OFF_WVP + 8 * (h + 1), 0:D]   # Wo folded
            s = lax.dot_general(q * head_masks[h], k,
                                (((1,), (1,)), ((), ())),
                                preferred_element_type=f32)      # (N, N)
            s = s + amask
            m = jnp.max(s, axis=-1, keepdims=True)
            p = jnp.exp(s - m)
            p = p * pl.reciprocal(jnp.sum(p, axis=-1, keepdims=True),
                                  approx=True)
            vp = jnp.dot(x, wvp, preferred_element_type=f32)     # (N, D)
            attn = attn + jnp.dot(p, vp, preferred_element_type=f32)
        attn = attn + b_attn

        x = _layer_norm(x + attn, ln1w, ln1b)

        # ---- FFN: bf16 operands, f32 accumulation, lane-dense W1^T / W2 ----
        w1 = wff_ref[l, 0:D, :]                    # (D, FF) bf16 = W1^T
        w2 = wff_ref[l, D:2 * D, :]                # (D, FF) bf16 = W2 (lane-dense)
        h1 = jnp.dot(x.astype(bf16), w1, preferred_element_type=f32) + b1_ref[l]
        h1 = jnp.maximum(h1, 0.0)                  # (N, FF)
        ff = lax.dot_general(h1.astype(bf16), w2, (((1,), (1,)), ((), ())),
                             preferred_element_type=f32) + b2    # (N, D)
        x = _layer_norm(x + ff, ln2w, ln2b)

    # ---------------- ego-token gather + regressor ---------------------------
    rowid = lax.broadcasted_iota(jnp.int32, (B, N), 0)
    colid = lax.broadcasted_iota(jnp.int32, (B, N), 1)
    sel = (colid == rowid * NUM_TOKENS).astype(f32)              # (B, N) one-hot
    tok = jnp.dot(sel, x, preferred_element_type=f32)            # (B, D)

    r1w = pslab_ref[REG_BASE + 0:REG_BASE + 8, 0:16]
    r2w = pslab_ref[REG_BASE + 8:REG_BASE + 24, 0:8]
    r3w = pslab_ref[REG_BASE + 24:REG_BASE + 32, 0:2]
    r1b = pslab_ref[REG_BASE + 32:REG_BASE + 33, 0:16]
    r2b = pslab_ref[REG_BASE + 33:REG_BASE + 34, 0:8]
    r3b = pslab_ref[REG_BASE + 34:REG_BASE + 35, 0:2]

    r = jnp.maximum(jnp.dot(tok, r1w, preferred_element_type=f32) + r1b, 0.0)
    r = jnp.maximum(jnp.dot(r, r2w, preferred_element_type=f32) + r2b, 0.0)
    out_ref[...] = jnp.dot(r, r3w, preferred_element_type=f32) + r3b


# -------------------------- parameter initialization -------------------------
def _kaiming(key, out_f, in_f):
    return jax.random.normal(key, (out_f, in_f), jnp.float32) * math.sqrt(2.0 / in_f)


def init_params(key):
    f32 = jnp.float32
    ks = iter(jax.random.split(key, 64))
    scale = 1.0 / math.sqrt(HEAD_DIM)
    D = EMBED_DIM

    pslab = jnp.zeros((P_ROWS, P_COLS), f32)

    # fused input projection: rows 0-2 ego_w, 3 ego_b, 4-6 agent_w, 7 agent_b,
    # 8 speed_w, 9 speed_b, 10-15 zero (batch-id column lands here -> no effect).
    ego_w = _kaiming(next(ks), D, 3).T                    # (3, D)
    agent_w = _kaiming(next(ks), D, 3).T                  # (3, D)
    speed_w = _kaiming(next(ks), D, 1).T                  # (1, D)
    win = jnp.zeros((16, D), f32)
    win = win.at[0:3].set(ego_w)
    win = win.at[4:7].set(agent_w)
    win = win.at[8:9].set(speed_w)
    # bias rows 3/7/9 stay zero (PyTorch init: constant_(bias, 0))
    pslab = pslab.at[ROW_WIN:ROW_WIN + 16, 0:D].set(win)

    wff_list, b1_list = [], []
    for _l in range(NUM_LAYERS):
        base = LAYER0_BASE + _l * LAYER_ROWS
        in_proj = jax.random.normal(next(ks), (3 * D, D), f32) / math.sqrt(D)
        in_bias = jax.random.normal(next(ks), (3 * D,), f32) * 0.05
        wq_t = in_proj[:D].T                              # (D, D)
        wk_t = in_proj[D:2 * D].T
        wv_t = in_proj[2 * D:].T
        bq = in_bias[:D]
        bv = in_bias[2 * D:]
        # bk is dropped: it adds a per-query constant to the scores
        # (softmax-invariant), so it never affects the output.

        wo = jax.random.normal(next(ks), (D, D), f32) / math.sqrt(D)
        bo = jax.random.normal(next(ks), (D,), f32) * 0.05
        wo_t = wo.T                                       # ctx @ wo_t + bo

        pslab = pslab.at[base + OFF_WQ:base + OFF_WQ + 8, 0:D].set(wq_t * scale)
        pslab = pslab.at[base + OFF_WK:base + OFF_WK + 8, 0:D].set(wk_t)
        for h in range(NUM_HEADS):
            sl = slice(h * HEAD_DIM, (h + 1) * HEAD_DIM)
            wvp = wv_t[:, sl] @ wo_t[sl, :]               # Wo folded into V
            pslab = pslab.at[base + OFF_WVP + 8 * h:
                             base + OFF_WVP + 8 * (h + 1), 0:D].set(wvp)
        b_attn = bo + bv @ wo_t                           # folded attention bias
        vec = base + OFF_VEC
        pslab = pslab.at[vec + 0, 0:D].set(bq * scale)
        pslab = pslab.at[vec + 1, 0:D].set(b_attn)
        pslab = pslab.at[vec + 2, 0:D].set(jnp.ones((D,), f32))   # ln1w
        pslab = pslab.at[vec + 4, 0:D].set(jnp.ones((D,), f32))   # ln2w
        # ln1b / ln2b stay zero

        w1 = jax.random.normal(next(ks), (DIM_FF, D), f32) / math.sqrt(D)
        b1 = jax.random.normal(next(ks), (DIM_FF,), f32) * 0.05
        w2 = jax.random.normal(next(ks), (D, DIM_FF), f32) / math.sqrt(DIM_FF)
        b2 = jax.random.normal(next(ks), (D,), f32) * 0.05
        # lane-dense bf16 FFN slab: rows 0:D = W1^T (D,FF), rows D:2D = W2 (D,FF)
        wff_list.append(jnp.concatenate([w1.T, w2], axis=0).astype(jnp.bfloat16))
        b1_list.append(b1[None, :])
        pslab = pslab.at[vec + 6, 0:D].set(b2)

    # regressor (transposed weights); biases zero per PyTorch init
    r1 = _kaiming(next(ks), 16, D)
    r2 = _kaiming(next(ks), 8, 16)
    r3 = _kaiming(next(ks), 2, 8)
    pslab = pslab.at[REG_BASE + 0:REG_BASE + 8, 0:16].set(r1.T)
    pslab = pslab.at[REG_BASE + 8:REG_BASE + 24, 0:8].set(r2.T)
    pslab = pslab.at[REG_BASE + 24:REG_BASE + 32, 0:2].set(r3.T)

    return {
        "pslab": pslab,                         # (136, 16) f32
        "wff": jnp.stack(wff_list),             # (L, 16, FF) bf16
        "b1": jnp.stack(b1_list),               # (L, 1, FF) f32
    }


# --------------------------------- wrapper -----------------------------------
@jax.jit
def transformer_forward(params, ego, agents, speed_limit, agent_mask):
    f32 = jnp.float32
    B = ego.shape[0]
    T = NUM_TOKENS
    N = B * T

    ego = ego.astype(f32)
    agents = agents.astype(f32)
    speed_limit = speed_limit.astype(f32)

    bid = jnp.broadcast_to(jnp.arange(B, dtype=f32)[:, None], (B, T))

    # ---- layout plumbing only: build the fused (N, 16) raw feature slab ----
    raw = jnp.zeros((B, T, RAW_COLS), f32)
    raw = raw.at[:, 0, 0:3].set(ego)
    raw = raw.at[:, 0, 3].set(1.0)
    raw = raw.at[:, 1:1 + MAX_AGENTS, 4:7].set(agents)
    raw = raw.at[:, 1:1 + MAX_AGENTS, 7].set(1.0)
    raw = raw.at[:, T - 1, 8].set(speed_limit[:, 0])
    raw = raw.at[:, T - 1, 9].set(1.0)
    raw = raw.at[:, :, COL_BID].set(bid)
    raw = raw.reshape(N, RAW_COLS)

    # additive key-padding values per key (ego / speed tokens never masked)
    kpm = jnp.zeros((B, T), f32)
    kpm = kpm.at[:, 1:1 + MAX_AGENTS].set(
        jnp.where(agent_mask, 0.0, NEG_INF).astype(f32))
    aux = jnp.stack([kpm.reshape(N), bid.reshape(N)], axis=0)   # (2, N)

    vmem = pltpu.MemorySpace.VMEM
    args = (raw, aux, params["pslab"], params["wff"], params["b1"])
    # Gridless, fully VMEM-resident (<1 MiB).  TODO(synk): for v7x / large B,
    # add a parallel batch grid axis (per-batch (T,T) scores) for 2-core use.
    return pl.pallas_call(
        transformer_kernel,
        out_shape=jax.ShapeDtypeStruct((B, 2), jnp.float32),
        in_specs=[pl.BlockSpec(memory_space=vmem)] * len(args),
        out_specs=pl.BlockSpec(memory_space=vmem),
    )(*args)


if __name__ == "__main__":
    key = jax.random.PRNGKey(0)
    pkey, dkey = jax.random.split(key)
    params = init_params(pkey)

    B = 2
    k1, k2, k3 = jax.random.split(dkey, 3)
    ego = jax.random.normal(k1, (B, 3), jnp.float32)
    agents = jax.random.normal(k2, (B, MAX_AGENTS, 3), jnp.float32)
    speed_limit = jax.random.normal(k3, (B, 1), jnp.float32)
    # first 6 agents valid in batch 0, first 3 valid in batch 1
    agent_mask = jnp.arange(MAX_AGENTS)[None, :] < jnp.array([[6], [3]])

    out = transformer_forward(params, ego, agents, speed_limit, agent_mask)
    out = jax.block_until_ready(out)
    assert out.shape == (B, 2)
    assert bool(jnp.all(jnp.isfinite(out)))
    print("KERNEL_OK")
</pallas_src>

<mosaic_0001>
module attributes {stable_mosaic.version = 11 : i64} {
  func.func @transformer_kernel(%arg0: memref<24x16xf32, #tpu.memory_space<vmem>>, %arg1: memref<2x24xf32, #tpu.memory_space<vmem>>, %arg2: memref<136x16xf32, #tpu.memory_space<vmem>>, %arg3: memref<2x16x2048xbf16, #tpu.memory_space<vmem>>, %arg4: memref<2x1x2048xf32, #tpu.memory_space<vmem>>, %arg5: memref<2x2xf32, #tpu.memory_space<vmem>>) attributes {dimension_semantics = [], scalar_prefetch = 0 : i64, scratch_operands = 0 : i64, tpu.core_type = #tpu.core_type<tc>} {
    %c0 = arith.constant 0 : index
    %c0_0 = arith.constant 0 : index
    %0 = vector.load %arg0[%c0, %c0_0] : memref<24x16xf32, #tpu.memory_space<vmem>>, vector<24x16xf32>
    %c0_1 = arith.constant 0 : index
    %c0_2 = arith.constant 0 : index
    %1 = vector.load %arg1[%c0_1, %c0_2] : memref<2x24xf32, #tpu.memory_space<vmem>>, vector<1x24xf32>
    %c1 = arith.constant 1 : index
    %c0_3 = arith.constant 0 : index
    %2 = vector.load %arg1[%c1, %c0_3] : memref<2x24xf32, #tpu.memory_space<vmem>>, vector<1x24xf32>
    %c0_4 = arith.constant 0 : index
    %c10 = arith.constant 10 : index
    %3 = vector.load %arg0[%c0_4, %c10] : memref<24x16xf32, #tpu.memory_space<vmem>>, vector<24x1xf32>
    %4 = vector.broadcast %3 : vector<24x1xf32> to vector<24x24xf32>
    %5 = vector.broadcast %2 : vector<1x24xf32> to vector<24x24xf32>
    %6 = arith.cmpf oeq, %4, %5 : vector<24x24xf32>
    %cst = arith.constant -1.000000e+30 : f32
    %7 = vector.shape_cast %1 : vector<1x24xf32> to vector<1x24xf32>
    %8 = vector.broadcast %7 : vector<1x24xf32> to vector<24x24xf32>
    %9 = vector.broadcast %cst : f32 to vector<24x24xf32>
    %10 = arith.select %6, %8, %9 : vector<24x24xi1>, vector<24x24xf32>
    %c0_5 = arith.constant 0 : index
    %c0_6 = arith.constant 0 : index
    %11 = vector.load %arg2[%c0_5, %c0_6] : memref<136x16xf32, #tpu.memory_space<vmem>>, vector<16x8xf32>
    %cst_7 = arith.constant dense<0.000000e+00> : vector<24x8xf32>
    %12 = tpu.matmul %0, %11, %cst_7 {dimension_numbers = #tpu.dot_dimension_numbers<[1], [0], [0], [1], [0, 0, 1, 1], [], []>} : vector<24x16xf32>, vector<16x8xf32>, vector<24x8xf32> -> vector<24x8xf32>
    %13 = tpu.iota {dimensions = array<i32: 1>} : vector<1x8xi32>
    %c0_i32 = arith.constant 0 : i32
    %14 = vector.broadcast %c0_i32 : i32 to vector<1x8xi32>
    %15 = arith.cmpi sge, %13, %14 : vector<1x8xi32>
    %c4_i32 = arith.constant 4 : i32
    %16 = vector.broadcast %c4_i32 : i32 to vector<1x8xi32>
    %17 = arith.cmpi slt, %13, %16 : vector<1x8xi32>
    %18 = arith.andi %15, %17 : vector<1x8xi1>
    %19 = arith.extui %18 : vector<1x8xi1> to vector<1x8xi32>
    %20 = arith.sitofp %19 : vector<1x8xi32> to vector<1x8xf32>
    %c4_i32_8 = arith.constant 4 : i32
    %21 = vector.broadcast %c4_i32_8 : i32 to vector<1x8xi32>
    %22 = arith.cmpi sge, %13, %21 : vector<1x8xi32>
    %c8_i32 = arith.constant 8 : i32
    %23 = vector.broadcast %c8_i32 : i32 to vector<1x8xi32>
    %24 = arith.cmpi slt, %13, %23 : vector<1x8xi32>
    %25 = arith.andi %22, %24 : vector<1x8xi1>
    %26 = arith.extui %25 : vector<1x8xi1> to vector<1x8xi32>
    %27 = arith.sitofp %26 : vector<1x8xi32> to vector<1x8xf32>
    %c16 = arith.constant 16 : index
    %c0_9 = arith.constant 0 : index
    %28 = vector.load %arg2[%c16, %c0_9] : memref<136x16xf32, #tpu.memory_space<vmem>>, vector<8x8xf32>
    %c24 = arith.constant 24 : index
    %c0_10 = arith.constant 0 : index
    %29 = vector.load %arg2[%c24, %c0_10] : memref<136x16xf32, #tpu.memory_space<vmem>>, vector<8x8xf32>
    %c48 = arith.constant 48 : index
    %c0_11 = arith.constant 0 : index
    %30 = vector.load %arg2[%c48, %c0_11] : memref<136x16xf32, #tpu.memory_space<vmem>>, vector<1x8xf32>
    %c49 = arith.constant 49 : index
    %c0_12 = arith.constant 0 : index
    %31 = vector.load %arg2[%c49, %c0_12] : memref<136x16xf32, #tpu.memory_space<vmem>>, vector<1x8xf32>
    %c50 = arith.constant 50 : index
    %c0_13 = arith.constant 0 : index
    %32 = vector.load %arg2[%c50, %c0_13] : memref<136x16xf32, #tpu.memory_space<vmem>>, vector<1x8xf32>
    %c51 = arith.constant 51 : index
    %c0_14 = arith.constant 0 : index
    %33 = vector.load %arg2[%c51, %c0_14] : memref<136x16xf32, #tpu.memory_space<vmem>>, vector<1x8xf32>
    %c52 = arith.constant 52 : index
    %c0_15 = arith.constant 0 : index
    %34 = vector.load %arg2[%c52, %c0_15] : memref<136x16xf32, #tpu.memory_space<vmem>>, vector<1x8xf32>
    %c53 = arith.constant 53 : index
    %c0_16 = arith.constant 0 : index
    %35 = vector.load %arg2[%c53, %c0_16] : memref<136x16xf32, #tpu.memory_space<vmem>>, vector<1x8xf32>
    %c54 = arith.constant 54 : index
    %c0_17 = arith.constant 0 : index
    %36 = vector.load %arg2[%c54, %c0_17] : memref<136x16xf32, #tpu.memory_space<vmem>>, vector<1x8xf32>
    %cst_18 = arith.constant dense<0.000000e+00> : vector<24x8xf32>
    %37 = tpu.matmul %12, %28, %cst_18 {dimension_numbers = #tpu.dot_dimension_numbers<[1], [0], [0], [1], [0, 0, 1, 1], [], []>} : vector<24x8xf32>, vector<8x8xf32>, vector<24x8xf32> -> vector<24x8xf32>
    %38 = vector.broadcast %30 : vector<1x8xf32> to vector<24x8xf32>
    %39 = arith.addf %37, %38 : vector<24x8xf32>
    %cst_19 = arith.constant dense<0.000000e+00> : vector<24x8xf32>
    %40 = tpu.matmul %12, %29, %cst_19 {dimension_numbers = #tpu.dot_dimension_numbers<[1], [0], [0], [1], [0, 0, 1, 1], [], []>} : vector<24x8xf32>, vector<8x8xf32>, vector<24x8xf32> -> vector<24x8xf32>
    %cst_20 = arith.constant 0.000000e+00 : f32
    %41 = vector.broadcast %cst_20 : f32 to vector<24x8xf32>
    %c32 = arith.constant 32 : index
    %c0_21 = arith.constant 0 : index
    %42 = vector.load %arg2[%c32, %c0_21] : memref<136x16xf32, #tpu.memory_space<vmem>>, vector<8x8xf32>
    %43 = vector.broadcast %20 : vector<1x8xf32> to vector<24x8xf32>
    %44 = arith.mulf %39, %43 : vector<24x8xf32>
    %cst_22 = arith.constant dense<0.000000e+00> : vector<24x24xf32>
    %45 = tpu.matmul %44, %40, %cst_22 {dimension_numbers = #tpu.dot_dimension_numbers<[1], [1], [0], [0], [0, 0, 1, 0], [], []>} : vector<24x8xf32>, vector<24x8xf32>, vector<24x24xf32> -> vector<24x24xf32>
    %46 = arith.addf %45, %10 : vector<24x24xf32>
    %cst_23 = arith.constant dense<0xFF800000> : vector<24xf32>
    %47 = vector.multi_reduction <maximumf>, %46, %cst_23 [1] : vector<24x24xf32> to vector<24xf32>
    %48 = vector.shape_cast %47 : vector<24xf32> to vector<24x1xf32>
    %49 = vector.broadcast %48 : vector<24x1xf32> to vector<24x24xf32>
    %50 = arith.subf %46, %49 : vector<24x24xf32>
    %51 = math.exp %50 : vector<24x24xf32>
    %cst_24 = arith.constant dense<0.000000e+00> : vector<24xf32>
    %52 = vector.multi_reduction <add>, %51, %cst_24 [1] : vector<24x24xf32> to vector<24xf32>
    %53 = vector.shape_cast %52 : vector<24xf32> to vector<24x1xf32>
    %54 = tpu.reciprocal %53 {approx = true} : vector<24x1xf32> -> vector<24x1xf32>
    %55 = vector.broadcast %54 : vector<24x1xf32> to vector<24x24xf32>
    %56 = arith.mulf %51, %55 : vector<24x24xf32>
    %cst_25 = arith.constant dense<0.000000e+00> : vector<24x8xf32>
    %57 = tpu.matmul %12, %42, %cst_25 {dimension_numbers = #tpu.dot_dimension_numbers<[1], [0], [0], [1], [0, 0, 1, 1], [], []>} : vector<24x8xf32>, vector<8x8xf32>, vector<24x8xf32> -> vector<24x8xf32>
    %cst_26 = arith.constant dense<0.000000e+00> : vector<24x8xf32>
    %58 = tpu.matmul %56, %57, %cst_26 {dimension_numbers = #tpu.dot_dimension_numbers<[1], [0], [0], [1], [0, 0, 1, 1], [], []>} : vector<24x24xf32>, vector<24x8xf32>, vector<24x8xf32> -> vector<24x8xf32>
    %59 = arith.addf %41, %58 : vector<24x8xf32>
    %c40 = arith.constant 40 : index
    %c0_27 = arith.constant 0 : index
    %60 = vector.load %arg2[%c40, %c0_27] : memref<136x16xf32, #tpu.memory_space<vmem>>, vector<8x8xf32>
    %61 = vector.broadcast %27 : vector<1x8xf32> to vector<24x8xf32>
    %62 = arith.mulf %39, %61 : vector<24x8xf32>
    %cst_28 = arith.constant dense<0.000000e+00> : vector<24x24xf32>
    %63 = tpu.matmul %62, %40, %cst_28 {dimension_numbers = #tpu.dot_dimension_numbers<[1], [1], [0], [0], [0, 0, 1, 0], [], []>} : vector<24x8xf32>, vector<24x8xf32>, vector<24x24xf32> -> vector<24x24xf32>
    %64 = arith.addf %63, %10 : vector<24x24xf32>
    %cst_29 = arith.constant dense<0xFF800000> : vector<24xf32>
    %65 = vector.multi_reduction <maximumf>, %64, %cst_29 [1] : vector<24x24xf32> to vector<24xf32>
    %66 = vector.shape_cast %65 : vector<24xf32> to vector<24x1xf32>
    %67 = vector.broadcast %66 : vector<24x1xf32> to vector<24x24xf32>
    %68 = arith.subf %64, %67 : vector<24x24xf32>
    %69 = math.exp %68 : vector<24x24xf32>
    %cst_30 = arith.constant dense<0.000000e+00> : vector<24xf32>
    %70 = vector.multi_reduction <add>, %69, %cst_30 [1] : vector<24x24xf32> to vector<24xf32>
    %71 = vector.shape_cast %70 : vector<24xf32> to vector<24x1xf32>
    %72 = tpu.reciprocal %71 {approx = true} : vector<24x1xf32> -> vector<24x1xf32>
    %73 = vector.broadcast %72 : vector<24x1xf32> to vector<24x24xf32>
    %74 = arith.mulf %69, %73 : vector<24x24xf32>
    %cst_31 = arith.constant dense<0.000000e+00> : vector<24x8xf32>
    %75 = tpu.matmul %12, %60, %cst_31 {dimension_numbers = #tpu.dot_dimension_numbers<[1], [0], [0], [1], [0, 0, 1, 1], [], []>} : vector<24x8xf32>, vector<8x8xf32>, vector<24x8xf32> -> vector<24x8xf32>
    %cst_32 = arith.constant dense<0.000000e+00> : vector<24x8xf32>
    %76 = tpu.matmul %74, %75, %cst_32 {dimension_numbers = #tpu.dot_dimension_numbers<[1], [0], [0], [1], [0, 0, 1, 1], [], []>} : vector<24x24xf32>, vector<24x8xf32>, vector<24x8xf32> -> vector<24x8xf32>
    %77 = arith.addf %59, %76 : vector<24x8xf32>
    %78 = vector.broadcast %31 : vector<1x8xf32> to vector<24x8xf32>
    %79 = arith.addf %77, %78 : vector<24x8xf32>
    %80 = arith.addf %12, %79 : vector<24x8xf32>
    %cst_33 = arith.constant dense<0.000000e+00> : vector<24xf32>
    %81 = vector.multi_reduction <add>, %80, %cst_33 [1] : vector<24x8xf32> to vector<24xf32>
    %82 = vector.shape_cast %81 : vector<24xf32> to vector<24x1xf32>
    %cst_34 = arith.constant 8.000000e+00 : f32
    %83 = vector.broadcast %cst_34 : f32 to vector<24x1xf32>
    %84 = arith.divf %82, %83 : vector<24x1xf32>
    %85 = vector.broadcast %84 : vector<24x1xf32> to vector<24x8xf32>
    %86 = arith.subf %80, %85 : vector<24x8xf32>
    %87 = arith.mulf %86, %86 : vector<24x8xf32>
    %cst_35 = arith.constant dense<0.000000e+00> : vector<24xf32>
    %88 = vector.multi_reduction <add>, %87, %cst_35 [1] : vector<24x8xf32> to vector<24xf32>
    %89 = vector.shape_cast %88 : vector<24xf32> to vector<24x1xf32>
    %cst_36 = arith.constant 8.000000e+00 : f32
    %90 = vector.broadcast %cst_36 : f32 to vector<24x1xf32>
    %91 = arith.divf %89, %90 : vector<24x1xf32>
    %cst_37 = arith.constant 9.99999974E-6 : f32
    %92 = vector.broadcast %cst_37 : f32 to vector<24x1xf32>
    %93 = arith.addf %91, %92 : vector<24x1xf32>
    %94 = math.rsqrt %93 : vector<24x1xf32>
    %95 = vector.broadcast %94 : vector<24x1xf32> to vector<24x8xf32>
    %96 = arith.mulf %86, %95 : vector<24x8xf32>
    %97 = vector.broadcast %32 : vector<1x8xf32> to vector<24x8xf32>
    %98 = arith.mulf %96, %97 : vector<24x8xf32>
    %99 = vector.broadcast %33 : vector<1x8xf32> to vector<24x8xf32>
    %100 = arith.addf %98, %99 : vector<24x8xf32>
    %c0_38 = arith.constant 0 : index
    %c0_39 = arith.constant 0 : index
    %c0_40 = arith.constant 0 : index
    %101 = vector.load %arg3[%c0_38, %c0_39, %c0_40] : memref<2x16x2048xbf16, #tpu.memory_space<vmem>>, vector<1x8x2048xbf16>
    %102 = vector.shape_cast %101 : vector<1x8x2048xbf16> to vector<8x2048xbf16>
    %c0_41 = arith.constant 0 : index
    %c8 = arith.constant 8 : index
    %c0_42 = arith.constant 0 : index
    %103 = vector.load %arg3[%c0_41, %c8, %c0_42] : memref<2x16x2048xbf16, #tpu.memory_space<vmem>>, vector<1x8x2048xbf16>
    %104 = vector.shape_cast %103 : vector<1x8x2048xbf16> to vector<8x2048xbf16>
    %105 = arith.truncf %100 : vector<24x8xf32> to vector<24x8xbf16>
    %cst_43 = arith.constant dense<0.000000e+00> : vector<24x2048xf32>
    %106 = tpu.matmul %105, %102, %cst_43 {dimension_numbers = #tpu.dot_dimension_numbers<[1], [0], [0], [1], [0, 0, 1, 1], [], []>} : vector<24x8xbf16>, vector<8x2048xbf16>, vector<24x2048xf32> -> vector<24x2048xf32>
    %c0_44 = arith.constant 0 : index
    %c0_45 = arith.constant 0 : index
    %c0_46 = arith.constant 0 : index
    %107 = vector.load %arg4[%c0_44, %c0_45, %c0_46] : memref<2x1x2048xf32, #tpu.memory_space<vmem>>, vector<1x1x2048xf32>
    %108 = vector.shape_cast %107 : vector<1x1x2048xf32> to vector<1x2048xf32>
    %109 = vector.broadcast %108 : vector<1x2048xf32> to vector<24x2048xf32>
    %110 = arith.addf %106, %109 : vector<24x2048xf32>
    %cst_47 = arith.constant 0.000000e+00 : f32
    %111 = vector.broadcast %cst_47 : f32 to vector<24x2048xf32>
    %112 = arith.maximumf %110, %111 : vector<24x2048xf32>
    %113 = arith.truncf %112 : vector<24x2048xf32> to vector<24x2048xbf16>
    %cst_48 = arith.constant dense<0.000000e+00> : vector<24x8xf32>
    %114 = tpu.matmul %113, %104, %cst_48 {dimension_numbers = #tpu.dot_dimension_numbers<[1], [1], [0], [0], [0, 0, 1, 0], [], []>} : vector<24x2048xbf16>, vector<8x2048xbf16>, vector<24x8xf32> -> vector<24x8xf32>
    %115 = vector.broadcast %36 : vector<1x8xf32> to vector<24x8xf32>
    %116 = arith.addf %114, %115 : vector<24x8xf32>
    %117 = arith.addf %100, %116 : vector<24x8xf32>
    %cst_49 = arith.constant dense<0.000000e+00> : vector<24xf32>
    %118 = vector.multi_reduction <add>, %117, %cst_49 [1] : vector<24x8xf32> to vector<24xf32>
    %119 = vector.shape_cast %118 : vector<24xf32> to vector<24x1xf32>
    %cst_50 = arith.constant 8.000000e+00 : f32
    %120 = vector.broadcast %cst_50 : f32 to vector<24x1xf32>
    %121 = arith.divf %119, %120 : vector<24x1xf32>
    %122 = vector.broadcast %121 : vector<24x1xf32> to vector<24x8xf32>
    %123 = arith.subf %117, %122 : vector<24x8xf32>
    %124 = arith.mulf %123, %123 : vector<24x8xf32>
    %cst_51 = arith.constant dense<0.000000e+00> : vector<24xf32>
    %125 = vector.multi_reduction <add>, %124, %cst_51 [1] : vector<24x8xf32> to vector<24xf32>
    %126 = vector.shape_cast %125 : vector<24xf32> to vector<24x1xf32>
    %cst_52 = arith.constant 8.000000e+00 : f32
    %127 = vector.broadcast %cst_52 : f32 to vector<24x1xf32>
    %128 = arith.divf %126, %127 : vector<24x1xf32>
    %cst_53 = arith.constant 9.99999974E-6 : f32
    %129 = vector.broadcast %cst_53 : f32 to vector<24x1xf32>
    %130 = arith.addf %128, %129 : vector<24x1xf32>
    %131 = math.rsqrt %130 : vector<24x1xf32>
    %132 = vector.broadcast %131 : vector<24x1xf32> to vector<24x8xf32>
    %133 = arith.mulf %123, %132 : vector<24x8xf32>
    %134 = vector.broadcast %34 : vector<1x8xf32> to vector<24x8xf32>
    %135 = arith.mulf %133, %134 : vector<24x8xf32>
    %136 = vector.broadcast %35 : vector<1x8xf32> to vector<24x8xf32>
    %137 = arith.addf %135, %136 : vector<24x8xf32>
    %c56 = arith.constant 56 : index
    %c0_54 = arith.constant 0 : index
    %138 = vector.load %arg2[%c56, %c0_54] : memref<136x16xf32, #tpu.memory_space<vmem>>, vector<8x8xf32>
    %c64 = arith.constant 64 : index
    %c0_55 = arith.constant 0 : index
    %139 = vector.load %arg2[%c64, %c0_55] : memref<136x16xf32, #tpu.memory_space<vmem>>, vector<8x8xf32>
    %c88 = arith.constant 88 : index
    %c0_56 = arith.constant 0 : index
    %140 = vector.load %arg2[%c88, %c0_56] : memref<136x16xf32, #tpu.memory_space<vmem>>, vector<1x8xf32>
    %c89 = arith.constant 89 : index
    %c0_57 = arith.constant 0 : index
    %141 = vector.load %arg2[%c89, %c0_57] : memref<136x16xf32, #tpu.memory_space<vmem>>, vector<1x8xf32>
    %c90 = arith.constant 90 : index
    %c0_58 = arith.constant 0 : index
    %142 = vector.load %arg2[%c90, %c0_58] : memref<136x16xf32, #tpu.memory_space<vmem>>, vector<1x8xf32>
    %c91 = arith.constant 91 : index
    %c0_59 = arith.constant 0 : index
    %143 = vector.load %arg2[%c91, %c0_59] : memref<136x16xf32, #tpu.memory_space<vmem>>, vector<1x8xf32>
    %c92 = arith.constant 92 : index
    %c0_60 = arith.constant 0 : index
    %144 = vector.load %arg2[%c92, %c0_60] : memref<136x16xf32, #tpu.memory_space<vmem>>, vector<1x8xf32>
    %c93 = arith.constant 93 : index
    %c0_61 = arith.constant 0 : index
    %145 = vector.load %arg2[%c93, %c0_61] : memref<136x16xf32, #tpu.memory_space<vmem>>, vector<1x8xf32>
    %c94 = arith.constant 94 : index
    %c0_62 = arith.constant 0 : index
    %146 = vector.load %arg2[%c94, %c0_62] : memref<136x16xf32, #tpu.memory_space<vmem>>, vector<1x8xf32>
    %cst_63 = arith.constant dense<0.000000e+00> : vector<24x8xf32>
    %147 = tpu.matmul %137, %138, %cst_63 {dimension_numbers = #tpu.dot_dimension_numbers<[1], [0], [0], [1], [0, 0, 1, 1], [], []>} : vector<24x8xf32>, vector<8x8xf32>, vector<24x8xf32> -> vector<24x8xf32>
    %148 = vector.broadcast %140 : vector<1x8xf32> to vector<24x8xf32>
    %149 = arith.addf %147, %148 : vector<24x8xf32>
    %cst_64 = arith.constant dense<0.000000e+00> : vector<24x8xf32>
    %150 = tpu.matmul %137, %139, %cst_64 {dimension_numbers = #tpu.dot_dimension_numbers<[1], [0], [0], [1], [0, 0, 1, 1], [], []>} : vector<24x8xf32>, vector<8x8xf32>, vector<24x8xf32> -> vector<24x8xf32>
    %cst_65 = arith.constant 0.000000e+00 : f32
    %151 = vector.broadcast %cst_65 : f32 to vector<24x8xf32>
    %c72 = arith.constant 72 : index
    %c0_66 = arith.constant 0 : index
    %152 = vector.load %arg2[%c72, %c0_66] : memref<136x16xf32, #tpu.memory_space<vmem>>, vector<8x8xf32>
    %153 = vector.broadcast %20 : vector<1x8xf32> to vector<24x8xf32>
    %154 = arith.mulf %149, %153 : vector<24x8xf32>
    %cst_67 = arith.constant dense<0.000000e+00> : vector<24x24xf32>
    %155 = tpu.matmul %154, %150, %cst_67 {dimension_numbers = #tpu.dot_dimension_numbers<[1], [1], [0], [0], [0, 0, 1, 0], [], []>} : vector<24x8xf32>, vector<24x8xf32>, vector<24x24xf32> -> vector<24x24xf32>
    %156 = arith.addf %155, %10 : vector<24x24xf32>
    %cst_68 = arith.constant dense<0xFF800000> : vector<24xf32>
    %157 = vector.multi_reduction <maximumf>, %156, %cst_68 [1] : vector<24x24xf32> to vector<24xf32>
    %158 = vector.shape_cast %157 : vector<24xf32> to vector<24x1xf32>
    %159 = vector.broadcast %158 : vector<24x1xf32> to vector<24x24xf32>
    %160 = arith.subf %156, %159 : vector<24x24xf32>
    %161 = math.exp %160 : vector<24x24xf32>
    %cst_69 = arith.constant dense<0.000000e+00> : vector<24xf32>
    %162 = vector.multi_reduction <add>, %161, %cst_69 [1] : vector<24x24xf32> to vector<24xf32>
    %163 = vector.shape_cast %162 : vector<24xf32> to vector<24x1xf32>
    %164 = tpu.reciprocal %163 {approx = true} : vector<24x1xf32> -> vector<24x1xf32>
    %165 = vector.broadcast %164 : vector<24x1xf32> to vector<24x24xf32>
    %166 = arith.mulf %161, %165 : vector<24x24xf32>
    %cst_70 = arith.constant dense<0.000000e+00> : vector<24x8xf32>
    %167 = tpu.matmul %137, %152, %cst_70 {dimension_numbers = #tpu.dot_dimension_numbers<[1], [0], [0], [1], [0, 0, 1, 1], [], []>} : vector<24x8xf32>, vector<8x8xf32>, vector<24x8xf32> -> vector<24x8xf32>
    %cst_71 = arith.constant dense<0.000000e+00> : vector<24x8xf32>
    %168 = tpu.matmul %166, %167, %cst_71 {dimension_numbers = #tpu.dot_dimension_numbers<[1], [0], [0], [1], [0, 0, 1, 1], [], []>} : vector<24x24xf32>, vector<24x8xf32>, vector<24x8xf32> -> vector<24x8xf32>
    %169 = arith.addf %151, %168 : vector<24x8xf32>
    %c80 = arith.constant 80 : index
    %c0_72 = arith.constant 0 : index
    %170 = vector.load %arg2[%c80, %c0_72] : memref<136x16xf32, #tpu.memory_space<vmem>>, vector<8x8xf32>
    %171 = vector.broadcast %27 : vector<1x8xf32> to vector<24x8xf32>
    %172 = arith.mulf %149, %171 : vector<24x8xf32>
    %cst_73 = arith.constant dense<0.000000e+00> : vector<24x24xf32>
    %173 = tpu.matmul %172, %150, %cst_73 {dimension_numbers = #tpu.dot_dimension_numbers<[1], [1], [0], [0], [0, 0, 1, 0], [], []>} : vector<24x8xf32>, vector<24x8xf32>, vector<24x24xf32> -> vector<24x24xf32>
    %174 = arith.addf %173, %10 : vector<24x24xf32>
    %cst_74 = arith.constant dense<0xFF800000> : vector<24xf32>
    %175 = vector.multi_reduction <maximumf>, %174, %cst_74 [1] : vector<24x24xf32> to vector<24xf32>
    %176 = vector.shape_cast %175 : vector<24xf32> to vector<24x1xf32>
    %177 = vector.broadcast %176 : vector<24x1xf32> to vector<24x24xf32>
    %178 = arith.subf %174, %177 : vector<24x24xf32>
    %179 = math.exp %178 : vector<24x24xf32>
    %cst_75 = arith.constant dense<0.000000e+00> : vector<24xf32>
    %180 = vector.multi_reduction <add>, %179, %cst_75 [1] : vector<24x24xf32> to vector<24xf32>
    %181 = vector.shape_cast %180 : vector<24xf32> to vector<24x1xf32>
    %182 = tpu.reciprocal %181 {approx = true} : vector<24x1xf32> -> vector<24x1xf32>
    %183 = vector.broadcast %182 : vector<24x1xf32> to vector<24x24xf32>
    %184 = arith.mulf %179, %183 : vector<24x24xf32>
    %cst_76 = arith.constant dense<0.000000e+00> : vector<24x8xf32>
    %185 = tpu.matmul %137, %170, %cst_76 {dimension_numbers = #tpu.dot_dimension_numbers<[1], [0], [0], [1], [0, 0, 1, 1], [], []>} : vector<24x8xf32>, vector<8x8xf32>, vector<24x8xf32> -> vector<24x8xf32>
    %cst_77 = arith.constant dense<0.000000e+00> : vector<24x8xf32>
    %186 = tpu.matmul %184, %185, %cst_77 {dimension_numbers = #tpu.dot_dimension_numbers<[1], [0], [0], [1], [0, 0, 1, 1], [], []>} : vector<24x24xf32>, vector<24x8xf32>, vector<24x8xf32> -> vector<24x8xf32>
    %187 = arith.addf %169, %186 : vector<24x8xf32>
    %188 = vector.broadcast %141 : vector<1x8xf32> to vector<24x8xf32>
    %189 = arith.addf %187, %188 : vector<24x8xf32>
    %190 = arith.addf %137, %189 : vector<24x8xf32>
    %cst_78 = arith.constant dense<0.000000e+00> : vector<24xf32>
    %191 = vector.multi_reduction <add>, %190, %cst_78 [1] : vector<24x8xf32> to vector<24xf32>
    %192 = vector.shape_cast %191 : vector<24xf32> to vector<24x1xf32>
    %cst_79 = arith.constant 8.000000e+00 : f32
    %193 = vector.broadcast %cst_79 : f32 to vector<24x1xf32>
    %194 = arith.divf %192, %193 : vector<24x1xf32>
    %195 = vector.broadcast %194 : vector<24x1xf32> to vector<24x8xf32>
    %196 = arith.subf %190, %195 : vector<24x8xf32>
    %197 = arith.mulf %196, %196 : vector<24x8xf32>
    %cst_80 = arith.constant dense<0.000000e+00> : vector<24xf32>
    %198 = vector.multi_reduction <add>, %197, %cst_80 [1] : vector<24x8xf32> to vector<24xf32>
    %199 = vector.shape_cast %198 : vector<24xf32> to vector<24x1xf32>
    %cst_81 = arith.constant 8.000000e+00 : f32
    %200 = vector.broadcast %cst_81 : f32 to vector<24x1xf32>
    %201 = arith.divf %199, %200 : vector<24x1xf32>
    %cst_82 = arith.constant 9.99999974E-6 : f32
    %202 = vector.broadcast %cst_82 : f32 to vector<24x1xf32>
    %203 = arith.addf %201, %202 : vector<24x1xf32>
    %204 = math.rsqrt %203 : vector<24x1xf32>
    %205 = vector.broadcast %204 : vector<24x1xf32> to vector<24x8xf32>
    %206 = arith.mulf %196, %205 : vector<24x8xf32>
    %207 = vector.broadcast %142 : vector<1x8xf32> to vector<24x8xf32>
    %208 = arith.mulf %206, %207 : vector<24x8xf32>
    %209 = vector.broadcast %143 : vector<1x8xf32> to vector<24x8xf32>
    %210 = arith.addf %208, %209 : vector<24x8xf32>
    %c1_83 = arith.constant 1 : index
    %c0_84 = arith.constant 0 : index
    %c0_85 = arith.constant 0 : index
    %211 = vector.load %arg3[%c1_83, %c0_84, %c0_85] : memref<2x16x2048xbf16, #tpu.memory_space<vmem>>, vector<1x8x2048xbf16>
    %212 = vector.shape_cast %211 : vector<1x8x2048xbf16> to vector<8x2048xbf16>
    %c1_86 = arith.constant 1 : index
    %c8_87 = arith.constant 8 : index
    %c0_88 = arith.constant 0 : index
    %213 = vector.load %arg3[%c1_86, %c8_87, %c0_88] : memref<2x16x2048xbf16, #tpu.memory_space<vmem>>, vector<1x8x2048xbf16>
    %214 = vector.shape_cast %213 : vector<1x8x2048xbf16> to vector<8x2048xbf16>
    %215 = arith.truncf %210 : vector<24x8xf32> to vector<24x8xbf16>
    %cst_89 = arith.constant dense<0.000000e+00> : vector<24x2048xf32>
    %216 = tpu.matmul %215, %212, %cst_89 {dimension_numbers = #tpu.dot_dimension_numbers<[1], [0], [0], [1], [0, 0, 1, 1], [], []>} : vector<24x8xbf16>, vector<8x2048xbf16>, vector<24x2048xf32> -> vector<24x2048xf32>
    %c1_90 = arith.constant 1 : index
    %c0_91 = arith.constant 0 : index
    %c0_92 = arith.constant 0 : index
    %217 = vector.load %arg4[%c1_90, %c0_91, %c0_92] : memref<2x1x2048xf32, #tpu.memory_space<vmem>>, vector<1x1x2048xf32>
    %218 = vector.shape_cast %217 : vector<1x1x2048xf32> to vector<1x2048xf32>
    %219 = vector.broadcast %218 : vector<1x2048xf32> to vector<24x2048xf32>
    %220 = arith.addf %216, %219 : vector<24x2048xf32>
    %cst_93 = arith.constant 0.000000e+00 : f32
    %221 = vector.broadcast %cst_93 : f32 to vector<24x2048xf32>
    %222 = arith.maximumf %220, %221 : vector<24x2048xf32>
    %223 = arith.truncf %222 : vector<24x2048xf32> to vector<24x2048xbf16>
    %cst_94 = arith.constant dense<0.000000e+00> : vector<24x8xf32>
    %224 = tpu.matmul %223, %214, %cst_94 {dimension_numbers = #tpu.dot_dimension_numbers<[1], [1], [0], [0], [0, 0, 1, 0], [], []>} : vector<24x2048xbf16>, vector<8x2048xbf16>, vector<24x8xf32> -> vector<24x8xf32>
    %225 = vector.broadcast %146 : vector<1x8xf32> to vector<24x8xf32>
    %226 = arith.addf %224, %225 : vector<24x8xf32>
    %227 = arith.addf %210, %226 : vector<24x8xf32>
    %cst_95 = arith.constant dense<0.000000e+00> : vector<24xf32>
    %228 = vector.multi_reduction <add>, %227, %cst_95 [1] : vector<24x8xf32> to vector<24xf32>
    %229 = vector.shape_cast %228 : vector<24xf32> to vector<24x1xf32>
    %cst_96 = arith.constant 8.000000e+00 : f32
    %230 = vector.broadcast %cst_96 : f32 to vector<24x1xf32>
    %231 = arith.divf %229, %230 : vector<24x1xf32>
    %232 = vector.broadcast %231 : vector<24x1xf32> to vector<24x8xf32>
    %233 = arith.subf %227, %232 : vector<24x8xf32>
    %234 = arith.mulf %233, %233 : vector<24x8xf32>
    %cst_97 = arith.constant dense<0.000000e+00> : vector<24xf32>
    %235 = vector.multi_reduction <add>, %234, %cst_97 [1] : vector<24x8xf32> to vector<24xf32>
    %236 = vector.shape_cast %235 : vector<24xf32> to vector<24x1xf32>
    %cst_98 = arith.constant 8.000000e+00 : f32
    %237 = vector.broadcast %cst_98 : f32 to vector<24x1xf32>
    %238 = arith.divf %236, %237 : vector<24x1xf32>
    %cst_99 = arith.constant 9.99999974E-6 : f32
    %239 = vector.broadcast %cst_99 : f32 to vector<24x1xf32>
    %240 = arith.addf %238, %239 : vector<24x1xf32>
    %241 = math.rsqrt %240 : vector<24x1xf32>
    %242 = vector.broadcast %241 : vector<24x1xf32> to vector<24x8xf32>
    %243 = arith.mulf %233, %242 : vector<24x8xf32>
    %244 = vector.broadcast %144 : vector<1x8xf32> to vector<24x8xf32>
    %245 = arith.mulf %243, %244 : vector<24x8xf32>
    %246 = vector.broadcast %145 : vector<1x8xf32> to vector<24x8xf32>
    %247 = arith.addf %245, %246 : vector<24x8xf32>
    %248 = tpu.iota {dimensions = array<i32: 0>} : vector<2x24xi32>
    %249 = tpu.iota {dimensions = array<i32: 1>} : vector<2x24xi32>
    %c12_i32 = arith.constant 12 : i32
    %250 = vector.broadcast %c12_i32 : i32 to vector<2x24xi32>
    %251 = arith.muli %248, %250 : vector<2x24xi32>
    %252 = arith.cmpi eq, %249, %251 : vector<2x24xi32>
    %253 = arith.extui %252 : vector<2x24xi1> to vector<2x24xi32>
    %254 = arith.sitofp %253 : vector<2x24xi32> to vector<2x24xf32>
    %cst_100 = arith.constant dense<0.000000e+00> : vector<2x8xf32>
    %255 = tpu.matmul %254, %247, %cst_100 {dimension_numbers = #tpu.dot_dimension_numbers<[1], [0], [0], [1], [0, 0, 1, 1], [], []>} : vector<2x24xf32>, vector<24x8xf32>, vector<2x8xf32> -> vector<2x8xf32>
    %c96 = arith.constant 96 : index
    %c0_101 = arith.constant 0 : index
    %256 = vector.load %arg2[%c96, %c0_101] : memref<136x16xf32, #tpu.memory_space<vmem>>, vector<8x16xf32>
    %c104 = arith.constant 104 : index
    %c0_102 = arith.constant 0 : index
    %257 = vector.load %arg2[%c104, %c0_102] : memref<136x16xf32, #tpu.memory_space<vmem>>, vector<16x8xf32>
    %c120 = arith.constant 120 : index
    %c0_103 = arith.constant 0 : index
    %258 = vector.load %arg2[%c120, %c0_103] : memref<136x16xf32, #tpu.memory_space<vmem>>, vector<8x2xf32>
    %c128 = arith.constant 128 : index
    %c0_104 = arith.constant 0 : index
    %259 = vector.load %arg2[%c128, %c0_104] : memref<136x16xf32, #tpu.memory_space<vmem>>, vector<1x16xf32>
    %c129 = arith.constant 129 : index
    %c0_105 = arith.constant 0 : index
    %260 = vector.load %arg2[%c129, %c0_105] : memref<136x16xf32, #tpu.memory_space<vmem>>, vector<1x8xf32>
    %c130 = arith.constant 130 : index
    %c0_106 = arith.constant 0 : index
    %261 = vector.load %arg2[%c130, %c0_106] : memref<136x16xf32, #tpu.memory_space<vmem>>, vector<1x2xf32>
    %cst_107 = arith.constant dense<0.000000e+00> : vector<2x16xf32>
    %262 = tpu.matmul %255, %256, %cst_107 {dimension_numbers = #tpu.dot_dimension_numbers<[1], [0], [0], [1], [0, 0, 1, 1], [], []>} : vector<2x8xf32>, vector<8x16xf32>, vector<2x16xf32> -> vector<2x16xf32>
    %263 = vector.broadcast %259 : vector<1x16xf32> to vector<2x16xf32>
    %264 = arith.addf %262, %263 : vector<2x16xf32>
    %cst_108 = arith.constant 0.000000e+00 : f32
    %265 = vector.broadcast %cst_108 : f32 to vector<2x16xf32>
    %266 = arith.maximumf %264, %265 : vector<2x16xf32>
    %cst_109 = arith.constant dense<0.000000e+00> : vector<2x8xf32>
    %267 = tpu.matmul %266, %257, %cst_109 {dimension_numbers = #tpu.dot_dimension_numbers<[1], [0], [0], [1], [0, 0, 1, 1], [], []>} : vector<2x16xf32>, vector<16x8xf32>, vector<2x8xf32> -> vector<2x8xf32>
    %268 = vector.broadcast %260 : vector<1x8xf32> to vector<2x8xf32>
    %269 = arith.addf %267, %268 : vector<2x8xf32>
    %cst_110 = arith.constant 0.000000e+00 : f32
    %270 = vector.broadcast %cst_110 : f32 to vector<2x8xf32>
    %271 = arith.maximumf %269, %270 : vector<2x8xf32>
    %cst_111 = arith.constant dense<0.000000e+00> : vector<2x2xf32>
    %272 = tpu.matmul %271, %258, %cst_111 {dimension_numbers = #tpu.dot_dimension_numbers<[1], [0], [0], [1], [0, 0, 1, 1], [], []>} : vector<2x8xf32>, vector<8x2xf32>, vector<2x2xf32> -> vector<2x2xf32>
    %273 = vector.broadcast %261 : vector<1x2xf32> to vector<2x2xf32>
    %274 = arith.addf %272, %273 : vector<2x2xf32>
    %c0_112 = arith.constant 0 : index
    %c0_113 = arith.constant 0 : index
    %275 = vector.load %arg5[%c0_112, %c0_113] : memref<2x2xf32, #tpu.memory_space<vmem>>, vector<2x2xf32>
    tpu.vector_store %arg5[%c0_112, %c0_113], %274 {strides = array<i32>} : memref<2x2xf32, #tpu.memory_space<vmem>>, vector<2x2xf32>,
    return
  }
}

</mosaic_0001>

<bundles_post_ra>
// kernel: transformer_forward.1
= control target key start
LH: loop header
LB: loop body
LE: loop exit
PB: predicated region body
PF: predicated region fallthrough
CT: control target
= control target key end

     0   :  { %v5321_v2 = vmov 0.0|0.0   ;;  %vm5322_vm0 = vmmov 0   ;;  %v5323_v4 = vmov 0.0   ;;  %s6226_s0 = inlined_call_operand.vmem [shape: f32[24,16], index: 0, kind: input, shape index: {}]   ;;  %s6227_s1 = inlined_call_operand.vmem [shape: f32[2,24], index: 1, kind: input, shape index: {}]   ;;  %s6228_s2 = inlined_call_operand.vmem [shape: f32[136,16], index: 2, kind: input, shape index: {}]   ;;  %s6229_s3 = inlined_call_operand.vmem [shape: bf16[2,16,2048], index: 3, kind: input, shape index: {}]   ;;  %s6230_s4 = inlined_call_operand.vmem [shape: f32[2,1,2048], index: 4, kind: input, shape index: {}]   ;;  %s6231_s5 = inlined_call_operand.hbm [shape: f32[2,2], index: 5, kind: output, shape index: {}]  }
   0x1   :  { %v56_v0 = vld [vmem:[%s6228_s2] sm:$0xff]  ;;  %v57_v1 = vld [vmem:[%s6228_s2 + $0x8] sm:$0xff]  ;;  %5116 = vmatprep.subr.bf16.mxu0 %v5321_v2  ;;  %4873 = vmatprep.mubr.msk.f32.mxu0 %vm5322_vm0, %v5323_v4 }
   0x2   :  { %v5117_v3 = vpack.c.bf16 %v57_v1, %v56_v0 }
   0x3   :  { %10 = vsyncpa [#allocation3], 0  ;;  %4882 = vmatprep.subr.mxu1 %v5323_v4  ;;  %4884 = vmatprep.mubr.msk.f32.mxu1 %vm5322_vm0, %v5323_v4  ;;  %v22_v5 = vld [vmem:[%s6226_s0] sm:$0xff]  ;;  %vm58_vm1 = vcmask 130048   ;;  %v23_v6 = vld [vmem:[%s6226_s0 + $0x8] sm:$0xff]  ;;  %vm170_vm2 = vcmask 64512   ;;  %v145_v27 = vlaneseq }
   0x4   :  { %5118 = vmatpush3.bf16.msra.mxu0 %v5117_v3  ;;  %v24_v7 = vld [vmem:[%s6226_s0 + $0x10] sm:$0xff]  ;;  %v158_v9 = vld [vmem:[%s6228_s2 + $0x18] sm:$0xff]  ;;  %v340_v16 = vld [vmem:[%s6228_s2 + $0x20] sm:$0xff]  ;;  %v5324_v18 = vmov 10   ;;  %vm442_vm9 = vcmask 195584   ;;  %vm1152_vm12 = vcmask 1043456  }
   0x5   :  { %5119 = vmatprep.subr.bf16.mxu0 %v5321_v2  ;;  %v157_v8 = vld [vmem:[%s6228_s2 + $0x10] sm:$0xff]  ;;  %v556_v17 = vld [vmem:[%s6228_s2 + $0x28] sm:$0xff]  ;;  %5159 = vset.pattern.permute.xlu0 %v5324_v18  ;;  %vm5460_vm3 = vmpackc.low %vm170_vm2, %vm170_vm2  ;;  %v5465_v32 = vand.u32 127, %v145_v27  ;;  %s5326_s25 = smov [#allocation2]   ;;  %vm4538_vm14 = vcmask 9216  }
   0x6   :  { %4883 = vmatpush3.msra.mxu1 %v157_v8  ;;  %5160 = vset.pattern.permute.xlu1 %v5324_v18  ;;  %v4561_v34 = vld [vmem:[%s6228_s2 + $0x30] ss:$0 sm:$0xff]  ;;  %v4554_v61 = vld [vmem:[%s6227_s1 + $0x1] ss:$0 sm:$0xff]  ;;  %v4555_v63 = vld [vmem:[%s6227_s1] ss:$0 sm:$0xff] }
   0x7   :  { %4874 = vmatmul.mubr.msk.f32.vlgmr.msra.gmra.mrb[0].mxu0 %vm58_vm1, %v22_v5  ;;  %4893 = vmatprep.subr.mxu1 %v5323_v4  ;;  %vm148_vm4 = vcmp.lt.s32.totalorder %v5465_v32, 4  ;;  %vm152_vm5 = vcmp.ge.s32.totalorder %v5465_v32, 4  ;;  %vm153_vm6 = vcmp.lt.s32.totalorder %v5465_v32, 8  ;;  %s4546_s26 = sshll.u32 %s5326_s25, 4  ;;  %s4547_s26 = int_to_ptr.vmem [resolvable:$true] %s4546_s26 }
   0x8   :  { %4876 = vmatprep.mubr.msk.f32.mxu0 %vm5322_vm0, %v5323_v4  ;;  %29 = vperm.xlu0 %5159, %v22_v5   ;;  %v5475_v38 = vsel %vm148_vm4, 1.0, %v5323_v4  ;;  %vm154_vm7 = vmand %vm152_vm5, %vm153_vm6  ;;  %s5297_s27 = scalar_lea.vmem %s4547_s26, 32  ;;  %p5302_p1 = scmp.lt.s32.totalorder %s4547_s26, %s4547_s26 }
   0x9   :  { %39 = vperm.xlu1 %5160, %v24_v7   ;;  %v5495_v51 = vsel %vm154_vm7, 1.0, %v5323_v4  ;;  %p5298_p0 = scmp.ne.s32.totalorder %s4547_s26, %s5297_s27  ;;  %p5303_p2 = scmp.lt.s32.totalorder %s5297_s27, %s5297_s27 }
   0xb   :  { %4877 = vmatmul.mubr.msk.f32.gmra.mrb[2].mxu0 %vm58_vm1, %v23_v6  ;;  %p5304_p3 = por %p5303_p2, %p5302_p1 }
   0xc   :  { %4879 = vmatprep.mubr.msk.f32.mxu0 %vm5322_vm0, %v5323_v4  ;;  %34 = vperm.xlu0 %5159, %v23_v6  }
   0xd   :  { %p5305_p4 = pnand %p5304_p3, %p5298_p0 }
   0xf   :  { %4880 = vmatmul.mubr.msk.f32.gmra.mrb[4].mxu0 %vm58_vm1, %v24_v7 }
  0x10   :  { %4910 = vmatprep.mubr.msk.f32.mxu0 %vm5322_vm0, %v5323_v4 }
  0x87   :  { %v30_v62 = vpop.permute.xlu0 %29 }
  0x88   :  { %vm46_vm8 = vcmp.eq.f32.partialorder %v30_v62, %v4554_v61 }
  0x89   :  { %v5521_v0 = vsel %vm46_vm8, %v4555_v63, -1e+30 }
  0xda   :  { %v5395_v10 = vpop.f32.mrb[0].mxu0 }
  0xdb   :  { %v4875_v11 = vpop.f32.mrb[1].mxu0  ;;  %4885 = vmatmul.mubr.msk.f32.vlgmr.msra.gmra.mrb[0].mxu1 %vm170_vm2, %v5395_v10 }
  0xdc   :  { %4887 = vmatprep.mubr.msk.f32.mxu1 %vm5322_vm0, %v5323_v4  ;;  %4894 = vmatpush3.msra.mxu1 %v158_v9  ;;  %v35_v9 = vpop.permute.xlu0 %34 }
  0xdd   :  { %4919 = vmatprep.subr.mxu1 %v5323_v4  ;;  %vm47_vm10 = vcmp.eq.f32.partialorder %v35_v9, %v4554_v61 }
  0xde   :  { %v5402_v12 = vpop.f32.mrb[2].mxu0 }
  0xdf   :  { %v4878_v13 = vpop.f32.mrb[3].mxu0  ;;  %4888 = vmatmul.mubr.msk.f32.gmra.mrb[2].mxu1 %vm170_vm2, %v5402_v12 }
  0xe0   :  { %4890 = vmatprep.mubr.msk.f32.mxu1 %vm5322_vm0, %v5323_v4 }
  0xe2   :  { %v5408_v14 = vpop.f32.mrb[4].mxu0 }
  0xe3   :  { %v4881_v15 = vpop.f32.mrb[5].mxu0  ;;  %4891 = vmatmul.mubr.msk.f32.gmra.mrb[4].mxu1 %vm170_vm2, %v5408_v14 }
  0xe4   :  { %4895 = vmatprep.mubr.msk.f32.mxu1 %vm5322_vm0, %v5323_v4  ;;  %v40_v15 = vpop.permute.xlu1 %39 }
  0xe5   :  { %vm48_vm11 = vcmp.eq.f32.partialorder %v40_v15, %v4554_v61 }
  0xe7   :  { %4896 = vmatmul.mubr.msk.f32.vlgmr.msra.gmra.mrb[6].mxu1 %vm170_vm2, %v5395_v10 }
  0xe8   :  { %4898 = vmatprep.mubr.msk.f32.mxu1 %vm5322_vm0, %v5323_v4  ;;  %4920 = vmatpush3.msra.mxu1 %v340_v16  ;;  %v5525_v16 = vsel %vm47_vm10, %v4555_v63, -1e+30 }
  0xe9   :  { %4945 = vmatprep.subr.mxu1 %v5323_v4 }
  0xeb   :  { %4899 = vmatmul.mubr.msk.f32.gmra.mrb[8].mxu1 %vm170_vm2, %v5402_v12 }
  0xec   :  { %4901 = vmatprep.mubr.msk.f32.mxu1 %vm5322_vm0, %v5323_v4 }
  0xef   :  { %4902 = vmatmul.mubr.msk.f32.gmra.mrb[10].mxu1 %vm170_vm2, %v5408_v14 }
  0xf0   :  { %4921 = vmatprep.mubr.msk.f32.mxu1 %vm5322_vm0, %v5323_v4 }
  0xf3   :  { %4922 = vmatmul.mubr.msk.f32.vlgmr.msra.gmra.mrb[12].mxu1 %vm170_vm2, %v5395_v10 }
  0xf4   :  { %4924 = vmatprep.mubr.msk.f32.mxu1 %vm5322_vm0, %v5323_v4  ;;  %4946 = vmatpush3.msra.mxu1 %v556_v17 }
  0xf5   :  { %5130 = vmatprep.subr.bf16.mxu1 %v5321_v2 }
  0xf7   :  { %4925 = vmatmul.mubr.msk.f32.gmra.mrb[14].mxu1 %vm170_vm2, %v5402_v12 }
  0xf8   :  { %4927 = vmatprep.mubr.msk.f32.mxu1 %vm5322_vm0, %v5323_v4 }
  0xfb   :  { %4928 = vmatmul.mubr.msk.f32.gmra.mrb[16].mxu1 %vm170_vm2, %v5408_v14 }
  0xfc   :  { %4947 = vmatprep.mubr.msk.f32.mxu1 %vm5322_vm0, %v5323_v4 }
  0xff   :  { %4948 = vmatmul.mubr.msk.f32.vlgmr.msra.gmra.mrb[18].mxu1 %vm170_vm2, %v5395_v10 }
 0x100   :  { %4950 = vmatprep.mubr.msk.f32.mxu1 %vm5322_vm0, %v5323_v4 }
 0x103   :  { %4951 = vmatmul.mubr.msk.f32.gmra.mrb[20].mxu1 %vm170_vm2, %v5402_v12 }
 0x104   :  { %4953 = vmatprep.mubr.msk.f32.mxu1 %vm5322_vm0, %v5323_v4 }
 0x107   :  { %4954 = vmatmul.mubr.msk.f32.gmra.mrb[22].mxu1 %vm170_vm2, %v5408_v14 }
 0x108   :  { %4977 = vmatprep.mubr.msk.f32.mxu1 %vm5322_vm0, %v5323_v4 }
 0x1ae   :  { %v246_v19 = vpop.f32.mrb[0].mxu1 }
 0x1af   :  { %v4886_v20 = vpop.f32.mrb[1].mxu1  ;;  %v247_v36 = vadd.f32 %v4561_v34, %v246_v19 }
 0x1b1   :  { %v341_v40 = vmul.f32 %v5475_v38, %v247_v36  ;;  %v557_v53 = vmul.f32 %v5495_v51, %v247_v36 }
 0x1b2   :  { %v251_v21 = vpop.f32.mrb[2].mxu1 }
 0x1b3   :  { %v4889_v22 = vpop.f32.mrb[3].mxu1  ;;  %v252_v41 = vadd.f32 %v4561_v34, %v251_v21 }
 0x1b4   :  { %v5530_v22 = vsel %vm48_vm11, %v4555_v63, -1e+30 }
 0x1b5   :  { %v342_v45 = vmul.f32 %v5475_v38, %v252_v41  ;;  %v558_v57 = vmul.f32 %v5495_v51, %v252_v41 }
 0x1b6   :  { %v256_v23 = vpop.f32.mrb[4].mxu1 }
 0x1b7   :  { %v4892_v24 = vpop.f32.mrb[5].mxu1  ;;  %v257_v46 = vadd.f32 %v4561_v34, %v256_v23 }
 0x1b9   :  { %v343_v49 = vmul.f32 %v5475_v38, %v257_v46  ;;  %v559_v60 = vmul.f32 %v5495_v51, %v257_v46 }
 0x1ba   :  { %v326_v25 = vpop.f32.mrb[6].mxu1 }
 0x1bb   :  { %v4897_v26 = vpop.f32.mrb[7].mxu1 }
 0x1be   :  { %v331_v28 = vpop.f32.mrb[8].mxu1 }
 0x1bf   :  { %v5120_v30 = vpack.c.bf16 %v331_v28, %v326_v25  ;;  %v4900_v31 = vpop.f32.mrb[9].mxu1 }
 0x1c1   :  { %5122 = vmatpush3.bf16.xpose.msk.msra.mxu0 %vm5460_vm3, %v5120_v30 }
 0x1c2   :  { %v336_v33 = vpop.f32.mrb[10].mxu1  ;;  %4908 = vmatprep.subr.mxu0 %v5323_v4 }
 0x1c3   :  { %v4903_v35 = vpop.f32.mrb[11].mxu1 }
 0x1c6   :  { %v542_v37 = vpop.f32.mrb[12].mxu1 }
 0x1c7   :  { %v4923_v39 = vpop.f32.mrb[13].mxu1 }
 0x1c9   :  { %4909 = vmatpush3.xpose.msk.msra.mxu0 %vm170_vm2, %v336_v33 }
 0x1ca   :  { %v547_v42 = vpop.f32.mrb[14].mxu1  ;;  %5123 = vmatprep.subr.bf16.mxu0 %v5321_v2 }
 0x1cb   :  { %v5131_v43 = vpack.c.bf16 %v547_v42, %v542_v37  ;;  %v4926_v44 = vpop.f32.mrb[15].mxu1 }
 0x1cc   :  { %4911 = vmatmul.mubr.msk.f32.vlgmr.msra.gmra.mrb[6].mxu0 %vm170_vm2, %v341_v40 }
 0x1cd   :  { %5126 = vmatpush3.bf16.xpose.msk.msra.mxu0 %vm5460_vm3, %v5120_v30  ;;  %5132 = vmatpush3.bf16.msra.mxu1 %v5131_v43 }
 0x1ce   :  { %v552_v47 = vpop.f32.mrb[16].mxu1  ;;  %4913 = vmatprep.mubr.msk.f32.mxu0 %vm5322_vm0, %v5323_v4  ;;  %4975 = vmatprep.subr.mxu1 %v5323_v4 }
 0x1cf   :  { %v4929_v48 = vpop.f32.mrb[17].mxu1  ;;  %4934 = vmatprep.subr.mxu0 %v5323_v4 }
 0x1d0   :  { %4914 = vmatmul.mubr.msk.f32.gmra.mrb[8].mxu0 %vm170_vm2, %v342_v45 }
 0x1d1   :  { %4976 = vmatpush3.msra.mxu1 %v552_v47  ;;  %4916 = vmatprep.mubr.msk.f32.mxu0 %vm5322_vm0, %v5323_v4 }
 0x1d2   :  { %v748_v50 = vpop.f32.mrb[18].mxu1 }
 0x1d3   :  { %v4949_v52 = vpop.f32.mrb[19].mxu1 }
 0x1d4   :  { %4917 = vmatmul.mubr.msk.f32.gmra.mrb[10].mxu0 %vm170_vm2, %v343_v49 }
 0x1d5   :  { %4935 = vmatpush3.xpose.msk.msra.mxu0 %vm170_vm2, %v336_v33  ;;  %4936 = vmatprep.mubr.msk.f32.mxu0 %vm5322_vm0, %v5323_v4 }
 0x1d6   :  { %v753_v54 = vpop.f32.mrb[20].mxu1  ;;  %5127 = vmatprep.subr.bf16.mxu0 %v5321_v2 }
 0x1d7   :  { %v5128_v55 = vpack.c.bf16 %v753_v54, %v748_v50  ;;  %v4952_v56 = vpop.f32.mrb[21].mxu1 }
 0x1d8   :  { %4937 = vmatmul.mubr.msk.f32.vlgmr.msra.gmra.mrb[12].mxu0 %vm170_vm2, %v557_v53 }
 0x1d9   :  { %5129 = vmatpush3.bf16.msra.mxu0 %v5128_v55  ;;  %4939 = vmatprep.mubr.msk.f32.mxu0 %vm5322_vm0, %v5323_v4 }
 0x1da   :  { %v758_v58 = vpop.f32.mrb[22].mxu1  ;;  %4960 = vmatprep.subr.mxu0 %v5323_v4 }
 0x1db   :  { %v4955_v59 = vpop.f32.mrb[23].mxu1 }
 0x1dc   :  { %4940 = vmatmul.mubr.msk.f32.gmra.mrb[14].mxu0 %vm170_vm2, %v558_v57 }
 0x1dd   :  { %4961 = vmatpush3.msra.mxu0 %v758_v58  ;;  %4942 = vmatprep.mubr.msk.f32.mxu0 %vm5322_vm0, %v5323_v4 }
 0x1e0   :  { %4943 = vmatmul.mubr.msk.f32.gmra.mrb[16].mxu0 %vm170_vm2, %v559_v60 }
 0x1e1   :  { %4962 = vmatprep.mubr.msk.f32.mxu0 %vm5322_vm0, %v5323_v4 }
 0x29f   :  { %v428_v1 = vpop.f32.mrb[6].mxu0 }
 0x2a0   :  { %v429_v3 = vadd.f32 %v428_v1, %v5521_v0  ;;  %v4912_v5 = vpop.f32.mrb[7].mxu0 }
 0x2a2   :  { %v443_v6 = vsel %vm442_vm9, %v429_v3, -inf }
 0x2a3   :  { %444 = vmax.xlane.f32.xlu1 %v443_v6  ;;  %v433_v7 = vpop.f32.mrb[8].mxu0 }
 0x2a4   :  { %v4915_v8 = vpop.f32.mrb[9].mxu0  ;;  %v434_v20 = vadd.f32 %v433_v7, %v5525_v16 }
 0x2a6   :  { %v446_v28 = vsel %vm442_vm9, %v434_v20, -inf }
 0x2a7   :  { %v438_v11 = vpop.f32.mrb[10].mxu0 }
 0x2a8   :  { %v4918_v13 = vpop.f32.mrb[11].mxu0  ;;  %v439_v26 = vadd.f32 %v438_v11, %v5530_v22 }
 0x2aa   :  { %v449_v35 = vsel %vm442_vm9, %v439_v26, -inf }
 0x2ab   :  { %v635_v17 = vpop.f32.mrb[12].mxu0 }
 0x2ac   :  { %v636_v18 = vadd.f32 %v635_v17, %v5521_v0  ;;  %v4938_v19 = vpop.f32.mrb[13].mxu0 }
 0x2ae   :  { %v649_v21 = vsel %vm442_vm9, %v636_v18, -inf }
 0x2af   :  { %650 = vmax.xlane.f32.xlu0 %v649_v21  ;;  %v640_v23 = vpop.f32.mrb[14].mxu0 }
 0x2b0   :  { %v641_v24 = vadd.f32 %v640_v23, %v5525_v16  ;;  %v4941_v25 = vpop.f32.mrb[15].mxu0 }
 0x2b2   :  { %v652_v30 = vsel %vm442_vm9, %v641_v24, -inf }
 0x2b3   :  { %447 = vmax.xlane.f32.xlu0 %v446_v28  ;;  %653 = vmax.xlane.f32.xlu1 %v652_v30  ;;  %v645_v31 = vpop.f32.mrb[16].mxu0 }
 0x2b4   :  { %v646_v33 = vadd.f32 %v645_v31, %v5530_v22  ;;  %v4944_v34 = vpop.f32.mrb[17].mxu0 }
 0x2b6   :  { %v655_v36 = vsel %vm442_vm9, %v646_v33, -inf }
 0x2b7   :  { %450 = vmax.xlane.f32.xlu0 %v449_v35  ;;  %656 = vmax.xlane.f32.xlu1 %v655_v36  ;;  %v4592_v36 = vld [vmem:[%s6228_s2 + $0x31] ss:$0 sm:$0xff] }
 0x330   :  { %v445_v37 = vpop.xlane.xlu1 %444 }
 0x331   :  { %v452_v39 = vsub.f32 %v429_v3, %v445_v37 }
 0x333   :  { %v455_v40 = vmul.f32 1.442695, %v452_v39 }
 0x335   :  { %5225 = vpow2.f32 %v455_v40 }
 0x33c   :  { %v651_v41 = vpop.xlane.xlu0 %650 }
 0x33d   :  { %v658_v42 = vsub.f32 %v636_v18, %v651_v41 }
 0x33f   :  { %v5226_v43 = vpop.eup %5225  ;;  %v661_v44 = vmul.f32 1.442695, %v658_v42 }
 0x340   :  { %v448_v45 = vpop.xlane.xlu0 %447  ;;  %v654_v46 = vpop.xlane.xlu1 %653  ;;  %v461_v47 = vsel %vm442_vm9, %v5226_v43, 0.0 }
 0x341   :  { %5227 = vpow2.f32 %v661_v44  ;;  %v453_v48 = vsub.f32 %v434_v20, %v448_v45  ;;  %v659_v49 = vsub.f32 %v641_v24, %v654_v46  ;;  %462 = vadd.xlane.f32.xlu0 %v461_v47 }
 0x343   :  { %v457_v50 = vmul.f32 1.442695, %v453_v48  ;;  %v663_v52 = vmul.f32 1.442695, %v659_v49 }
 0x344   :  { %v451_v53 = vpop.xlane.xlu0 %450  ;;  %v657_v54 = vpop.xlane.xlu1 %656 }
 0x345   :  { %5229 = vpow2.f32 %v457_v50  ;;  %v454_v55 = vsub.f32 %v439_v26, %v451_v53  ;;  %v660_v56 = vsub.f32 %v646_v33, %v657_v54 }
 0x346   :  { %5231 = vpow2.f32 %v663_v52 }
 0x347   :  { %v459_v57 = vmul.f32 1.442695, %v454_v55  ;;  %v665_v58 = vmul.f32 1.442695, %v660_v56 }
 0x349   :  { %5233 = vpow2.f32 %v459_v57 }
 0x34a   :  { %5235 = vpow2.f32 %v665_v58 }
 0x34b   :  { %v5228_v59 = vpop.eup %5227 }
 0x34c   :  { %v667_v60 = vsel %vm442_vm9, %v5228_v59, 0.0 }
 0x34d   :  { %668 = vadd.xlane.f32.xlu1 %v667_v60 }
 0x34f   :  { %v5230_v61 = vpop.eup %5229 }
 0x350   :  { %v5232_v62 = vpop.eup %5231  ;;  %v464_v63 = vsel %vm442_vm9, %v5230_v61, 0.0 }
 0x351   :  { %465 = vadd.xlane.f32.xlu0 %v464_v63  ;;  %v670_v1 = vsel %vm442_vm9, %v5232_v62, 0.0 }
 0x352   :  { %671 = vadd.xlane.f32.xlu1 %v670_v1 }
 0x353   :  { %v5234_v3 = vpop.eup %5233 }
 0x354   :  { %v5236_v5 = vpop.eup %5235  ;;  %v467_v6 = vsel %vm442_vm9, %v5234_v3, 0.0 }
 0x355   :  { %468 = vadd.xlane.f32.xlu0 %v467_v6  ;;  %v673_v7 = vsel %vm442_vm9, %v5236_v5, 0.0 }
 0x356   :  { %674 = vadd.xlane.f32.xlu1 %v673_v7 }
 0x3ce   :  { %v463_v8 = vpop.xlane.xlu0 %462 }
 0x3cf   :  { %5237 = vrcp.f32 %v463_v8 }
 0x3d9   :  { %v5238_v9 = vpop.eup %5237 }
 0x3da   :  { %v473_v11 = vmul.f32 %v5238_v9, %v5226_v43  ;;  %v669_v13 = vpop.xlane.xlu1 %668 }
 0x3db   :  { %5239 = vrcp.f32 %v669_v13 }
 0x3dc   :  { %4978 = vmatmul.mubr.msk.f32.vlgmr.msra.gmra.mrb[24].mxu1 %vm442_vm9, %v473_v11 }
 0x3dd   :  { %4980 = vmatprep.mubr.msk.f32.mxu1 %vm5322_vm0, %v5323_v4 }
 0x3de   :  { %v466_v15 = vpop.xlane.xlu0 %465 }
 0x3df   :  { %5241 = vrcp.f32 %v466_v15  ;;  %v672_v17 = vpop.xlane.xlu1 %671  ;;  %v1004_v15 = vld [vmem:[%s6229_s3] sm:$0xff] }
 0x3e0   :  { %5243 = vrcp.f32 %v672_v17  ;;  %v1005_v17 = vld [vmem:[%s6229_s3 + $0x8] sm:$0xff] }
 0x3e2   :  { %v469_v18 = vpop.xlane.xlu0 %468 }
 0x3e3   :  { %5245 = vrcp.f32 %v469_v18  ;;  %v675_v19 = vpop.xlane.xlu1 %674  ;;  %v4596_v18 = vcombine.high %v1004_v15, %v1004_v15 }
 0x3e4   :  { %5247 = vrcp.f32 %v675_v19  ;;  %v4598_v19 = vcombine.high %v1005_v17, %v1005_v17 }
 0x3e5   :  { %v5240_v20 = vpop.eup %5239  ;;  %4611 = vmatprep.subr.msk.bf16.mxu0 %vm1152_vm12, %v4596_v18 }
 0x3e6   :  { %v679_v21 = vmul.f32 %v5240_v20, %v5228_v59  ;;  %v4595_v20 = vcombine.low %v1004_v15, %v1004_v15  ;;  %4614 = vmatprep.subr.msk.bf16.mxu1 %vm1152_vm12, %v4598_v19 }
 0x3e8   :  { %4963 = vmatmul.mubr.msk.f32.vlgmr.msra.gmra.mrb[18].mxu0 %vm442_vm9, %v679_v21  ;;  %v4597_v21 = vcombine.low %v1005_v17, %v1005_v17 }
 0x3e9   :  { %v5242_v23 = vpop.eup %5241  ;;  %4965 = vmatprep.mubr.msk.f32.mxu0 %vm5322_vm0, %v5323_v4 }
 0x3ea   :  { %v5244_v24 = vpop.eup %5243  ;;  %v474_v25 = vmul.f32 %v5242_v23, %v5230_v61  ;;  %v1154_v23 = vsel %vm1152_vm12, %v4595_v20, 0  ;;  %v1012_v20 = vld [vmem:[%s6229_s3 + $0x40] sm:$0xff] }
 0x3eb   :  { %v680_v26 = vmul.f32 %v5244_v24, %v5232_v62  ;;  %v1160_v24 = vsel %vm1152_vm12, %v4597_v21, 0  ;;  %1202 = vmatpush1.bf16.msra.mxu0 %v1154_v23  ;;  %v1013_v21 = vld [vmem:[%s6229_s3 + $0x48] sm:$0xff]  ;;  %v4637_v23 = vcombine.high %v1012_v20, %v1012_v20 }
 0x3ec   :  { %4981 = vmatmul.mubr.msk.f32.gmra.mrb[26].mxu1 %vm442_vm9, %v474_v25  ;;  %v5325_v25 = vmov 0  }
 0x3ed   :  { %v5246_v28 = vpop.eup %5245  ;;  %4966 = vmatmul.mubr.msk.f32.gmra.mrb[20].mxu0 %vm442_vm9, %v680_v26  ;;  %4983 = vmatprep.mubr.msk.f32.mxu1 %vm5322_vm0, %v5323_v4  ;;  %v1006_v26 = vld [vmem:[%s6229_s3 + $0x10] sm:$0xff] }
 0x3ee   :  { %v5248_v30 = vpop.eup %5247  ;;  %4968 = vmatprep.mubr.msk.f32.mxu0 %vm5322_vm0, %v5323_v4  ;;  %v475_v31 = vmul.f32 %v5246_v28, %v5234_v3  ;;  %1253 = vmatpush1.bf16.msra.mxu1 %v1160_v24  ;;  %v1007_v28 = vld [vmem:[%s6229_s3 + $0x18] sm:$0xff]  ;;  %v4639_v24 = vcombine.high %v1013_v21, %v1013_v21 }
 0x3ef   :  { %v681_v33 = vmul.f32 %v5248_v30, %v5236_v5  ;;  %v4600_v30 = vcombine.high %v1006_v26, %v1006_v26 }
 0x3f0   :  { %4984 = vmatmul.mubr.msk.f32.gmra.mrb[28].mxu1 %vm442_vm9, %v475_v31  ;;  %v4602_v31 = vcombine.high %v1007_v28, %v1007_v28 }
 0x3f1   :  { %4969 = vmatmul.mubr.msk.f32.gmra.mrb[22].mxu0 %vm442_vm9, %v681_v33  ;;  %1284 = vmatprep.mubr.bf16.mxu1 %v5325_v25 }
 0x3f2   :  { %1233 = vmatprep.mubr.bf16.mxu0 %v5325_v25  ;;  %4617 = vmatprep.subr.msk.bf16.mxu0 %vm1152_vm12, %v4600_v30  ;;  %v5668_v30 = vld [vmem:[%s6229_s3 + $0x50] sm:$0xff] }
 0x3f3   :  { %4620 = vmatprep.subr.msk.bf16.mxu1 %vm1152_vm12, %v4602_v31  ;;  %v5673_v31 = vld [vmem:[%s6229_s3 + $0x58] sm:$0xff] }
 0x4af   :  { %v926_v34 = vpop.f32.mrb[24].mxu1 }
 0x4b0   :  { %v4979_v35 = vpop.f32.mrb[25].mxu1 }
 0x4bb   :  { %v837_v37 = vpop.f32.mrb[18].mxu0 }
 0x4bc   :  { %v927_v39 = vadd.f32 %v926_v34, %v837_v37  ;;  %v4964_v40 = vpop.f32.mrb[19].mxu0 }
 0x4be   :  { %v944_v41 = vadd.f32 %v4592_v36, %v927_v39 }
 0x4bf   :  { %v931_v42 = vpop.f32.mrb[26].mxu1 }
 0x4c0   :  { %v842_v43 = vpop.f32.mrb[20].mxu0  ;;  %v4982_v44 = vpop.f32.mrb[27].mxu1  ;;  %v947_v45 = vadd.f32 %v944_v41, %v5395_v10 }
 0x4c1   :  { %v932_v46 = vadd.f32 %v931_v42, %v842_v43  ;;  %v4967_v47 = vpop.f32.mrb[21].mxu0 }
 0x4c2   :  { %v950_v48 = vsel %vm170_vm2, %v947_v45, 0.0 }
 0x4c3   :  { %v945_v49 = vadd.f32 %v4592_v36, %v932_v46  ;;  %v936_v50 = vpop.f32.mrb[28].mxu1  ;;  %951 = vadd.xlane.f32.xlu0 %v950_v48 }
 0x4c4   :  { %v847_v52 = vpop.f32.mrb[22].mxu0  ;;  %v4985_v53 = vpop.f32.mrb[29].mxu1 }
 0x4c5   :  { %v937_v54 = vadd.f32 %v936_v50, %v847_v52  ;;  %v4970_v55 = vpop.f32.mrb[23].mxu0  ;;  %v948_v56 = vadd.f32 %v945_v49, %v5402_v12  ;;  %v4594_v49 = vld [vmem:[%s6228_s2 + $0x33] ss:$0 sm:$0xff]  ;;  %v4599_v53 = vcombine.low %v1006_v26, %v1006_v26  ;;  %v4636_v26 = vcombine.low %v1012_v20, %v1012_v20 }
 0x4c7   :  { %v946_v57 = vadd.f32 %v4592_v36, %v937_v54  ;;  %v953_v58 = vsel %vm170_vm2, %v948_v56, 0.0  ;;  %v4601_v54 = vcombine.low %v1007_v28, %v1007_v28  ;;  %v4638_v28 = vcombine.low %v1013_v21, %v1013_v21 }
 0x4c8   :  { %954 = vadd.xlane.f32.xlu1 %v953_v58  ;;  %v1008_v58 = vld [vmem:[%s6229_s3 + $0x20] sm:$0xff] }
 0x4c9   :  { %v949_v59 = vadd.f32 %v946_v57, %v5408_v14 }
 0x4cb   :  { %v956_v10 = vsel %vm170_vm2, %v949_v59, 0.0 }
 0x4cc   :  { %957 = vadd.xlane.f32.xlu0 %v956_v10 }
 0x550   :  { %v952_v60 = vpop.xlane.xlu0 %951 }
 0x551   :  { %v960_v61 = vmul.f32 0.125, %v952_v60 }
 0x553   :  { %v963_v62 = vsub.f32 %v947_v45, %v960_v61  ;;  %v4593_v45 = vld [vmem:[%s6228_s2 + $0x32] ss:$0 sm:$0xff]  ;;  %v1166_v61 = vsel %vm1152_vm12, %v4599_v53, 0 }
 0x555   :  { %v955_v63 = vpop.xlane.xlu1 %954  ;;  %v966_v1 = vmul.f32 %v963_v62, %v963_v62 }
 0x556   :  { %v961_v3 = vmul.f32 0.125, %v955_v63  ;;  %v4604_v63 = vcombine.high %v1008_v58, %v1008_v58 }
 0x557   :  { %v969_v5 = vsel %vm170_vm2, %v966_v1, 0.0 }
 0x558   :  { %v964_v6 = vsub.f32 %v948_v56, %v961_v3  ;;  %970 = vadd.xlane.f32.xlu1 %v969_v5 }
 0x559   :  { %v958_v12 = vpop.xlane.xlu0 %957 }
 0x55a   :  { %v962_v7 = vmul.f32 0.125, %v958_v12  ;;  %v967_v8 = vmul.f32 %v964_v6, %v964_v6 }
 0x55c   :  { %v965_v9 = vsub.f32 %v949_v59, %v962_v7  ;;  %v972_v11 = vsel %vm170_vm2, %v967_v8, 0.0  ;;  %v1009_v59 = vld [vmem:[%s6229_s3 + $0x28] sm:$0xff]  ;;  %v1010_v7 = vld [vmem:[%s6229_s3 + $0x30] sm:$0xff]  ;;  %v1011_v8 = vld [vmem:[%s6229_s3 + $0x38] sm:$0xff] }
 0x55d   :  { %973 = vadd.xlane.f32.xlu0 %v972_v11  ;;  %v4606_v1 = vcombine.high %v1009_v59, %v1009_v59  ;;  %v4605_v12 = vcombine.low %v1009_v59, %v1009_v59  ;;  %v4607_v15 = vcombine.low %v1010_v7, %v1010_v7  ;;  %v4609_v17 = vcombine.low %v1011_v8, %v1011_v8 }
 0x55e   :  { %v968_v14 = vmul.f32 %v965_v9, %v965_v9 }
 0x55f   :  { %v1184_v11 = vsel %vm1152_vm12, %v4605_v12, 0  ;;  %v1190_v18 = vsel %vm1152_vm12, %v4607_v15, 0  ;;  %v1196_v19 = vsel %vm1152_vm12, %v4609_v17, 0 }
 0x560   :  { %v975_v13 = vsel %vm170_vm2, %v968_v14, 0.0  ;;  %v4608_v14 = vcombine.high %v1010_v7, %v1010_v7 }
 0x561   :  { %976 = vadd.xlane.f32.xlu1 %v975_v13  ;;  %v4610_v13 = vcombine.high %v1011_v8, %v1011_v8 }
 0x5e5   :  { %v971_v33 = vpop.xlane.xlu1 %970 }
 0x5e6   :  { %v978_v34 = vmul.f32 0.125, %v971_v33  ;;  %v4641_v33 = vcombine.high %v5668_v30, %v5668_v30 }
 0x5e8   :  { %v981_v35 = vadd.f32 1e-05, %v978_v34  ;;  %v4643_v34 = vcombine.high %v5673_v31, %v5673_v31 }
 0x5ea   :  { %5249 = vrsqrt.f32 %v981_v35  ;;  %v974_v36 = vpop.xlane.xlu0 %973  ;;  %v5680_v35 = vshrl.u32 %v145_v27, 7 }
 0x5eb   :  { %v979_v37 = vmul.f32 0.125, %v974_v36 }
 0x5ec   :  { %v5683_v36 = vsub.s32 0, %v5680_v35  ;;  %v5718_v17 = vsub.s32 4, %v5680_v35 }
 0x5ed   :  { %v982_v39 = vadd.f32 1e-05, %v979_v37  ;;  %v5686_v37 = vsub.s32 2, %v5680_v35 }
 0x5ee   :  { %v977_v40 = vpop.xlane.xlu1 %976 }
 0x5ef   :  { %5251 = vrsqrt.f32 %v982_v39  ;;  %v980_v41 = vmul.f32 0.125, %v977_v40  ;;  %v5691_v39 = vld [vmem:[%s6230_s4] sm:$0xff]  ;;  %v5694_v40 = vsub.s32 1, %v5680_v35 }
 0x5f0   :  { %v1029_v27 = vrot.slane %v5691_v39, %v5683_v36 }
 0x5f1   :  { %v983_v42 = vadd.f32 1e-05, %v980_v41  ;;  %v5697_v41 = vsub.s32 3, %v5680_v35 }
 0x5f3   :  { %5253 = vrsqrt.f32 %v983_v42  ;;  %v1037_v42 = vrot.slane %v5691_v39, %v5686_v37 }
 0x5f4   :  { %v5250_v43 = vpop.eup %5249 }
 0x5f5   :  { %v987_v44 = vmul.f32 %v5250_v43, %v963_v62  ;;  %v1172_v62 = vsel %vm1152_vm12, %v4601_v54, 0  ;;  %v1033_v43 = vrot.slane %v5691_v39, %v5694_v40 }
 0x5f7   :  { %v994_v47 = vmul.f32 %v4593_v45, %v987_v44  ;;  %v1041_v44 = vrot.slane %v5691_v39, %v5697_v41 }
 0x5f9   :  { %v5252_v46 = vpop.eup %5251  ;;  %v5597_v55 = vadd.f32 %v4594_v49, %v994_v47 }
 0x5fa   :  { %v988_v48 = vmul.f32 %v5252_v46, %v964_v6  ;;  %v4603_v6 = vcombine.low %v1008_v58, %v1008_v58 }
 0x5fc   :  { %v995_v50 = vmul.f32 %v4593_v45, %v988_v48 }
 0x5fd   :  { %v5254_v52 = vpop.eup %5253 }
 0x5fe   :  { %v5599_v56 = vadd.f32 %v4594_v49, %v995_v50  ;;  %v989_v57 = vmul.f32 %v5254_v52, %v965_v9  ;;  %v1178_v9 = vsel %vm1152_vm12, %v4603_v6, 0 }
 0x600   :  { %v1020_v10 = vpack.c.bf16 %v5599_v56, %v5597_v55  ;;  %v996_v60 = vmul.f32 %v4593_v45, %v989_v57 }
 0x602   :  { %4612 = vmatmul.mubr.msk.bf16.vlgmr.msra.gmra.mrb[24].mxu0 %vm170_vm2, %v1020_v10  ;;  %4615 = vmatmul.mubr.msk.bf16.vlgmr.msra.gmra.mrb[32].mxu1 %vm170_vm2, %v1020_v10  ;;  %v5615_v3 = vadd.f32 %v4594_v49, %v996_v60 }
 0x603   :  { %1243 = vmatprep.mubr.bf16.mxu0 %v5325_v25  ;;  %1294 = vmatprep.mubr.bf16.mxu1 %v5325_v25 }
 0x604   :  { %1304 = vmatpush1.bf16.msra.mxu0 %v1166_v61  ;;  %1355 = vmatpush1.bf16.msra.mxu1 %v1172_v62  ;;  %v1021_v5 = vpack.c.bf16 %v5615_v3, %v5615_v3 }
 0x605   :  { %4623 = vmatprep.subr.msk.bf16.mxu0 %vm1152_vm12, %v4604_v63  ;;  %4626 = vmatprep.subr.msk.bf16.mxu1 %vm1152_vm12, %v4606_v1 }
 0x60a   :  { %4613 = vmatmul.mubr.msk.bf16.gmra.mrb[28].mxu0 %vm170_vm2, %v1021_v5  ;;  %4616 = vmatmul.mubr.msk.bf16.gmra.mrb[36].mxu1 %vm170_vm2, %v1021_v5 }
 0x60b   :  { %1335 = vmatprep.mubr.bf16.mxu0 %v5325_v25  ;;  %1386 = vmatprep.mubr.bf16.mxu1 %v5325_v25 }
 0x612   :  { %4618 = vmatmul.mubr.msk.bf16.vlgmr.msra.gmra.mrb[32].mxu0 %vm170_vm2, %v1020_v10  ;;  %4621 = vmatmul.mubr.msk.bf16.vlgmr.msra.gmra.mrb[40].mxu1 %vm170_vm2, %v1020_v10 }
 0x613   :  { %1345 = vmatprep.mubr.bf16.mxu0 %v5325_v25  ;;  %1396 = vmatprep.mubr.bf16.mxu1 %v5325_v25 }
 0x614   :  { %1406 = vmatpush1.bf16.msra.mxu0 %v1178_v9  ;;  %1457 = vmatpush1.bf16.msra.mxu1 %v1184_v11  ;;  %v5710_v11 = vld [vmem:[%s6229_s3 + $0x60] sm:$0xff] }
 0x615   :  { %4629 = vmatprep.subr.msk.bf16.mxu0 %vm1152_vm12, %v4608_v14  ;;  %4632 = vmatprep.subr.msk.bf16.mxu1 %vm1152_vm12, %v4610_v13  ;;  %v5715_v14 = vld [vmem:[%s6229_s3 + $0x68] sm:$0xff] }
 0x61a   :  { %4619 = vmatmul.mubr.msk.bf16.gmra.mrb[36].mxu0 %vm170_vm2, %v1021_v5  ;;  %4622 = vmatmul.mubr.msk.bf16.gmra.mrb[44].mxu1 %vm170_vm2, %v1021_v5 }
 0x61b   :  { %1437 = vmatprep.mubr.bf16.mxu0 %v5325_v25  ;;  %1488 = vmatprep.mubr.bf16.mxu1 %v5325_v25 }
 0x622   :  { %4624 = vmatmul.mubr.msk.bf16.vlgmr.msra.gmra.mrb[40].mxu0 %vm170_vm2, %v1020_v10  ;;  %4627 = vmatmul.mubr.msk.bf16.vlgmr.msra.gmra.mrb[48].mxu1 %vm170_vm2, %v1020_v10 }
 0x623   :  { %1447 = vmatprep.mubr.bf16.mxu0 %v5325_v25  ;;  %1498 = vmatprep.mubr.bf16.mxu1 %v5325_v25 }
 0x624   :  { %1508 = vmatpush1.bf16.msra.mxu0 %v1190_v18  ;;  %1559 = vmatpush1.bf16.msra.mxu1 %v1196_v19  ;;  %v5721_v18 = vsub.s32 6, %v5680_v35 }
 0x625   :  { %1749 = vmatprep.subr.bf16.mxu0 %v4637_v23  ;;  %1797 = vmatprep.subr.bf16.mxu1 %v4639_v24  ;;  %v4640_v24 = vcombine.low %v5668_v30, %v5668_v30  ;;  %v5732_v30 = vsub.s32 5, %v5680_v35 }
 0x62a   :  { %4625 = vmatmul.mubr.msk.bf16.gmra.mrb[44].mxu0 %vm170_vm2, %v1021_v5  ;;  %4628 = vmatmul.mubr.msk.bf16.gmra.mrb[52].mxu1 %vm170_vm2, %v1021_v5 }
 0x62b   :  { %1539 = vmatprep.mubr.bf16.mxu0 %v5325_v25  ;;  %1590 = vmatprep.mubr.bf16.mxu1 %v5325_v25 }
 0x632   :  { %4630 = vmatmul.mubr.msk.bf16.vlgmr.msra.gmra.mrb[48].mxu0 %vm170_vm2, %v1020_v10  ;;  %4633 = vmatmul.mubr.msk.bf16.vlgmr.msra.gmra.mrb[56].mxu1 %vm170_vm2, %v1020_v10 }
 0x633   :  { %1549 = vmatprep.mubr.bf16.mxu0 %v5325_v25  ;;  %1600 = vmatprep.mubr.bf16.mxu1 %v5325_v25 }
 0x634   :  { %1750 = vmatpush1.bf16.xpose.msra.mxu0 %v4636_v26  ;;  %1798 = vmatpush1.bf16.xpose.msra.mxu1 %v4638_v28  ;;  %v4642_v26 = vcombine.low %v5673_v31, %v5673_v31  ;;  %v5735_v31 = vsub.s32 7, %v5680_v35 }
 0x635   :  { %1845 = vmatprep.subr.bf16.mxu0 %v4641_v33  ;;  %1893 = vmatprep.subr.bf16.mxu1 %v4643_v34 }
 0x63a   :  { %4631 = vmatmul.mubr.msk.bf16.gmra.mrb[52].mxu0 %vm170_vm2, %v1021_v5  ;;  %4634 = vmatmul.mubr.msk.bf16.gmra.mrb[60].mxu1 %vm170_vm2, %v1021_v5 }
 0x6d5   :  { %v1235_v45 = vpop.f32.mrb[24].mxu0  ;;  %v1286_v46 = vpop.f32.mrb[32].mxu1 }
 0x6d6   :  { %v1236_v47 = vadd.f32 %v1235_v45, %v1029_v27  ;;  %v1287_v48 = vadd.f32 %v1286_v46, %v1037_v42  ;;  %v1237_v49 = vpop.f32.mrb[25].mxu0  ;;  %v1288_v50 = vpop.f32.mrb[33].mxu1  ;;  %v4645_v46 = vcombine.high %v5710_v11, %v5710_v11 }
 0x6d7   :  { %v1238_v52 = vadd.f32 %v1237_v49, %v1033_v43  ;;  %v1289_v53 = vadd.f32 %v1288_v50, %v1041_v44  ;;  %v1239_v54 = vpop.f32.mrb[26].mxu0  ;;  %v1290_v57 = vpop.f32.mrb[34].mxu1 }
 0x6d8   :  { %v1240_v58 = vadd.f32 %v1239_v54, %v1029_v27  ;;  %v1291_v59 = vadd.f32 %v1290_v57, %v1037_v42  ;;  %v1241_v10 = vpop.f32.mrb[27].mxu0  ;;  %v1292_v60 = vpop.f32.mrb[35].mxu1  ;;  %v1609_v63 = vmax.f32 %v1236_v47, 0.0  ;;  %v1611_v1 = vmax.f32 %v1287_v48, 0.0 }
 0x6d9   :  { %v1242_v61 = vadd.f32 %v1241_v10, %v1033_v43  ;;  %v1293_v62 = vadd.f32 %v1292_v60, %v1041_v44  ;;  %v1610_v12 = vmax.f32 %v1238_v52, 0.0  ;;  %v1612_v7 = vmax.f32 %v1289_v53, 0.0 }
 0x6da   :  { %v1625_v5 = vmax.f32 %v1240_v58, 0.0  ;;  %v1627_v6 = vmax.f32 %v1291_v59, 0.0  ;;  %v4647_v47 = vcombine.high %v5715_v14, %v5715_v14  ;;  %v1045_v57 = vrot.slane %v5691_v39, %v5718_v17 }
 0x6db   :  { %v1626_v8 = vmax.f32 %v1242_v61, 0.0  ;;  %v1628_v9 = vmax.f32 %v1293_v62, 0.0  ;;  %v1053_v58 = vrot.slane %v5691_v39, %v5721_v18  ;;  %v1049_v60 = vrot.slane %v5691_v39, %v5732_v30 }
 0x6dc   :  { %v1657_v13 = vpack.c.bf16 %v1625_v5, %v1609_v63  ;;  %v1659_v15 = vpack.c.bf16 %v1627_v6, %v1611_v1  ;;  %v1057_v61 = vrot.slane %v5691_v39, %v5735_v31 }
 0x6dd   :  { %v1658_v19 = vpack.c.bf16 %v1626_v8, %v1610_v12  ;;  %v1660_v20 = vpack.c.bf16 %v1628_v9, %v1612_v7  ;;  %v1245_v21 = vpop.f32.mrb[28].mxu0  ;;  %v1296_v23 = vpop.f32.mrb[36].mxu1 }
 0x6de   :  { %v1246_v28 = vadd.f32 %v1245_v21, %v1029_v27  ;;  %v1297_v33 = vadd.f32 %v1296_v23, %v1037_v42  ;;  %v1247_v34 = vpop.f32.mrb[29].mxu0  ;;  %v1298_v45 = vpop.f32.mrb[37].mxu1 }
 0x6df   :  { %v1248_v48 = vadd.f32 %v1247_v34, %v1033_v43  ;;  %v1299_v49 = vadd.f32 %v1298_v45, %v1041_v44  ;;  %v1249_v50 = vpop.f32.mrb[30].mxu0  ;;  %v1300_v52 = vpop.f32.mrb[38].mxu1  ;;  %1781 = vmatprep.mubr.bf16.mxu0 %v1658_v19  ;;  %1829 = vmatprep.mubr.bf16.mxu1 %v1660_v20 }
 0x6e0   :  { %v1250_v27 = vpop.f32.mrb[31].mxu0  ;;  %v1301_v42 = vpop.f32.mrb[39].mxu1  ;;  %1782 = vmatmul.mubr.bf16.vlgmr.msra.gmra.mrb[56].mxu0 %v1657_v13  ;;  %1830 = vmatmul.mubr.bf16.vlgmr.msra.gmra.mrb[64].mxu1 %v1659_v15  ;;  %v1641_v43 = vmax.f32 %v1246_v28, 0.0  ;;  %v1643_v44 = vmax.f32 %v1297_v33, 0.0  ;;  %v5748_v50 = vld [vmem:[%s6229_s3 + $0x70] sm:$0xff]  ;;  %v5753_v52 = vld [vmem:[%s6229_s3 + $0x78] sm:$0xff] }
 0x6e1   :  { %v1642_v53 = vmax.f32 %v1248_v48, 0.0  ;;  %v1644_v54 = vmax.f32 %v1299_v49, 0.0  ;;  %1846 = vmatpush1.bf16.xpose.msra.mxu0 %v4640_v24  ;;  %1894 = vmatpush1.bf16.xpose.msra.mxu1 %v4642_v26 }
 0x6e2   :  { %1941 = vmatprep.subr.bf16.mxu0 %v4645_v46  ;;  %1989 = vmatprep.subr.bf16.mxu1 %v4647_v47  ;;  %v1673_v1 = vpack.c.bf16 %v1641_v43, %v1641_v43  ;;  %v1675_v5 = vpack.c.bf16 %v1643_v44, %v1643_v44 }
 0x6e3   :  { %v1674_v59 = vpack.c.bf16 %v1642_v53, %v1642_v53  ;;  %v1676_v10 = vpack.c.bf16 %v1644_v54, %v1644_v54 }
 0x6e5   :  { %v1337_v62 = vpop.f32.mrb[32].mxu0  ;;  %v1388_v63 = vpop.f32.mrb[40].mxu1  ;;  %1789 = vmatprep.mubr.bf16.mxu0 %v1674_v59  ;;  %1837 = vmatprep.mubr.bf16.mxu1 %v1676_v10  ;;  %v4644_v59 = vcombine.low %v5710_v11, %v5710_v11  ;;  %v4646_v10 = vcombine.low %v5715_v14, %v5715_v14  ;;  %v5766_v11 = vld [vmem:[%s6230_s4 + $0x8] sm:$0xff] }
 0x6e6   :  { %v1338_v6 = vadd.f32 %v1337_v62, %v1045_v57  ;;  %v1389_v12 = vadd.f32 %v1388_v63, %v1053_v58  ;;  %v1339_v7 = vpop.f32.mrb[33].mxu0  ;;  %v1390_v8 = vpop.f32.mrb[41].mxu1 }
 0x6e7   :  { %v1340_v9 = vadd.f32 %v1339_v7, %v1049_v60  ;;  %v1391_v13 = vadd.f32 %v1390_v8, %v1057_v61  ;;  %v1341_v15 = vpop.f32.mrb[34].mxu0  ;;  %v1392_v19 = vpop.f32.mrb[42].mxu1 }
 0x6e8   :  { %v1342_v20 = vadd.f32 %v1341_v15, %v1045_v57  ;;  %v1393_v21 = vadd.f32 %v1392_v19, %v1053_v58  ;;  %v1343_v23 = vpop.f32.mrb[35].mxu0  ;;  %v1394_v24 = vpop.f32.mrb[43].mxu1  ;;  %1790 = vmatmul.mubr.bf16.gmra.mrb[60].mxu0 %v1673_v1  ;;  %1838 = vmatmul.mubr.bf16.gmra.mrb[68].mxu1 %v1675_v5  ;;  %v1613_v28 = vmax.f32 %v1338_v6, 0.0  ;;  %v1615_v33 = vmax.f32 %v1389_v12, 0.0 }
 0x6e9   :  { %v1344_v39 = vadd.f32 %v1343_v23, %v1049_v60  ;;  %v1395_v26 = vadd.f32 %v1394_v24, %v1057_v61  ;;  %v1614_v46 = vmax.f32 %v1340_v9, 0.0  ;;  %v1616_v47 = vmax.f32 %v1391_v13, 0.0 }
 0x6ea   :  { %v1629_v34 = vmax.f32 %v1342_v20, 0.0  ;;  %v1631_v45 = vmax.f32 %v1393_v21, 0.0  ;;  %v4649_v6 = vcombine.high %v5748_v50, %v5748_v50  ;;  %v4651_v12 = vcombine.high %v5753_v52, %v5753_v52 }
 0x6eb   :  { %v1630_v48 = vmax.f32 %v1344_v39, 0.0  ;;  %v1632_v49 = vmax.f32 %v1395_v26, 0.0  ;;  %v1069_v20 = vrot.slane %v5766_v11, %v5686_v37  ;;  %v1065_v24 = vrot.slane %v5766_v11, %v5694_v40 }
 0x6ec   :  { %v1661_v27 = vpack.c.bf16 %v1629_v34, %v1613_v28  ;;  %v1663_v42 = vpack.c.bf16 %v1631_v45, %v1615_v33  ;;  %v1073_v39 = vrot.slane %v5766_v11, %v5697_v41 }
 0x6ed   :  { %v1662_v53 = vpack.c.bf16 %v1630_v48, %v1614_v46  ;;  %v1664_v54 = vpack.c.bf16 %v1632_v49, %v1616_v47  ;;  %v1347_v43 = vpop.f32.mrb[36].mxu0  ;;  %v1398_v44 = vpop.f32.mrb[44].mxu1 }
 0x6ee   :  { %v1348_v62 = vadd.f32 %v1347_v43, %v1045_v57  ;;  %v1399_v63 = vadd.f32 %v1398_v44, %v1053_v58  ;;  %v1349_v1 = vpop.f32.mrb[37].mxu0  ;;  %v1400_v5 = vpop.f32.mrb[45].mxu1 }
 0x6ef   :  { %v1350_v7 = vadd.f32 %v1349_v1, %v1049_v60  ;;  %v1401_v8 = vadd.f32 %v1400_v5, %v1057_v61  ;;  %v1351_v9 = vpop.f32.mrb[38].mxu0  ;;  %v1402_v13 = vpop.f32.mrb[46].mxu1  ;;  %1877 = vmatprep.mubr.bf16.mxu0 %v1662_v53  ;;  %1925 = vmatprep.mubr.bf16.mxu1 %v1664_v54  ;;  %v1061_v61 = vrot.slane %v5766_v11, %v5683_v36 }
 0x6f0   :  { %v1352_v14 = vpop.f32.mrb[39].mxu0  ;;  %v1403_v57 = vpop.f32.mrb[47].mxu1  ;;  %1878 = vmatmul.mubr.bf16.vlgmr.msra.gmra.mrb[64].mxu0 %v1661_v27  ;;  %1926 = vmatmul.mubr.bf16.vlgmr.msra.gmra.mrb[72].mxu1 %v1663_v42  ;;  %v1645_v19 = vmax.f32 %v1348_v62, 0.0  ;;  %v1647_v60 = vmax.f32 %v1399_v63, 0.0 }
 0x6f1   :  { %v1646_v58 = vmax.f32 %v1350_v7, 0.0  ;;  %v1648_v15 = vmax.f32 %v1401_v8, 0.0  ;;  %1942 = vmatpush1.bf16.xpose.msra.mxu0 %v4644_v59  ;;  %1990 = vmatpush1.bf16.xpose.msra.mxu1 %v4646_v10 }
 0x6f2   :  { %2037 = vmatprep.subr.bf16.mxu0 %v4649_v6  ;;  %2085 = vmatprep.subr.bf16.mxu1 %v4651_v12  ;;  %v1677_v33 = vpack.c.bf16 %v1645_v19, %v1645_v19  ;;  %v1679_v34 = vpack.c.bf16 %v1647_v60, %v1647_v60  ;;  %v4648_v60 = vcombine.low %v5748_v50, %v5748_v50 }
 0x6f3   :  { %v1678_v21 = vpack.c.bf16 %v1646_v58, %v1646_v58  ;;  %v1680_v23 = vpack.c.bf16 %v1648_v15, %v1648_v15 }
 0x6f5   :  { %v1439_v26 = vpop.f32.mrb[40].mxu0  ;;  %v1490_v28 = vpop.f32.mrb[48].mxu1  ;;  %1885 = vmatprep.mubr.bf16.mxu0 %v1678_v21  ;;  %1933 = vmatprep.mubr.bf16.mxu1 %v1680_v23  ;;  %v4650_v21 = vcombine.low %v5753_v52, %v5753_v52 }
 0x6f6   :  { %v1440_v45 = vadd.f32 %v1439_v26, %v1061_v61  ;;  %v1491_v46 = vadd.f32 %v1490_v28, %v1069_v20  ;;  %v1441_v47 = vpop.f32.mrb[41].mxu0  ;;  %v1492_v48 = vpop.f32.mrb[49].mxu1 }
 0x6f7   :  { %v1442_v49 = vadd.f32 %v1441_v47, %v1065_v24  ;;  %v1493_v27 = vadd.f32 %v1492_v48, %v1073_v39  ;;  %v1443_v42 = vpop.f32.mrb[42].mxu0  ;;  %v1494_v53 = vpop.f32.mrb[50].mxu1 }
 0x6f8   :  { %v1444_v54 = vadd.f32 %v1443_v42, %v1061_v61  ;;  %v1495_v43 = vadd.f32 %v1494_v53, %v1069_v20  ;;  %v1445_v44 = vpop.f32.mrb[43].mxu0  ;;  %v1496_v59 = vpop.f32.mrb[51].mxu1  ;;  %1886 = vmatmul.mubr.bf16.gmra.mrb[68].mxu0 %v1677_v33  ;;  %1934 = vmatmul.mubr.bf16.gmra.mrb[76].mxu1 %v1679_v34  ;;  %v1617_v63 = vmax.f32 %v1440_v45, 0.0  ;;  %v1619_v1 = vmax.f32 %v1491_v46, 0.0 }
 0x6f9   :  { %v1446_v10 = vadd.f32 %v1445_v44, %v1065_v24  ;;  %v1497_v62 = vadd.f32 %v1496_v59, %v1073_v39  ;;  %v1618_v12 = vmax.f32 %v1442_v49, 0.0  ;;  %v1620_v7 = vmax.f32 %v1493_v27, 0.0 }
 0x6fa   :  { %v1633_v5 = vmax.f32 %v1444_v54, 0.0  ;;  %v1635_v6 = vmax.f32 %v1495_v43, 0.0  ;;  %v1081_v53 = vrot.slane %v5766_v11, %v5732_v30  ;;  %v1089_v54 = vrot.slane %v5766_v11, %v5735_v31 }
 0x6fb   :  { %v1634_v8 = vmax.f32 %v1446_v10, 0.0  ;;  %v1636_v9 = vmax.f32 %v1497_v62, 0.0 }
 0x6fc   :  { %v1665_v13 = vpack.c.bf16 %v1633_v5, %v1617_v63  ;;  %v1667_v14 = vpack.c.bf16 %v1635_v6, %v1619_v1 }
 0x6fd   :  { %v1666_v57 = vpack.c.bf16 %v1634_v8, %v1618_v12  ;;  %v1668_v58 = vpack.c.bf16 %v1636_v9, %v1620_v7  ;;  %v1449_v15 = vpop.f32.mrb[44].mxu0  ;;  %v1500_v19 = vpop.f32.mrb[52].mxu1 }
 0x6fe   :  { %v1450_v23 = vadd.f32 %v1449_v15, %v1061_v61  ;;  %v1501_v26 = vadd.f32 %v1500_v19, %v1069_v20  ;;  %v1451_v28 = vpop.f32.mrb[45].mxu0  ;;  %v1502_v33 = vpop.f32.mrb[53].mxu1  ;;  %v1077_v61 = vrot.slane %v5766_v11, %v5718_v17  ;;  %v1085_v20 = vrot.slane %v5766_v11, %v5721_v18 }
 0x6ff   :  { %v1452_v34 = vadd.f32 %v1451_v28, %v1065_v24  ;;  %v1503_v45 = vadd.f32 %v1502_v33, %v1073_v39  ;;  %v1453_v46 = vpop.f32.mrb[46].mxu0  ;;  %v1504_v47 = vpop.f32.mrb[54].mxu1  ;;  %1973 = vmatprep.mubr.bf16.mxu0 %v1666_v57  ;;  %2021 = vmatprep.mubr.bf16.mxu1 %v1668_v58 }
 0x700   :  { %v1454_v48 = vpop.f32.mrb[47].mxu0  ;;  %v1505_v49 = vpop.f32.mrb[55].mxu1  ;;  %1974 = vmatmul.mubr.bf16.vlgmr.msra.gmra.mrb[72].mxu0 %v1665_v13  ;;  %2022 = vmatmul.mubr.bf16.vlgmr.msra.gmra.mrb[80].mxu1 %v1667_v14  ;;  %v1649_v50 = vmax.f32 %v1450_v23, 0.0  ;;  %v1651_v52 = vmax.f32 %v1501_v26, 0.0 }
 0x701   :  { %v1650_v27 = vmax.f32 %v1452_v34, 0.0  ;;  %v1652_v42 = vmax.f32 %v1503_v45, 0.0  ;;  %2038 = vmatpush1.bf16.xpose.msra.mxu0 %v4648_v60  ;;  %2086 = vmatpush1.bf16.xpose.msra.mxu1 %v4650_v21 }
 0x702   :  { %4997 = vmatprep.subr.mxu1 %v5323_v4  ;;  %4986 = vmatprep.subr.mxu0 %v5323_v4  ;;  %v1681_v59 = vpack.c.bf16 %v1649_v50, %v1649_v50  ;;  %v1683_v10 = vpack.c.bf16 %v1651_v52, %v1651_v52 }
 0x703   :  { %v1682_v24 = vpack.c.bf16 %v1650_v27, %v1650_v27  ;;  %v1684_v39 = vpack.c.bf16 %v1652_v42, %v1652_v42 }
 0x705   :  { %v1541_v43 = vpop.f32.mrb[48].mxu0  ;;  %v1592_v44 = vpop.f32.mrb[56].mxu1  ;;  %1981 = vmatprep.mubr.bf16.mxu0 %v1682_v24  ;;  %2029 = vmatprep.mubr.bf16.mxu1 %v1684_v39 }
 0x706   :  { %v1542_v62 = vadd.f32 %v1541_v43, %v1077_v61  ;;  %v1593_v63 = vadd.f32 %v1592_v44, %v1085_v20  ;;  %v1543_v1 = vpop.f32.mrb[49].mxu0  ;;  %v1594_v5 = vpop.f32.mrb[57].mxu1 }
 0x707   :  { %v1544_v6 = vadd.f32 %v1543_v1, %v1081_v53  ;;  %v1595_v12 = vadd.f32 %v1594_v5, %v1089_v54  ;;  %v1545_v7 = vpop.f32.mrb[50].mxu0  ;;  %v1596_v8 = vpop.f32.mrb[58].mxu1 }
 0x708   :  { %v1546_v9 = vadd.f32 %v1545_v7, %v1077_v61  ;;  %v1597_v13 = vadd.f32 %v1596_v8, %v1085_v20  ;;  %v1547_v14 = vpop.f32.mrb[51].mxu0  ;;  %v1598_v57 = vpop.f32.mrb[59].mxu1  ;;  %1982 = vmatmul.mubr.bf16.gmra.mrb[76].mxu0 %v1681_v59  ;;  %2030 = vmatmul.mubr.bf16.gmra.mrb[84].mxu1 %v1683_v10  ;;  %v1621_v15 = vmax.f32 %v1542_v62, 0.0  ;;  %v1623_v19 = vmax.f32 %v1593_v63, 0.0 }
 0x709   :  { %v1548_v11 = vadd.f32 %v1547_v14, %v1081_v53  ;;  %v1599_v58 = vadd.f32 %v1598_v57, %v1089_v54  ;;  %v1622_v23 = vmax.f32 %v1544_v6, 0.0  ;;  %v1624_v26 = vmax.f32 %v1595_v12, 0.0 }
 0x70a   :  { %v1637_v60 = vmax.f32 %v1546_v9, 0.0  ;;  %v1639_v21 = vmax.f32 %v1597_v13, 0.0 }
 0x70b   :  { %v1638_v28 = vmax.f32 %v1548_v11, 0.0  ;;  %v1640_v33 = vmax.f32 %v1599_v58, 0.0 }
 0x70c   :  { %v1669_v34 = vpack.c.bf16 %v1637_v60, %v1621_v15  ;;  %v1671_v45 = vpack.c.bf16 %v1639_v21, %v1623_v19 }
 0x70d   :  { %v1670_v46 = vpack.c.bf16 %v1638_v28, %v1622_v23  ;;  %v1672_v47 = vpack.c.bf16 %v1640_v33, %v1624_v26  ;;  %v1551_v48 = vpop.f32.mrb[52].mxu0  ;;  %v1602_v49 = vpop.f32.mrb[60].mxu1 }
 0x70e   :  { %v1552_v27 = vadd.f32 %v1551_v48, %v1077_v61  ;;  %v1603_v42 = vadd.f32 %v1602_v49, %v1085_v20  ;;  %v1553_v50 = vpop.f32.mrb[53].mxu0  ;;  %v1604_v52 = vpop.f32.mrb[61].mxu1 }
 0x70f   :  { %v1554_v24 = vadd.f32 %v1553_v50, %v1081_v53  ;;  %v1605_v39 = vadd.f32 %v1604_v52, %v1089_v54  ;;  %v1555_v43 = vpop.f32.mrb[54].mxu0  ;;  %v1606_v44 = vpop.f32.mrb[62].mxu1  ;;  %2069 = vmatprep.mubr.bf16.mxu0 %v1670_v46  ;;  %2117 = vmatprep.mubr.bf16.mxu1 %v1672_v47  ;;  %v4635_v53 = vld [vmem:[%s6228_s2 + $0x36] ss:$0 sm:$0xff] }
 0x710   :  { %v1556_v59 = vpop.f32.mrb[55].mxu0  ;;  %v1607_v10 = vpop.f32.mrb[63].mxu1  ;;  %2070 = vmatmul.mubr.bf16.vlgmr.msra.gmra.mrb[80].mxu0 %v1669_v34  ;;  %2118 = vmatmul.mubr.bf16.vlgmr.msra.gmra.mrb[88].mxu1 %v1671_v45  ;;  %v1653_v1 = vmax.f32 %v1552_v27, 0.0  ;;  %v1655_v5 = vmax.f32 %v1603_v42, 0.0 }
 0x711   :  { %v1654_v62 = vmax.f32 %v1554_v24, 0.0  ;;  %v1656_v63 = vmax.f32 %v1605_v39, 0.0 }
 0x712   :  { %v1685_v61 = vpack.c.bf16 %v1653_v1, %v1653_v1  ;;  %v1687_v20 = vpack.c.bf16 %v1655_v5, %v1655_v5 }
 0x713   :  { %v1686_v6 = vpack.c.bf16 %v1654_v62, %v1654_v62  ;;  %v1688_v12 = vpack.c.bf16 %v1656_v63, %v1656_v63 }
 0x715   :  { %2077 = vmatprep.mubr.bf16.mxu0 %v1686_v6  ;;  %2125 = vmatprep.mubr.bf16.mxu1 %v1688_v12 }
 0x718   :  { %2078 = vmatmul.mubr.bf16.gmra.mrb[84].mxu0 %v1685_v61  ;;  %2126 = vmatmul.mubr.bf16.gmra.mrb[92].mxu1 %v1687_v20 }
 0x719   :  { %4988 = vmatprep.mubr.msk.f32.mxu0 %vm5322_vm0, %v5323_v4  ;;  %4999 = vmatprep.mubr.msk.f32.mxu1 %vm5322_vm0, %v5323_v4 }
 0x7b3   :  { %v1783_v54 = vpop.f32.mrb[56].mxu0  ;;  %v1831_v7 = vpop.f32.mrb[64].mxu1 }
 0x7b4   :  { %v1784_v8 = vadd.f32 %v4635_v53, %v1783_v54  ;;  %v1785_v9 = vpop.f32.mrb[57].mxu0  ;;  %v1833_v13 = vpop.f32.mrb[65].mxu1 }
 0x7b5   :  { %v1786_v14 = vpop.f32.mrb[58].mxu0  ;;  %v1834_v57 = vpop.f32.mrb[66].mxu1 }
 0x7b6   :  { %v1832_v11 = vadd.f32 %v1831_v7, %v1784_v8  ;;  %v1787_v58 = vadd.f32 %v4635_v53, %v1786_v14  ;;  %v1788_v15 = vpop.f32.mrb[59].mxu0  ;;  %v1836_v19 = vpop.f32.mrb[67].mxu1 }
 0x7b8   :  { %v1835_v60 = vadd.f32 %v1834_v57, %v1787_v58 }
 0x7bb   :  { %v1791_v21 = vpop.f32.mrb[60].mxu0  ;;  %v1839_v23 = vpop.f32.mrb[68].mxu1 }
 0x7bc   :  { %v1792_v26 = vadd.f32 %v4635_v53, %v1791_v21  ;;  %v1793_v28 = vpop.f32.mrb[61].mxu0  ;;  %v1841_v33 = vpop.f32.mrb[69].mxu1 }
 0x7bd   :  { %v1794_v34 = vpop.f32.mrb[62].mxu0  ;;  %v1842_v45 = vpop.f32.mrb[70].mxu1 }
 0x7be   :  { %v1840_v46 = vadd.f32 %v1839_v23, %v1792_v26  ;;  %v1795_v47 = vpop.f32.mrb[63].mxu0  ;;  %v1843_v48 = vpop.f32.mrb[71].mxu1 }
 0x7c3   :  { %v1879_v49 = vpop.f32.mrb[64].mxu0  ;;  %v1927_v27 = vpop.f32.mrb[72].mxu1 }
 0x7c4   :  { %v1880_v42 = vadd.f32 %v1879_v49, %v1832_v11  ;;  %v1881_v50 = vpop.f32.mrb[65].mxu0  ;;  %v1929_v52 = vpop.f32.mrb[73].mxu1 }
 0x7c5   :  { %v1882_v24 = vpop.f32.mrb[66].mxu0  ;;  %v1930_v39 = vpop.f32.mrb[74].mxu1 }
 0x7c6   :  { %v1928_v43 = vadd.f32 %v1927_v27, %v1880_v42  ;;  %v1883_v44 = vadd.f32 %v1882_v24, %v1835_v60  ;;  %v1884_v59 = vpop.f32.mrb[67].mxu0  ;;  %v1932_v10 = vpop.f32.mrb[75].mxu1 }
 0x7c8   :  { %v1931_v62 = vadd.f32 %v1930_v39, %v1883_v44 }
 0x7cb   :  { %v1887_v63 = vpop.f32.mrb[68].mxu0  ;;  %v1935_v1 = vpop.f32.mrb[76].mxu1 }
 0x7cc   :  { %v1888_v5 = vadd.f32 %v1887_v63, %v1840_v46  ;;  %v1889_v6 = vpop.f32.mrb[69].mxu0  ;;  %v1937_v12 = vpop.f32.mrb[77].mxu1 }
 0x7cd   :  { %v1890_v61 = vpop.f32.mrb[70].mxu0  ;;  %v1938_v20 = vpop.f32.mrb[78].mxu1 }
 0x7ce   :  { %v1936_v53 = vadd.f32 %v1935_v1, %v1888_v5  ;;  %v1891_v54 = vpop.f32.mrb[71].mxu0  ;;  %v1939_v7 = vpop.f32.mrb[79].mxu1 }
 0x7d3   :  { %v1975_v8 = vpop.f32.mrb[72].mxu0  ;;  %v2023_v9 = vpop.f32.mrb[80].mxu1 }
 0x7d4   :  { %v1976_v13 = vadd.f32 %v1975_v8, %v1928_v43  ;;  %v1977_v14 = vpop.f32.mrb[73].mxu0  ;;  %v2025_v57 = vpop.f32.mrb[81].mxu1 }
 0x7d5   :  { %v1978_v11 = vpop.f32.mrb[74].mxu0  ;;  %v2026_v58 = vpop.f32.mrb[82].mxu1 }
 0x7d6   :  { %v2024_v15 = vadd.f32 %v2023_v9, %v1976_v13  ;;  %v1979_v19 = vadd.f32 %v1978_v11, %v1931_v62  ;;  %v1980_v60 = vpop.f32.mrb[75].mxu0  ;;  %v2028_v21 = vpop.f32.mrb[83].mxu1 }
 0x7d8   :  { %v2027_v23 = vadd.f32 %v2026_v58, %v1979_v19 }
 0x7db   :  { %v1983_v26 = vpop.f32.mrb[76].mxu0  ;;  %v2031_v28 = vpop.f32.mrb[84].mxu1 }
 0x7dc   :  { %v1984_v33 = vadd.f32 %v1983_v26, %v1936_v53  ;;  %v1985_v34 = vpop.f32.mrb[77].mxu0  ;;  %v2033_v45 = vpop.f32.mrb[85].mxu1 }
 0x7dd   :  { %v1986_v46 = vpop.f32.mrb[78].mxu0  ;;  %v2034_v47 = vpop.f32.mrb[86].mxu1 }
 0x7de   :  { %v2032_v48 = vadd.f32 %v2031_v28, %v1984_v33  ;;  %v1987_v49 = vpop.f32.mrb[79].mxu0  ;;  %v2035_v27 = vpop.f32.mrb[87].mxu1 }
 0x7df   :  { %v2190_v49 = vld [vmem:[%s6228_s2 + $0x40] sm:$0xff]  ;;  %v2189_v27 = vld [vmem:[%s6228_s2 + $0x38] sm:$0xff] }
 0x7e0   :  { %4998 = vmatpush3.msra.mxu1 %v2190_v49  ;;  %4987 = vmatpush3.msra.mxu0 %v2189_v27 }
 0x7e1   :  { %5023 = vmatprep.subr.mxu1 %v5323_v4  ;;  %5133 = vmatprep.subr.bf16.mxu0 %v5321_v2 }
 0x7e3   :  { %v2071_v42 = vpop.f32.mrb[80].mxu0  ;;  %v2119_v50 = vpop.f32.mrb[88].mxu1 }
 0x7e4   :  { %v2072_v52 = vadd.f32 %v2071_v42, %v2024_v15  ;;  %v2073_v24 = vpop.f32.mrb[81].mxu0  ;;  %v2121_v39 = vpop.f32.mrb[89].mxu1 }
 0x7e5   :  { %v2074_v43 = vpop.f32.mrb[82].mxu0  ;;  %v2122_v44 = vpop.f32.mrb[90].mxu1 }
 0x7e6   :  { %v2120_v59 = vadd.f32 %v2119_v50, %v2072_v52  ;;  %v2075_v10 = vadd.f32 %v2074_v43, %v2027_v23  ;;  %v2076_v62 = vpop.f32.mrb[83].mxu0  ;;  %v2124_v63 = vpop.f32.mrb[91].mxu1 }
 0x7e7   :  { %v4652_v63 = vld [vmem:[%s6228_s2 + $0x34] ss:$0 sm:$0xff] }
 0x7e8   :  { %v2123_v1 = vadd.f32 %v2122_v44, %v2075_v10  ;;  %v2133_v5 = vadd.f32 %v2120_v59, %v5597_v55 }
 0x7ea   :  { %v2136_v6 = vsel %vm170_vm2, %v2133_v5, 0.0  ;;  %v2134_v12 = vadd.f32 %v2123_v1, %v5599_v56 }
 0x7eb   :  { %v2079_v61 = vpop.f32.mrb[84].mxu0  ;;  %v2127_v20 = vpop.f32.mrb[92].mxu1  ;;  %2137 = vadd.xlane.f32.xlu0 %v2136_v6  ;;  %v4653_v6 = vld [vmem:[%s6228_s2 + $0x35] ss:$0 sm:$0xff] }
 0x7ec   :  { %v2080_v53 = vadd.f32 %v2079_v61, %v2032_v48  ;;  %v2081_v54 = vpop.f32.mrb[85].mxu0  ;;  %v2129_v7 = vpop.f32.mrb[93].mxu1  ;;  %v2139_v8 = vsel %vm170_vm2, %v2134_v12, 0.0 }
 0x7ed   :  { %v2082_v9 = vpop.f32.mrb[86].mxu0  ;;  %v2130_v13 = vpop.f32.mrb[94].mxu1  ;;  %2140 = vadd.xlane.f32.xlu1 %v2139_v8  ;;  %v2371_v54 = vld [vmem:[%s6228_s2 + $0x48] sm:$0xff] }
 0x7ee   :  { %v2128_v14 = vadd.f32 %v2127_v20, %v2080_v53  ;;  %v2083_v57 = vpop.f32.mrb[87].mxu0  ;;  %v2131_v11 = vpop.f32.mrb[95].mxu1 }
 0x7ef   :  { %v2586_v57 = vld [vmem:[%s6228_s2 + $0x50] sm:$0xff] }
 0x7f0   :  { %v2135_v55 = vadd.f32 %v2128_v14, %v5615_v3 }
 0x7f2   :  { %v2142_v58 = vsel %vm170_vm2, %v2135_v55, 0.0 }
 0x7f3   :  { %2143 = vadd.xlane.f32.xlu0 %v2142_v58 }
 0x878   :  { %v2138_v56 = vpop.xlane.xlu0 %2137 }
 0x879   :  { %v2145_v15 = vmul.f32 0.125, %v2138_v56 }
 0x87a   :  { %v2141_v19 = vpop.xlane.xlu1 %2140 }
 0x87b   :  { %v2148_v60 = vsub.f32 %v2133_v5, %v2145_v15  ;;  %v2146_v21 = vmul.f32 0.125, %v2141_v19 }
 0x87d   :  { %v2149_v23 = vsub.f32 %v2134_v12, %v2146_v21  ;;  %v2151_v26 = vmul.f32 %v2148_v60, %v2148_v60 }
 0x87f   :  { %v2154_v28 = vsel %vm170_vm2, %v2151_v26, 0.0  ;;  %v2152_v33 = vmul.f32 %v2149_v23, %v2149_v23 }
 0x880   :  { %2155 = vadd.xlane.f32.xlu1 %v2154_v28  ;;  %v2144_v34 = vpop.xlane.xlu0 %2143 }
 0x881   :  { %v2147_v45 = vmul.f32 0.125, %v2144_v34  ;;  %v2157_v46 = vsel %vm170_vm2, %v2152_v33, 0.0  ;;  %v4654_v33 = vld [vmem:[%s6228_s2 + $0x58] ss:$0 sm:$0xff] }
 0x882   :  { %2158 = vadd.xlane.f32.xlu0 %v2157_v46 }
 0x883   :  { %v2150_v3 = vsub.f32 %v2135_v55, %v2147_v45 }
 0x885   :  { %v2153_v47 = vmul.f32 %v2150_v3, %v2150_v3 }
 0x887   :  { %v2160_v48 = vsel %vm170_vm2, %v2153_v47, 0.0 }
 0x888   :  { %2161 = vadd.xlane.f32.xlu1 %v2160_v48 }
 0x90d   :  { %v2156_v42 = vpop.xlane.xlu1 %2155 }
 0x90e   :  { %v2163_v50 = vmul.f32 0.125, %v2156_v42 }
 0x90f   :  { %v2159_v52 = vpop.xlane.xlu0 %2158 }
 0x910   :  { %v2166_v24 = vadd.f32 1e-05, %v2163_v50  ;;  %v2164_v39 = vmul.f32 0.125, %v2159_v52 }
 0x912   :  { %5255 = vrsqrt.f32 %v2166_v24  ;;  %v2167_v43 = vadd.f32 1e-05, %v2164_v39 }
 0x914   :  { %5257 = vrsqrt.f32 %v2167_v43 }
 0x915   :  { %v2162_v44 = vpop.xlane.xlu1 %2161 }
 0x916   :  { %v2165_v59 = vmul.f32 0.125, %v2162_v44 }
 0x918   :  { %v2168_v10 = vadd.f32 1e-05, %v2165_v59 }
 0x91a   :  { %5259 = vrsqrt.f32 %v2168_v10 }
 0x91c   :  { %v5256_v62 = vpop.eup %5255 }
 0x91d   :  { %v2172_v1 = vmul.f32 %v5256_v62, %v2148_v60 }
 0x91e   :  { %v5258_v5 = vpop.eup %5257 }
 0x91f   :  { %v2179_v12 = vmul.f32 %v4652_v63, %v2172_v1  ;;  %v2173_v61 = vmul.f32 %v5258_v5, %v2149_v23 }
 0x921   :  { %v5820_v20 = vadd.f32 %v4653_v6, %v2179_v12  ;;  %v2180_v53 = vmul.f32 %v4652_v63, %v2173_v61 }
 0x923   :  { %4989 = vmatmul.mubr.msk.f32.vlgmr.msra.gmra.mrb[88].mxu0 %vm170_vm2, %v5820_v20  ;;  %5000 = vmatmul.mubr.msk.f32.vlgmr.msra.gmra.mrb[30].mxu1 %vm170_vm2, %v5820_v20  ;;  %v5833_v9 = vadd.f32 %v4653_v6, %v2180_v53 }
 0x924   :  { %v5260_v7 = vpop.eup %5259  ;;  %4991 = vmatprep.mubr.msk.f32.mxu0 %vm5322_vm0, %v5323_v4  ;;  %5002 = vmatprep.mubr.msk.f32.mxu1 %vm5322_vm0, %v5323_v4 }
 0x925   :  { %v2174_v8 = vmul.f32 %v5260_v7, %v2150_v3  ;;  %5024 = vmatpush3.msra.mxu1 %v2371_v54 }
 0x926   :  { %5049 = vmatprep.subr.mxu1 %v5323_v4 }
 0x927   :  { %4992 = vmatmul.mubr.msk.f32.gmra.mrb[90].mxu0 %vm170_vm2, %v5833_v9  ;;  %5003 = vmatmul.mubr.msk.f32.gmra.mrb[96].mxu1 %vm170_vm2, %v5833_v9  ;;  %v2181_v13 = vmul.f32 %v4652_v63, %v2174_v8 }
 0x928   :  { %4994 = vmatprep.mubr.msk.f32.mxu0 %vm5322_vm0, %v5323_v4  ;;  %5005 = vmatprep.mubr.msk.f32.mxu1 %vm5322_vm0, %v5323_v4 }
 0x929   :  { %v5844_v14 = vadd.f32 %v4653_v6, %v2181_v13 }
 0x92b   :  { %4995 = vmatmul.mubr.msk.f32.gmra.mrb[92].mxu0 %vm170_vm2, %v5844_v14  ;;  %5006 = vmatmul.mubr.msk.f32.gmra.mrb[98].mxu1 %vm170_vm2, %v5844_v14 }
 0x92c   :  { %5025 = vmatprep.mubr.msk.f32.mxu1 %vm5322_vm0, %v5323_v4  ;;  %5014 = vmatprep.mubr.msk.f32.mxu0 %vm5322_vm0, %v5323_v4 }
 0x92f   :  { %5026 = vmatmul.mubr.msk.f32.vlgmr.msra.gmra.mrb[100].mxu1 %vm170_vm2, %v5820_v20 }
 0x930   :  { %5028 = vmatprep.mubr.msk.f32.mxu1 %vm5322_vm0, %v5323_v4  ;;  %5050 = vmatpush3.msra.mxu1 %v2586_v57 }
 0x931   :  { %5144 = vmatprep.subr.bf16.mxu1 %v5321_v2 }
 0x933   :  { %5029 = vmatmul.mubr.msk.f32.gmra.mrb[102].mxu1 %vm170_vm2, %v5833_v9 }
 0x934   :  { %5031 = vmatprep.mubr.msk.f32.mxu1 %vm5322_vm0, %v5323_v4 }
 0x937   :  { %5032 = vmatmul.mubr.msk.f32.gmra.mrb[104].mxu1 %vm170_vm2, %v5844_v14 }
 0x938   :  { %5051 = vmatprep.mubr.msk.f32.mxu1 %vm5322_vm0, %v5323_v4 }
 0x93b   :  { %5052 = vmatmul.mubr.msk.f32.vlgmr.msra.gmra.mrb[106].mxu1 %vm170_vm2, %v5820_v20 }
 0x93c   :  { %5054 = vmatprep.mubr.msk.f32.mxu1 %vm5322_vm0, %v5323_v4 }
 0x93f   :  { %5055 = vmatmul.mubr.msk.f32.gmra.mrb[108].mxu1 %vm170_vm2, %v5833_v9 }
 0x940   :  { %5057 = vmatprep.mubr.msk.f32.mxu1 %vm5322_vm0, %v5323_v4 }
 0x943   :  { %5058 = vmatmul.mubr.msk.f32.gmra.mrb[110].mxu1 %vm170_vm2, %v5844_v14 }
 0x944   :  { %5081 = vmatprep.mubr.msk.f32.mxu1 %vm5322_vm0, %v5323_v4 }
 0x9f6   :  { %v2277_v11 = vpop.f32.mrb[88].mxu0  ;;  %v2357_v55 = vpop.f32.mrb[30].mxu1 }
 0x9f7   :  { %v4990_v58 = vpop.f32.mrb[89].mxu0  ;;  %v5001_v56 = vpop.f32.mrb[31].mxu1  ;;  %v2278_v46 = vadd.f32 %v4654_v33, %v2277_v11 }
 0x9f9   :  { %v2372_v48 = vmul.f32 %v5475_v38, %v2278_v46  ;;  %v2587_v10 = vmul.f32 %v5495_v51, %v2278_v46 }
 0x9fa   :  { %v2282_v15 = vpop.f32.mrb[90].mxu0  ;;  %v2362_v19 = vpop.f32.mrb[96].mxu1 }
 0x9fb   :  { %v5134_v60 = vpack.c.bf16 %v2362_v19, %v2357_v55  ;;  %v4993_v21 = vpop.f32.mrb[91].mxu0  ;;  %v5004_v23 = vpop.f32.mrb[97].mxu1  ;;  %v2283_v49 = vadd.f32 %v4654_v33, %v2282_v15 }
 0x9fd   :  { %5136 = vmatpush3.bf16.xpose.msk.msra.mxu0 %vm5460_vm3, %v5134_v60  ;;  %v2373_v52 = vmul.f32 %v5475_v38, %v2283_v49 }
 0x9fe   :  { %v2287_v26 = vpop.f32.mrb[92].mxu0  ;;  %v2367_v28 = vpop.f32.mrb[98].mxu1  ;;  %5012 = vmatprep.subr.mxu0 %v5323_v4 }
 0x9ff   :  { %v4996_v34 = vpop.f32.mrb[93].mxu0  ;;  %v5007_v45 = vpop.f32.mrb[99].mxu1  ;;  %v2288_v24 = vadd.f32 %v4654_v33, %v2287_v26 }
 0xa01   :  { %v2374_v29 = vmul.f32 %v5475_v38, %v2288_v24  ;;  %v2588_v38 = vmul.f32 %v5495_v51, %v2283_v49  ;;  %v2589_v12 = vmul.f32 %v5495_v51, %v2288_v24 }
 0xa02   :  { %v2572_v3 = vpop.f32.mrb[100].mxu1 }
 0xa03   :  { %v5027_v47 = vpop.f32.mrb[101].mxu1 }
 0xa05   :  { %5013 = vmatpush3.xpose.msk.msra.mxu0 %vm170_vm2, %v2367_v28 }
 0xa06   :  { %v2577_v27 = vpop.f32.mrb[102].mxu1  ;;  %5137 = vmatprep.subr.bf16.mxu0 %v5321_v2 }
 0xa07   :  { %v5145_v42 = vpack.c.bf16 %v2577_v27, %v2572_v3  ;;  %v5030_v50 = vpop.f32.mrb[103].mxu1 }
 0xa08   :  { %5015 = vmatmul.mubr.msk.f32.vlgmr.msra.gmra.mrb[94].mxu0 %vm170_vm2, %v2372_v48 }
 0xa09   :  { %5140 = vmatpush3.bf16.xpose.msk.msra.mxu0 %vm5460_vm3, %v5134_v60  ;;  %5146 = vmatpush3.bf16.msra.mxu1 %v5145_v42 }
 0xa0a   :  { %v2582_v39 = vpop.f32.mrb[104].mxu1  ;;  %5017 = vmatprep.mubr.msk.f32.mxu0 %vm5322_vm0, %v5323_v4  ;;  %5079 = vmatprep.subr.mxu1 %v5323_v4 }
 0xa0b   :  { %v5033_v43 = vpop.f32.mrb[105].mxu1  ;;  %5038 = vmatprep.subr.mxu0 %v5323_v4 }
 0xa0c   :  { %5018 = vmatmul.mubr.msk.f32.gmra.mrb[96].mxu0 %vm170_vm2, %v2373_v52 }
 0xa0d   :  { %5080 = vmatpush3.msra.mxu1 %v2582_v39  ;;  %5020 = vmatprep.mubr.msk.f32.mxu0 %vm5322_vm0, %v5323_v4 }
 0xa0e   :  { %v2778_v44 = vpop.f32.mrb[106].mxu1 }
 0xa0f   :  { %v5053_v59 = vpop.f32.mrb[107].mxu1 }
 0xa10   :  { %5021 = vmatmul.mubr.msk.f32.gmra.mrb[98].mxu0 %vm170_vm2, %v2374_v29 }
 0xa11   :  { %5039 = vmatpush3.xpose.msk.msra.mxu0 %vm170_vm2, %v2367_v28  ;;  %5040 = vmatprep.mubr.msk.f32.mxu0 %vm5322_vm0, %v5323_v4 }
 0xa12   :  { %v2783_v62 = vpop.f32.mrb[108].mxu1  ;;  %5141 = vmatprep.subr.bf16.mxu0 %v5321_v2 }
 0xa13   :  { %v5142_v63 = vpack.c.bf16 %v2783_v62, %v2778_v44  ;;  %v5056_v1 = vpop.f32.mrb[109].mxu1 }
 0xa14   :  { %5041 = vmatmul.mubr.msk.f32.vlgmr.msra.gmra.mrb[100].mxu0 %vm170_vm2, %v2587_v10 }
 0xa15   :  { %5143 = vmatpush3.bf16.msra.mxu0 %v5142_v63  ;;  %5043 = vmatprep.mubr.msk.f32.mxu0 %vm5322_vm0, %v5323_v4 }
 0xa16   :  { %v2788_v5 = vpop.f32.mrb[110].mxu1  ;;  %5064 = vmatprep.subr.mxu0 %v5323_v4 }
 0xa17   :  { %v5059_v6 = vpop.f32.mrb[111].mxu1 }
 0xa18   :  { %5044 = vmatmul.mubr.msk.f32.gmra.mrb[102].mxu0 %vm170_vm2, %v2588_v38 }
 0xa19   :  { %5065 = vmatpush3.msra.mxu0 %v2788_v5  ;;  %5046 = vmatprep.mubr.msk.f32.mxu0 %vm5322_vm0, %v5323_v4 }
 0xa1c   :  { %5047 = vmatmul.mubr.msk.f32.gmra.mrb[104].mxu0 %vm170_vm2, %v2589_v12 }
 0xa1d   :  { %5066 = vmatprep.mubr.msk.f32.mxu0 %vm5322_vm0, %v5323_v4 }
 0xadb   :  { %v2459_v61 = vpop.f32.mrb[94].mxu0 }
 0xadc   :  { %v2460_v53 = vadd.f32 %v2459_v61, %v5521_v0  ;;  %v5016_v54 = vpop.f32.mrb[95].mxu0 }
 0xade   :  { %v2473_v7 = vsel %vm442_vm9, %v2460_v53, -inf }
 0xadf   :  { %2474 = vmax.xlane.f32.xlu0 %v2473_v7  ;;  %v2464_v8 = vpop.f32.mrb[96].mxu0 }
 0xae0   :  { %v2465_v13 = vadd.f32 %v2464_v8, %v5525_v16  ;;  %v5019_v57 = vpop.f32.mrb[97].mxu0 }
 0xae2   :  { %v2476_v11 = vsel %vm442_vm9, %v2465_v13, -inf }
 0xae3   :  { %2477 = vmax.xlane.f32.xlu0 %v2476_v11  ;;  %v2469_v51 = vpop.f32.mrb[98].mxu0 }
 0xae4   :  { %v2470_v55 = vadd.f32 %v2469_v51, %v5530_v22  ;;  %v5022_v58 = vpop.f32.mrb[99].mxu0 }
 0xae6   :  { %v2479_v56 = vsel %vm442_vm9, %v2470_v55, -inf }
 0xae7   :  { %2480 = vmax.xlane.f32.xlu0 %v2479_v56  ;;  %v2665_v15 = vpop.f32.mrb[100].mxu0 }
 0xae8   :  { %v2666_v19 = vadd.f32 %v2665_v15, %v5521_v0  ;;  %v5042_v60 = vpop.f32.mrb[101].mxu0 }
 0xaea   :  { %v2679_v21 = vsel %vm442_vm9, %v2666_v19, -inf }
 0xaeb   :  { %2680 = vmax.xlane.f32.xlu1 %v2679_v21  ;;  %v2670_v23 = vpop.f32.mrb[102].mxu0 }
 0xaec   :  { %v2671_v26 = vadd.f32 %v2670_v23, %v5525_v16  ;;  %v5045_v28 = vpop.f32.mrb[103].mxu0 }
 0xaee   :  { %v2682_v33 = vsel %vm442_vm9, %v2671_v26, -inf }
 0xaef   :  { %2683 = vmax.xlane.f32.xlu1 %v2682_v33  ;;  %v2675_v34 = vpop.f32.mrb[104].mxu0 }
 0xaf0   :  { %v2676_v45 = vadd.f32 %v2675_v34, %v5530_v22  ;;  %v5048_v46 = vpop.f32.mrb[105].mxu0 }
 0xaf2   :  { %v2685_v3 = vsel %vm442_vm9, %v2676_v45, -inf }
 0xaf3   :  { %2686 = vmax.xlane.f32.xlu1 %v2685_v3 }
 0xb6c   :  { %v2475_v47 = vpop.xlane.xlu0 %2474 }
 0xb6d   :  { %v2482_v0 = vsub.f32 %v2460_v53, %v2475_v47 }
 0xb6f   :  { %v2485_v48 = vmul.f32 1.442695, %v2482_v0 }
 0xb70   :  { %v2478_v49 = vpop.xlane.xlu0 %2477 }
 0xb71   :  { %5261 = vpow2.f32 %v2485_v48  ;;  %v2483_v27 = vsub.f32 %v2465_v13, %v2478_v49 }
 0xb73   :  { %v2487_v42 = vmul.f32 1.442695, %v2483_v27 }
 0xb74   :  { %v2481_v50 = vpop.xlane.xlu0 %2480 }
 0xb75   :  { %5263 = vpow2.f32 %v2487_v42  ;;  %v2484_v16 = vsub.f32 %v2470_v55, %v2481_v50  ;;  %v4685_v50 = vld [vmem:[%s6228_s2 + $0x59] ss:$0 sm:$0xff] }
 0xb77   :  { %v2489_v52 = vmul.f32 1.442695, %v2484_v16 }
 0xb78   :  { %v2681_v24 = vpop.xlane.xlu1 %2680 }
 0xb79   :  { %5265 = vpow2.f32 %v2489_v52  ;;  %v2688_v39 = vsub.f32 %v2666_v19, %v2681_v24 }
 0xb7b   :  { %v5262_v43 = vpop.eup %5261  ;;  %v2691_v22 = vmul.f32 1.442695, %v2688_v39 }
 0xb7c   :  { %v2684_v29 = vpop.xlane.xlu1 %2683  ;;  %v2491_v44 = vsel %vm442_vm9, %v5262_v43, 0.0 }
 0xb7d   :  { %5267 = vpow2.f32 %v2691_v22  ;;  %v2689_v59 = vsub.f32 %v2671_v26, %v2684_v29  ;;  %2492 = vadd.xlane.f32.xlu0 %v2491_v44 }
 0xb7f   :  { %v5264_v10 = vpop.eup %5263  ;;  %v2693_v62 = vmul.f32 1.442695, %v2689_v59 }
 0xb80   :  { %v2687_v63 = vpop.xlane.xlu1 %2686  ;;  %v2494_v1 = vsel %vm442_vm9, %v5264_v10, 0.0 }
 0xb81   :  { %5269 = vpow2.f32 %v2693_v62  ;;  %v2690_v38 = vsub.f32 %v2676_v45, %v2687_v63  ;;  %2495 = vadd.xlane.f32.xlu0 %v2494_v1 }
 0xb83   :  { %v5266_v5 = vpop.eup %5265  ;;  %v2695_v6 = vmul.f32 1.442695, %v2690_v38 }
 0xb84   :  { %v2497_v12 = vsel %vm442_vm9, %v5266_v5, 0.0 }
 0xb85   :  { %5271 = vpow2.f32 %v2695_v6  ;;  %2498 = vadd.xlane.f32.xlu0 %v2497_v12 }
 0xb87   :  { %v5268_v61 = vpop.eup %5267 }
 0xb88   :  { %v2697_v53 = vsel %vm442_vm9, %v5268_v61, 0.0 }
 0xb89   :  { %2698 = vadd.xlane.f32.xlu1 %v2697_v53 }
 0xb8b   :  { %v5270_v54 = vpop.eup %5269 }
 0xb8c   :  { %v2700_v7 = vsel %vm442_vm9, %v5270_v54, 0.0 }
 0xb8d   :  { %2701 = vadd.xlane.f32.xlu1 %v2700_v7 }
 0xb8f   :  { %v5272_v8 = vpop.eup %5271 }
 0xb90   :  { %v2703_v13 = vsel %vm442_vm9, %v5272_v8, 0.0 }
 0xb91   :  { %2704 = vadd.xlane.f32.xlu1 %v2703_v13 }
 0xc0a   :  { %v2493_v57 = vpop.xlane.xlu0 %2492 }
 0xc0b   :  { %5273 = vrcp.f32 %v2493_v57 }
 0xc0e   :  { %v2496_v11 = vpop.xlane.xlu0 %2495 }
 0xc0f   :  { %5275 = vrcp.f32 %v2496_v11 }
 0xc12   :  { %v2499_v51 = vpop.xlane.xlu0 %2498 }
 0xc13   :  { %5277 = vrcp.f32 %v2499_v51 }
 0xc15   :  { %v5274_v55 = vpop.eup %5273 }
 0xc16   :  { %v2503_v58 = vmul.f32 %v5274_v55, %v5262_v43  ;;  %v2699_v56 = vpop.xlane.xlu1 %2698 }
 0xc17   :  { %5279 = vrcp.f32 %v2699_v56 }
 0xc18   :  { %5082 = vmatmul.mubr.msk.f32.vlgmr.msra.gmra.mrb[112].mxu1 %vm442_vm9, %v2503_v58 }
 0xc19   :  { %v5276_v15 = vpop.eup %5275  ;;  %5084 = vmatprep.mubr.msk.f32.mxu1 %vm5322_vm0, %v5323_v4 }
 0xc1a   :  { %v2702_v19 = vpop.xlane.xlu1 %2701  ;;  %v2504_v60 = vmul.f32 %v5276_v15, %v5264_v10 }
 0xc1b   :  { %5281 = vrcp.f32 %v2702_v19  ;;  %v4688_v19 = vld [vmem:[%s6229_s3 + $0x80] sm:$0xff] }
 0xc1c   :  { %5085 = vmatmul.mubr.msk.f32.gmra.mrb[114].mxu1 %vm442_vm9, %v2504_v60  ;;  %v4689_v60 = vld [vmem:[%s6229_s3 + $0x88] sm:$0xff] }
 0xc1d   :  { %v5278_v21 = vpop.eup %5277  ;;  %5087 = vmatprep.mubr.msk.f32.mxu1 %vm5322_vm0, %v5323_v4 }
 0xc1e   :  { %v2705_v23 = vpop.xlane.xlu1 %2704  ;;  %v2505_v26 = vmul.f32 %v5278_v21, %v5266_v5  ;;  %v4707_v21 = vcombine.high %v4688_v19, %v4688_v19 }
 0xc1f   :  { %5283 = vrcp.f32 %v2705_v23  ;;  %v4709_v23 = vcombine.high %v4689_v60, %v4689_v60 }
 0xc20   :  { %5088 = vmatmul.mubr.msk.f32.gmra.mrb[116].mxu1 %vm442_vm9, %v2505_v26  ;;  %v4706_v26 = vcombine.low %v4688_v19, %v4688_v19  ;;  %4722 = vmatprep.subr.msk.bf16.mxu0 %vm1152_vm12, %v4707_v21 }
 0xc21   :  { %v5280_v28 = vpop.eup %5279  ;;  %3314 = vmatprep.mubr.bf16.mxu1 %v5325_v25  ;;  %4725 = vmatprep.subr.msk.bf16.mxu1 %vm1152_vm12, %v4709_v23 }
 0xc22   :  { %v2709_v33 = vmul.f32 %v5280_v28, %v5268_v61  ;;  %v4708_v28 = vcombine.low %v4689_v60, %v4689_v60 }
 0xc24   :  { %5067 = vmatmul.mubr.msk.f32.vlgmr.msra.gmra.mrb[106].mxu0 %vm442_vm9, %v2709_v33  ;;  %v3184_v33 = vsel %vm1152_vm12, %v4706_v26, 0 }
 0xc25   :  { %v5282_v34 = vpop.eup %5281  ;;  %5069 = vmatprep.mubr.msk.f32.mxu0 %vm5322_vm0, %v5323_v4  ;;  %3232 = vmatpush1.bf16.msra.mxu0 %v3184_v33  ;;  %v4696_v33 = vld [vmem:[%s6229_s3 + $0xc0] sm:$0xff] }
 0xc26   :  { %v2710_v45 = vmul.f32 %v5282_v34, %v5270_v54  ;;  %v3190_v34 = vsel %vm1152_vm12, %v4708_v28, 0 }
 0xc27   :  { %3283 = vmatpush1.bf16.msra.mxu1 %v3190_v34  ;;  %v4697_v34 = vld [vmem:[%s6229_s3 + $0xc8] sm:$0xff] }
 0xc28   :  { %5070 = vmatmul.mubr.msk.f32.gmra.mrb[108].mxu0 %vm442_vm9, %v2710_v45  ;;  %v4690_v45 = vld [vmem:[%s6229_s3 + $0x90] sm:$0xff] }
 0xc29   :  { %v5284_v46 = vpop.eup %5283  ;;  %5072 = vmatprep.mubr.msk.f32.mxu0 %vm5322_vm0, %v5323_v4 }
 0xc2a   :  { %v2711_v3 = vmul.f32 %v5284_v46, %v5272_v8  ;;  %v4691_v46 = vld [vmem:[%s6229_s3 + $0x98] sm:$0xff] }
 0xc2c   :  { %5073 = vmatmul.mubr.msk.f32.gmra.mrb[110].mxu0 %vm442_vm9, %v2711_v3  ;;  %v4711_v3 = vcombine.high %v4690_v45, %v4690_v45 }
 0xc2d   :  { %3263 = vmatprep.mubr.bf16.mxu0 %v5325_v25 }
 0xc2e   :  { %4728 = vmatprep.subr.msk.bf16.mxu0 %vm1152_vm12, %v4711_v3  ;;  %v4747_v3 = vcombine.low %v4696_v33, %v4696_v33 }
 0xceb   :  { %v2956_v47 = vpop.f32.mrb[112].mxu1 }
 0xcec   :  { %v5083_v0 = vpop.f32.mrb[113].mxu1 }
 0xcef   :  { %v2961_v48 = vpop.f32.mrb[114].mxu1 }
 0xcf0   :  { %v5086_v49 = vpop.f32.mrb[115].mxu1 }
 0xcf3   :  { %v2966_v27 = vpop.f32.mrb[116].mxu1 }
 0xcf4   :  { %v5089_v42 = vpop.f32.mrb[117].mxu1 }
 0xcf7   :  { %v2867_v16 = vpop.f32.mrb[106].mxu0 }
 0xcf8   :  { %v2957_v52 = vadd.f32 %v2956_v47, %v2867_v16  ;;  %v5068_v24 = vpop.f32.mrb[107].mxu0  ;;  %v4713_v47 = vcombine.high %v4691_v46, %v4691_v46 }
 0xcfa   :  { %v2974_v39 = vadd.f32 %v4685_v50, %v2957_v52  ;;  %4731 = vmatprep.subr.msk.bf16.mxu1 %vm1152_vm12, %v4713_v47  ;;  %v4749_v47 = vcombine.low %v4697_v34, %v4697_v34 }
 0xcfb   :  { %v2872_v43 = vpop.f32.mrb[108].mxu0 }
 0xcfc   :  { %v2962_v22 = vadd.f32 %v2961_v48, %v2872_v43  ;;  %v5071_v29 = vpop.f32.mrb[109].mxu0  ;;  %v2977_v44 = vadd.f32 %v2974_v39, %v5820_v20 }
 0xcfe   :  { %v2975_v59 = vadd.f32 %v4685_v50, %v2962_v22  ;;  %v2980_v10 = vsel %vm170_vm2, %v2977_v44, 0.0  ;;  %v4686_v22 = vld [vmem:[%s6228_s2 + $0x5a] ss:$0 sm:$0xff] }
 0xcff   :  { %2981 = vadd.xlane.f32.xlu0 %v2980_v10  ;;  %v2877_v62 = vpop.f32.mrb[110].mxu0  ;;  %v4687_v10 = vld [vmem:[%s6228_s2 + $0x5b] ss:$0 sm:$0xff] }
 0xd00   :  { %v2967_v63 = vadd.f32 %v2966_v27, %v2877_v62  ;;  %v5074_v1 = vpop.f32.mrb[111].mxu0  ;;  %v2978_v38 = vadd.f32 %v2975_v59, %v5833_v9 }
 0xd01   :  { %v4710_v1 = vcombine.low %v4690_v45, %v4690_v45  ;;  %v4748_v45 = vcombine.high %v4696_v33, %v4696_v33 }
 0xd02   :  { %v2976_v5 = vadd.f32 %v4685_v50, %v2967_v63  ;;  %v2983_v6 = vsel %vm170_vm2, %v2978_v38, 0.0 }
 0xd03   :  { %2984 = vadd.xlane.f32.xlu1 %v2983_v6 }
 0xd04   :  { %v2979_v12 = vadd.f32 %v2976_v5, %v5844_v14 }
 0xd06   :  { %v2986_v61 = vsel %vm170_vm2, %v2979_v12, 0.0 }
 0xd07   :  { %2987 = vadd.xlane.f32.xlu0 %v2986_v61  ;;  %v4692_v61 = vld [vmem:[%s6229_s3 + $0xa0] sm:$0xff] }
 0xd8c   :  { %v2982_v53 = vpop.xlane.xlu0 %2981 }
 0xd8d   :  { %v2989_v20 = vmul.f32 0.125, %v2982_v53  ;;  %v4693_v53 = vld [vmem:[%s6229_s3 + $0xa8] sm:$0xff] }
 0xd8f   :  { %v2992_v54 = vsub.f32 %v2977_v44, %v2989_v20 }
 0xd90   :  { %v2985_v7 = vpop.xlane.xlu1 %2984 }
 0xd91   :  { %v2990_v8 = vmul.f32 0.125, %v2985_v7  ;;  %v2995_v13 = vmul.f32 %v2992_v54, %v2992_v54  ;;  %v3196_v7 = vsel %vm1152_vm12, %v4710_v1, 0 }
 0xd93   :  { %v2993_v57 = vsub.f32 %v2978_v38, %v2990_v8  ;;  %v2998_v11 = vsel %vm170_vm2, %v2995_v13, 0.0  ;;  %v4712_v38 = vcombine.low %v4691_v46, %v4691_v46  ;;  %v4715_v13 = vcombine.high %v4692_v61, %v4692_v61 }
 0xd94   :  { %2999 = vadd.xlane.f32.xlu1 %v2998_v11  ;;  %v2988_v9 = vpop.xlane.xlu0 %2987  ;;  %v4750_v46 = vcombine.high %v4697_v34, %v4697_v34 }
 0xd95   :  { %v2991_v51 = vmul.f32 0.125, %v2988_v9  ;;  %v2996_v55 = vmul.f32 %v2993_v57, %v2993_v57  ;;  %v3202_v8 = vsel %vm1152_vm12, %v4712_v38, 0 }
 0xd97   :  { %v2994_v58 = vsub.f32 %v2979_v12, %v2991_v51  ;;  %v3001_v56 = vsel %vm170_vm2, %v2996_v55, 0.0  ;;  %v4714_v51 = vcombine.low %v4692_v61, %v4692_v61  ;;  %v4716_v55 = vcombine.low %v4693_v53, %v4693_v53 }
 0xd98   :  { %3002 = vadd.xlane.f32.xlu0 %v3001_v56  ;;  %v4695_v56 = vld [vmem:[%s6229_s3 + $0xb8] sm:$0xff] }
 0xd99   :  { %v2997_v14 = vmul.f32 %v2994_v58, %v2994_v58  ;;  %v4721_v60 = vcombine.high %v4695_v56, %v4695_v56  ;;  %v4720_v23 = vcombine.low %v4695_v56, %v4695_v56  ;;  %v6094_v56 = vld [vmem:[%s6229_s3 + $0xe8] sm:$0xff] }
 0xd9b   :  { %v3004_v15 = vsel %vm170_vm2, %v2997_v14, 0.0  ;;  %v3208_v14 = vsel %vm1152_vm12, %v4714_v51, 0  ;;  %v3226_v28 = vsel %vm1152_vm12, %v4720_v23, 0 }
 0xd9c   :  { %3005 = vadd.xlane.f32.xlu1 %v3004_v15  ;;  %v3214_v15 = vsel %vm1152_vm12, %v4716_v55, 0 }
 0xe21   :  { %v3000_v0 = vpop.xlane.xlu1 %2999 }
 0xe22   :  { %v3007_v48 = vmul.f32 0.125, %v3000_v0  ;;  %v6067_v0 = vld [vmem:[%s6229_s3 + $0xd8] sm:$0xff] }
 0xe24   :  { %v3010_v49 = vadd.f32 1e-05, %v3007_v48 }
 0xe25   :  { %v3003_v27 = vpop.xlane.xlu0 %3002 }
 0xe26   :  { %5285 = vrsqrt.f32 %v3010_v49  ;;  %v3008_v42 = vmul.f32 0.125, %v3003_v27  ;;  %v4754_v49 = vcombine.high %v6067_v0, %v6067_v0  ;;  %v6076_v27 = vld [vmem:[%s6230_s4 + $0x10] sm:$0xff] }
 0xe28   :  { %v3011_v50 = vadd.f32 1e-05, %v3008_v42  ;;  %v3060_v42 = vrot.slane %v6076_v27, %v5683_v36 }
 0xe29   :  { %v3006_v16 = vpop.xlane.xlu1 %3005 }
 0xe2a   :  { %5287 = vrsqrt.f32 %v3011_v50  ;;  %v3009_v52 = vmul.f32 0.125, %v3006_v16  ;;  %v3068_v50 = vrot.slane %v6076_v27, %v5686_v37  ;;  %v3064_v16 = vrot.slane %v6076_v27, %v5694_v40 }
 0xe2c   :  { %v3012_v24 = vadd.f32 1e-05, %v3009_v52  ;;  %v3072_v52 = vrot.slane %v6076_v27, %v5697_v41 }
 0xe2e   :  { %5289 = vrsqrt.f32 %v3012_v24 }
 0xe30   :  { %v5286_v39 = vpop.eup %5285 }
 0xe31   :  { %v3016_v43 = vmul.f32 %v5286_v39, %v2992_v54 }
 0xe33   :  { %v3023_v44 = vmul.f32 %v4686_v22, %v3016_v43 }
 0xe34   :  { %v5288_v29 = vpop.eup %5287 }
 0xe35   :  { %v3017_v59 = vmul.f32 %v5288_v29, %v2993_v57  ;;  %v5991_v5 = vadd.f32 %v4687_v10, %v3023_v44  ;;  %v4717_v57 = vcombine.high %v4693_v53, %v4693_v53 }
 0xe37   :  { %v3024_v62 = vmul.f32 %v4686_v22, %v3017_v59 }
 0xe38   :  { %v5290_v63 = vpop.eup %5289 }
 0xe39   :  { %v5993_v6 = vadd.f32 %v4687_v10, %v3024_v62  ;;  %v3018_v12 = vmul.f32 %v5290_v63, %v2994_v58  ;;  %v4694_v58 = vld [vmem:[%s6229_s3 + $0xb0] sm:$0xff] }
 0xe3a   :  { %v4719_v19 = vcombine.high %v4694_v58, %v4694_v58  ;;  %v4718_v21 = vcombine.low %v4694_v58, %v4694_v58  ;;  %v6089_v58 = vld [vmem:[%s6229_s3 + $0xe0] sm:$0xff] }
 0xe3b   :  { %v3050_v20 = vpack.c.bf16 %v5993_v6, %v5991_v5  ;;  %v3025_v54 = vmul.f32 %v4686_v22, %v3018_v12 }
 0xe3c   :  { %v3220_v26 = vsel %vm1152_vm12, %v4718_v21, 0 }
 0xe3d   :  { %4723 = vmatmul.mubr.msk.bf16.vlgmr.msra.gmra.mrb[112].mxu0 %vm170_vm2, %v3050_v20  ;;  %4726 = vmatmul.mubr.msk.bf16.vlgmr.msra.gmra.mrb[120].mxu1 %vm170_vm2, %v3050_v20  ;;  %v6009_v11 = vadd.f32 %v4687_v10, %v3025_v54 }
 0xe3e   :  { %3273 = vmatprep.mubr.bf16.mxu0 %v5325_v25  ;;  %3324 = vmatprep.mubr.bf16.mxu1 %v5325_v25 }
 0xe3f   :  { %3334 = vmatpush1.bf16.msra.mxu0 %v3196_v7  ;;  %3385 = vmatpush1.bf16.msra.mxu1 %v3202_v8  ;;  %v3051_v9 = vpack.c.bf16 %v6009_v11, %v6009_v11 }
 0xe40   :  { %4734 = vmatprep.subr.msk.bf16.mxu0 %vm1152_vm12, %v4715_v13  ;;  %4737 = vmatprep.subr.msk.bf16.mxu1 %vm1152_vm12, %v4717_v57 }
 0xe45   :  { %4724 = vmatmul.mubr.msk.bf16.gmra.mrb[116].mxu0 %vm170_vm2, %v3051_v9  ;;  %4727 = vmatmul.mubr.msk.bf16.gmra.mrb[124].mxu1 %vm170_vm2, %v3051_v9 }
 0xe46   :  { %3365 = vmatprep.mubr.bf16.mxu0 %v5325_v25  ;;  %3416 = vmatprep.mubr.bf16.mxu1 %v5325_v25 }
 0xe4d   :  { %4729 = vmatmul.mubr.msk.bf16.vlgmr.msra.gmra.mrb[120].mxu0 %vm170_vm2, %v3050_v20  ;;  %4732 = vmatmul.mubr.msk.bf16.vlgmr.msra.gmra.mrb[128].mxu1 %vm170_vm2, %v3050_v20 }
 0xe4e   :  { %3375 = vmatprep.mubr.bf16.mxu0 %v5325_v25  ;;  %3426 = vmatprep.mubr.bf16.mxu1 %v5325_v25 }
 0xe4f   :  { %3436 = vmatpush1.bf16.msra.mxu0 %v3208_v14  ;;  %3487 = vmatpush1.bf16.msra.mxu1 %v3214_v15 }
 0xe50   :  { %4740 = vmatprep.subr.msk.bf16.mxu0 %vm1152_vm12, %v4719_v19  ;;  %4743 = vmatprep.subr.msk.bf16.mxu1 %vm1152_vm12, %v4721_v60 }
 0xe55   :  { %4730 = vmatmul.mubr.msk.bf16.gmra.mrb[124].mxu0 %vm170_vm2, %v3051_v9  ;;  %4733 = vmatmul.mubr.msk.bf16.gmra.mrb[132].mxu1 %vm170_vm2, %v3051_v9 }
 0xe56   :  { %3467 = vmatprep.mubr.bf16.mxu0 %v5325_v25  ;;  %3518 = vmatprep.mubr.bf16.mxu1 %v5325_v25 }
 0xe5d   :  { %4735 = vmatmul.mubr.msk.bf16.vlgmr.msra.gmra.mrb[128].mxu0 %vm170_vm2, %v3050_v20  ;;  %4738 = vmatmul.mubr.msk.bf16.vlgmr.msra.gmra.mrb[136].mxu1 %vm170_vm2, %v3050_v20 }
 0xe5e   :  { %3477 = vmatprep.mubr.bf16.mxu0 %v5325_v25  ;;  %3528 = vmatprep.mubr.bf16.mxu1 %v5325_v25 }
 0xe5f   :  { %3538 = vmatpush1.bf16.msra.mxu0 %v3220_v26  ;;  %3589 = vmatpush1.bf16.msra.mxu1 %v3226_v28  ;;  %v4753_v28 = vcombine.low %v6067_v0, %v6067_v0 }
 0xe60   :  { %3779 = vmatprep.subr.bf16.mxu0 %v4748_v45  ;;  %3827 = vmatprep.subr.bf16.mxu1 %v4750_v46 }
 0xe65   :  { %4736 = vmatmul.mubr.msk.bf16.gmra.mrb[132].mxu0 %vm170_vm2, %v3051_v9  ;;  %4739 = vmatmul.mubr.msk.bf16.gmra.mrb[140].mxu1 %vm170_vm2, %v3051_v9 }
 0xe66   :  { %3569 = vmatprep.mubr.bf16.mxu0 %v5325_v25  ;;  %3620 = vmatprep.mubr.bf16.mxu1 %v5325_v25 }
 0xe6d   :  { %4741 = vmatmul.mubr.msk.bf16.vlgmr.msra.gmra.mrb[136].mxu0 %vm170_vm2, %v3050_v20  ;;  %4744 = vmatmul.mubr.msk.bf16.vlgmr.msra.gmra.mrb[144].mxu1 %vm170_vm2, %v3050_v20 }
 0xe6e   :  { %3579 = vmatprep.mubr.bf16.mxu0 %v5325_v25  ;;  %3630 = vmatprep.mubr.bf16.mxu1 %v5325_v25  ;;  %v6062_v25 = vld [vmem:[%s6229_s3 + $0xd0] sm:$0xff] }
 0xe6f   :  { %3780 = vmatpush1.bf16.xpose.msra.mxu0 %v4747_v3  ;;  %3828 = vmatpush1.bf16.xpose.msra.mxu1 %v4749_v47  ;;  %v4752_v48 = vcombine.high %v6062_v25, %v6062_v25  ;;  %v4751_v26 = vcombine.low %v6062_v25, %v6062_v25  ;;  %v4756_v3 = vcombine.high %v6089_v58, %v6089_v58 }
 0xe70   :  { %3923 = vmatprep.subr.bf16.mxu1 %v4754_v49  ;;  %v4758_v47 = vcombine.high %v6094_v56, %v6094_v56 }
 0xe71   :  { %3875 = vmatprep.subr.bf16.mxu0 %v4752_v48 }
 0xe75   :  { %4742 = vmatmul.mubr.msk.bf16.gmra.mrb[140].mxu0 %vm170_vm2, %v3051_v9  ;;  %4745 = vmatmul.mubr.msk.bf16.gmra.mrb[148].mxu1 %vm170_vm2, %v3051_v9 }
 0xf10   :  { %v3265_v24 = vpop.f32.mrb[112].mxu0  ;;  %v3316_v39 = vpop.f32.mrb[120].mxu1 }
 0xf11   :  { %v3266_v43 = vadd.f32 %v3265_v24, %v3060_v42  ;;  %v3317_v22 = vadd.f32 %v3316_v39, %v3068_v50  ;;  %v3267_v29 = vpop.f32.mrb[113].mxu0  ;;  %v3318_v44 = vpop.f32.mrb[121].mxu1 }
 0xf12   :  { %v3268_v59 = vadd.f32 %v3267_v29, %v3064_v16  ;;  %v3319_v10 = vadd.f32 %v3318_v44, %v3072_v52  ;;  %v3269_v62 = vpop.f32.mrb[114].mxu0  ;;  %v3320_v63 = vpop.f32.mrb[122].mxu1  ;;  %v3076_v29 = vrot.slane %v6076_v27, %v5718_v17 }
 0xf13   :  { %v3270_v1 = vadd.f32 %v3269_v62, %v3060_v42  ;;  %v3321_v38 = vadd.f32 %v3320_v63, %v3068_v50  ;;  %v3271_v12 = vpop.f32.mrb[115].mxu0  ;;  %v3322_v61 = vpop.f32.mrb[123].mxu1  ;;  %v3639_v54 = vmax.f32 %v3266_v43, 0.0  ;;  %v3641_v7 = vmax.f32 %v3317_v22, 0.0 }
 0xf14   :  { %v3272_v53 = vadd.f32 %v3271_v12, %v3064_v16  ;;  %v3323_v20 = vadd.f32 %v3322_v61, %v3072_v52  ;;  %v3640_v57 = vmax.f32 %v3268_v59, 0.0  ;;  %v3642_v9 = vmax.f32 %v3319_v10, 0.0 }
 0xf15   :  { %v3655_v8 = vmax.f32 %v3270_v1, 0.0  ;;  %v3657_v13 = vmax.f32 %v3321_v38, 0.0  ;;  %v3080_v59 = vrot.slane %v6076_v27, %v5732_v30  ;;  %v3088_v10 = vrot.slane %v6076_v27, %v5735_v31 }
 0xf16   :  { %v3656_v51 = vmax.f32 %v3272_v53, 0.0  ;;  %v3658_v55 = vmax.f32 %v3323_v20, 0.0 }
 0xf17   :  { %v3687_v14 = vpack.c.bf16 %v3655_v8, %v3639_v54  ;;  %v3689_v15 = vpack.c.bf16 %v3657_v13, %v3641_v7 }
 0xf18   :  { %v3688_v19 = vpack.c.bf16 %v3656_v51, %v3640_v57  ;;  %v3690_v60 = vpack.c.bf16 %v3658_v55, %v3642_v9  ;;  %v3275_v21 = vpop.f32.mrb[116].mxu0  ;;  %v3326_v23 = vpop.f32.mrb[124].mxu1 }
 0xf19   :  { %v3276_v33 = vadd.f32 %v3275_v21, %v3060_v42  ;;  %v3327_v34 = vadd.f32 %v3326_v23, %v3068_v50  ;;  %v3277_v45 = vpop.f32.mrb[117].mxu0  ;;  %v3328_v46 = vpop.f32.mrb[125].mxu1 }
 0xf1a   :  { %v3278_v48 = vadd.f32 %v3277_v45, %v3064_v16  ;;  %v3329_v49 = vadd.f32 %v3328_v46, %v3072_v52  ;;  %v3279_v24 = vpop.f32.mrb[118].mxu0  ;;  %v3330_v39 = vpop.f32.mrb[126].mxu1  ;;  %3811 = vmatprep.mubr.bf16.mxu0 %v3688_v19  ;;  %3859 = vmatprep.mubr.bf16.mxu1 %v3690_v60  ;;  %v3084_v16 = vrot.slane %v6076_v27, %v5721_v18  ;;  %v6120_v45 = vld [vmem:[%s6229_s3 + $0xf8] sm:$0xff] }
 0xf1b   :  { %v3280_v25 = vpop.f32.mrb[119].mxu0  ;;  %v3331_v43 = vpop.f32.mrb[127].mxu1  ;;  %3812 = vmatmul.mubr.bf16.vlgmr.msra.gmra.mrb[144].mxu0 %v3687_v14  ;;  %3860 = vmatmul.mubr.bf16.vlgmr.msra.gmra.mrb[152].mxu1 %v3689_v15  ;;  %v3671_v50 = vmax.f32 %v3276_v33, 0.0  ;;  %v3673_v22 = vmax.f32 %v3327_v34, 0.0  ;;  %v6115_v34 = vld [vmem:[%s6229_s3 + $0xf0] sm:$0xff]  ;;  %v4755_v39 = vcombine.low %v6089_v58, %v6089_v58  ;;  %v6133_v58 = vld [vmem:[%s6230_s4 + $0x18] sm:$0xff] }
 0xf1c   :  { %v3672_v0 = vmax.f32 %v3278_v48, 0.0  ;;  %v3674_v42 = vmax.f32 %v3329_v49, 0.0  ;;  %3876 = vmatpush1.bf16.xpose.msra.mxu0 %v4751_v26  ;;  %3924 = vmatpush1.bf16.xpose.msra.mxu1 %v4753_v28  ;;  %v4757_v25 = vcombine.low %v6094_v56, %v6094_v56 }
 0xf1d   :  { %3971 = vmatprep.subr.bf16.mxu0 %v4756_v3  ;;  %4019 = vmatprep.subr.bf16.mxu1 %v4758_v47  ;;  %v3703_v1 = vpack.c.bf16 %v3671_v50, %v3671_v50  ;;  %v3705_v38 = vpack.c.bf16 %v3673_v22, %v3673_v22  ;;  %v4760_v22 = vcombine.high %v6115_v34, %v6115_v34 }
 0xf1e   :  { %v3704_v52 = vpack.c.bf16 %v3672_v0, %v3672_v0  ;;  %v3706_v44 = vpack.c.bf16 %v3674_v42, %v3674_v42 }
 0xf20   :  { %v3367_v62 = vpop.f32.mrb[120].mxu0  ;;  %v3418_v63 = vpop.f32.mrb[128].mxu1  ;;  %3819 = vmatprep.mubr.bf16.mxu0 %v3704_v52  ;;  %3867 = vmatprep.mubr.bf16.mxu1 %v3706_v44  ;;  %v4762_v52 = vcombine.high %v6120_v45, %v6120_v45 }
 0xf21   :  { %v3368_v12 = vadd.f32 %v3367_v62, %v3076_v29  ;;  %v3419_v61 = vadd.f32 %v3418_v63, %v3084_v16  ;;  %v3369_v53 = vpop.f32.mrb[121].mxu0  ;;  %v3420_v20 = vpop.f32.mrb[129].mxu1 }
 0xf22   :  { %v3370_v54 = vadd.f32 %v3369_v53, %v3080_v59  ;;  %v3421_v7 = vadd.f32 %v3420_v20, %v3088_v10  ;;  %v3371_v8 = vpop.f32.mrb[122].mxu0  ;;  %v3422_v13 = vpop.f32.mrb[130].mxu1 }
 0xf23   :  { %v3372_v57 = vadd.f32 %v3371_v8, %v3076_v29  ;;  %v3423_v9 = vadd.f32 %v3422_v13, %v3084_v16  ;;  %v3373_v51 = vpop.f32.mrb[123].mxu0  ;;  %v3424_v55 = vpop.f32.mrb[131].mxu1  ;;  %3820 = vmatmul.mubr.bf16.gmra.mrb[148].mxu0 %v3703_v1  ;;  %3868 = vmatmul.mubr.bf16.gmra.mrb[156].mxu1 %v3705_v38  ;;  %v3643_v15 = vmax.f32 %v3368_v12, 0.0  ;;  %v3645_v19 = vmax.f32 %v3419_v61, 0.0 }
 0xf24   :  { %v3374_v27 = vadd.f32 %v3373_v51, %v3080_v59  ;;  %v3425_v14 = vadd.f32 %v3424_v55, %v3088_v10  ;;  %v3644_v23 = vmax.f32 %v3370_v54, 0.0  ;;  %v3646_v26 = vmax.f32 %v3421_v7, 0.0 }
 0xf25   :  { %v3659_v60 = vmax.f32 %v3372_v57, 0.0  ;;  %v3661_v21 = vmax.f32 %v3423_v9, 0.0  ;;  %v3100_v61 = vrot.slane %v6133_v58, %v5686_v37  ;;  %v3096_v54 = vrot.slane %v6133_v58, %v5694_v40 }
 0xf26   :  { %v3660_v28 = vmax.f32 %v3374_v27, 0.0  ;;  %v3662_v33 = vmax.f32 %v3425_v14, 0.0  ;;  %v3104_v7 = vrot.slane %v6133_v58, %v5697_v41 }
 0xf27   :  { %v3691_v46 = vpack.c.bf16 %v3659_v60, %v3643_v15  ;;  %v3693_v3 = vpack.c.bf16 %v3661_v21, %v3645_v19 }
 0xf28   :  { %v3692_v47 = vpack.c.bf16 %v3660_v28, %v3644_v23  ;;  %v3694_v48 = vpack.c.bf16 %v3662_v33, %v3646_v26  ;;  %v3377_v49 = vpop.f32.mrb[124].mxu0  ;;  %v3428_v24 = vpop.f32.mrb[132].mxu1 }
 0xf29   :  { %v3378_v43 = vadd.f32 %v3377_v49, %v3076_v29  ;;  %v3429_v0 = vadd.f32 %v3428_v24, %v3084_v16  ;;  %v3379_v42 = vpop.f32.mrb[125].mxu0  ;;  %v3430_v50 = vpop.f32.mrb[133].mxu1 }
 0xf2a   :  { %v3380_v44 = vadd.f32 %v3379_v42, %v3080_v59  ;;  %v3431_v62 = vadd.f32 %v3430_v50, %v3088_v10  ;;  %v3381_v63 = vpop.f32.mrb[126].mxu0  ;;  %v3432_v1 = vpop.f32.mrb[134].mxu1  ;;  %3907 = vmatprep.mubr.bf16.mxu0 %v3692_v47  ;;  %3955 = vmatprep.mubr.bf16.mxu1 %v3694_v48  ;;  %v3092_v10 = vrot.slane %v6133_v58, %v5683_v36 }
 0xf2b   :  { %v3382_v56 = vpop.f32.mrb[127].mxu0  ;;  %v3433_v29 = vpop.f32.mrb[135].mxu1  ;;  %3908 = vmatmul.mubr.bf16.vlgmr.msra.gmra.mrb[152].mxu0 %v3691_v46  ;;  %3956 = vmatmul.mubr.bf16.vlgmr.msra.gmra.mrb[160].mxu1 %v3693_v3  ;;  %v3675_v12 = vmax.f32 %v3378_v43, 0.0  ;;  %v3677_v59 = vmax.f32 %v3429_v0, 0.0 }
 0xf2c   :  { %v3676_v16 = vmax.f32 %v3380_v44, 0.0  ;;  %v3678_v38 = vmax.f32 %v3431_v62, 0.0  ;;  %3972 = vmatpush1.bf16.xpose.msra.mxu0 %v4755_v39  ;;  %4020 = vmatpush1.bf16.xpose.msra.mxu1 %v4757_v25 }
 0xf2d   :  { %4067 = vmatprep.subr.bf16.mxu0 %v4760_v22  ;;  %4115 = vmatprep.subr.bf16.mxu1 %v4762_v52  ;;  %v3707_v57 = vpack.c.bf16 %v3675_v12, %v3675_v12  ;;  %v3709_v9 = vpack.c.bf16 %v3677_v59, %v3677_v59  ;;  %v4759_v22 = vcombine.low %v6115_v34, %v6115_v34 }
 0xf2e   :  { %v3708_v53 = vpack.c.bf16 %v3676_v16, %v3676_v16  ;;  %v3710_v20 = vpack.c.bf16 %v3678_v38, %v3678_v38  ;;  %v4761_v52 = vcombine.low %v6120_v45, %v6120_v45 }
 0xf30   :  { %v3469_v8 = vpop.f32.mrb[128].mxu0  ;;  %v3520_v13 = vpop.f32.mrb[136].mxu1  ;;  %3915 = vmatprep.mubr.bf16.mxu0 %v3708_v53  ;;  %3963 = vmatprep.mubr.bf16.mxu1 %v3710_v20 }
 0xf31   :  { %v3470_v36 = vadd.f32 %v3469_v8, %v3092_v10  ;;  %v3521_v51 = vadd.f32 %v3520_v13, %v3100_v61  ;;  %v3471_v55 = vpop.f32.mrb[129].mxu0  ;;  %v3522_v37 = vpop.f32.mrb[137].mxu1  ;;  %v3112_v8 = vrot.slane %v6133_v58, %v5732_v30  ;;  %v3120_v13 = vrot.slane %v6133_v58, %v5735_v31 }
 0xf32   :  { %v3472_v27 = vadd.f32 %v3471_v55, %v3096_v54  ;;  %v3523_v14 = vadd.f32 %v3522_v37, %v3104_v7  ;;  %v3473_v15 = vpop.f32.mrb[130].mxu0  ;;  %v3524_v19 = vpop.f32.mrb[138].mxu1 }
 0xf33   :  { %v3474_v60 = vadd.f32 %v3473_v15, %v3092_v10  ;;  %v3525_v21 = vadd.f32 %v3524_v19, %v3100_v61  ;;  %v3475_v40 = vpop.f32.mrb[131].mxu0  ;;  %v3526_v23 = vpop.f32.mrb[139].mxu1  ;;  %3916 = vmatmul.mubr.bf16.gmra.mrb[156].mxu0 %v3707_v57  ;;  %3964 = vmatmul.mubr.bf16.gmra.mrb[164].mxu1 %v3709_v9  ;;  %v3647_v28 = vmax.f32 %v3470_v36, 0.0  ;;  %v3649_v33 = vmax.f32 %v3521_v51, 0.0 }
 0xf34   :  { %v3476_v41 = vadd.f32 %v3475_v40, %v3096_v54  ;;  %v3527_v26 = vadd.f32 %v3526_v23, %v3104_v7  ;;  %v3648_v47 = vmax.f32 %v3472_v27, 0.0  ;;  %v3650_v48 = vmax.f32 %v3523_v14, 0.0 }
 0xf35   :  { %v3663_v46 = vmax.f32 %v3474_v60, 0.0  ;;  %v3665_v3 = vmax.f32 %v3525_v21, 0.0 }
 0xf36   :  { %v3664_v49 = vmax.f32 %v3476_v41, 0.0  ;;  %v3666_v24 = vmax.f32 %v3527_v26, 0.0 }
 0xf37   :  { %v3695_v39 = vpack.c.bf16 %v3663_v46, %v3647_v28  ;;  %v3697_v25 = vpack.c.bf16 %v3665_v3, %v3649_v33 }
 0xf38   :  { %v3696_v43 = vpack.c.bf16 %v3664_v49, %v3648_v47  ;;  %v3698_v0 = vpack.c.bf16 %v3666_v24, %v3650_v48  ;;  %v3479_v42 = vpop.f32.mrb[132].mxu0  ;;  %v3530_v50 = vpop.f32.mrb[140].mxu1 }
 0xf39   :  { %v3480_v44 = vadd.f32 %v3479_v42, %v3092_v10  ;;  %v3531_v62 = vadd.f32 %v3530_v50, %v3100_v61  ;;  %v3481_v63 = vpop.f32.mrb[133].mxu0  ;;  %v3532_v1 = vpop.f32.mrb[141].mxu1  ;;  %v3108_v10 = vrot.slane %v6133_v58, %v5718_v17  ;;  %v3116_v61 = vrot.slane %v6133_v58, %v5721_v18 }
 0xf3a   :  { %v3482_v56 = vadd.f32 %v3481_v63, %v3096_v54  ;;  %v3533_v29 = vadd.f32 %v3532_v1, %v3104_v7  ;;  %v3483_v16 = vpop.f32.mrb[134].mxu0  ;;  %v3534_v38 = vpop.f32.mrb[142].mxu1  ;;  %4003 = vmatprep.mubr.bf16.mxu0 %v3696_v43  ;;  %4051 = vmatprep.mubr.bf16.mxu1 %v3698_v0 }
 0xf3b   :  { %v3484_v12 = vpop.f32.mrb[135].mxu0  ;;  %v3535_v59 = vpop.f32.mrb[143].mxu1  ;;  %4004 = vmatmul.mubr.bf16.vlgmr.msra.gmra.mrb[160].mxu0 %v3695_v39  ;;  %4052 = vmatmul.mubr.bf16.vlgmr.msra.gmra.mrb[168].mxu1 %v3697_v25  ;;  %v3679_v34 = vmax.f32 %v3480_v44, 0.0  ;;  %v3681_v45 = vmax.f32 %v3531_v62, 0.0 }
 0xf3c   :  { %v3680_v53 = vmax.f32 %v3482_v56, 0.0  ;;  %v3682_v20 = vmax.f32 %v3533_v29, 0.0  ;;  %4068 = vmatpush1.bf16.xpose.msra.mxu0 %v4759_v22  ;;  %4116 = vmatpush1.bf16.xpose.msra.mxu1 %v4761_v52 }
 0xf3d   :  { %5147 = vmatprep.subr.bf16.mxu0 %v5321_v2  ;;  %5111 = vmatprep.subr.mxu1 %v5323_v4  ;;  %v3711_v17 = vpack.c.bf16 %v3679_v34, %v3679_v34  ;;  %v3713_v36 = vpack.c.bf16 %v3681_v45, %v3681_v45  ;;  %v4746_v45 = vld [vmem:[%s6228_s2 + $0x5e] ss:$0 sm:$0xff] }
 0xf3e   :  { %v3712_v54 = vpack.c.bf16 %v3680_v53, %v3680_v53  ;;  %v3714_v7 = vpack.c.bf16 %v3682_v20, %v3682_v20 }
 0xf40   :  { %v3571_v57 = vpop.f32.mrb[136].mxu0  ;;  %v3622_v9 = vpop.f32.mrb[144].mxu1  ;;  %4011 = vmatprep.mubr.bf16.mxu0 %v3712_v54  ;;  %4059 = vmatprep.mubr.bf16.mxu1 %v3714_v7 }
 0xf41   :  { %v3572_v51 = vadd.f32 %v3571_v57, %v3108_v10  ;;  %v3623_v18 = vadd.f32 %v3622_v9, %v3116_v61  ;;  %v3573_v55 = vpop.f32.mrb[137].mxu0  ;;  %v3624_v37 = vpop.f32.mrb[145].mxu1 }
 0xf42   :  { %v3574_v27 = vadd.f32 %v3573_v55, %v3112_v8  ;;  %v3625_v14 = vadd.f32 %v3624_v37, %v3120_v13  ;;  %v3575_v15 = vpop.f32.mrb[138].mxu0  ;;  %v3626_v19 = vpop.f32.mrb[146].mxu1 }
 0xf43   :  { %v3576_v60 = vadd.f32 %v3575_v15, %v3108_v10  ;;  %v3627_v21 = vadd.f32 %v3626_v19, %v3116_v61  ;;  %v3577_v30 = vpop.f32.mrb[139].mxu0  ;;  %v3628_v40 = vpop.f32.mrb[147].mxu1  ;;  %4012 = vmatmul.mubr.bf16.gmra.mrb[164].mxu0 %v3711_v17  ;;  %4060 = vmatmul.mubr.bf16.gmra.mrb[172].mxu1 %v3713_v36  ;;  %v3651_v23 = vmax.f32 %v3572_v51, 0.0  ;;  %v3653_v41 = vmax.f32 %v3623_v18, 0.0 }
 0xf44   :  { %v3578_v31 = vadd.f32 %v3577_v30, %v3112_v8  ;;  %v3629_v58 = vadd.f32 %v3628_v40, %v3120_v13  ;;  %v3652_v33 = vmax.f32 %v3574_v27, 0.0  ;;  %v3654_v46 = vmax.f32 %v3625_v14, 0.0 }
 0xf45   :  { %v3667_v26 = vmax.f32 %v3576_v60, 0.0  ;;  %v3669_v28 = vmax.f32 %v3627_v21, 0.0 }
 0xf46   :  { %v3668_v3 = vmax.f32 %v3578_v31, 0.0  ;;  %v3670_v47 = vmax.f32 %v3629_v58, 0.0 }
 0xf47   :  { %v3699_v48 = vpack.c.bf16 %v3667_v26, %v3651_v23  ;;  %v3701_v49 = vpack.c.bf16 %v3669_v28, %v3653_v41 }
 0xf48   :  { %v3700_v24 = vpack.c.bf16 %v3668_v3, %v3652_v33  ;;  %v3702_v39 = vpack.c.bf16 %v3670_v47, %v3654_v46  ;;  %v3581_v25 = vpop.f32.mrb[140].mxu0  ;;  %v3632_v43 = vpop.f32.mrb[148].mxu1 }
 0xf49   :  { %v3582_v0 = vadd.f32 %v3581_v25, %v3108_v10  ;;  %v3633_v42 = vadd.f32 %v3632_v43, %v3116_v61  ;;  %v3583_v50 = vpop.f32.mrb[141].mxu0  ;;  %v3634_v22 = vpop.f32.mrb[149].mxu1 }
 0xf4a   :  { %v3584_v52 = vadd.f32 %v3583_v50, %v3112_v8  ;;  %v3635_v44 = vadd.f32 %v3634_v22, %v3120_v13  ;;  %v3585_v62 = vpop.f32.mrb[142].mxu0  ;;  %v3636_v63 = vpop.f32.mrb[150].mxu1  ;;  %4099 = vmatprep.mubr.bf16.mxu0 %v3700_v24  ;;  %4147 = vmatprep.mubr.bf16.mxu1 %v3702_v39 }
 0xf4b   :  { %v3586_v1 = vpop.f32.mrb[143].mxu0  ;;  %v3637_v56 = vpop.f32.mrb[151].mxu1  ;;  %4100 = vmatmul.mubr.bf16.vlgmr.msra.gmra.mrb[168].mxu0 %v3699_v48  ;;  %4148 = vmatmul.mubr.bf16.vlgmr.msra.gmra.mrb[176].mxu1 %v3701_v49  ;;  %v3683_v38 = vmax.f32 %v3582_v0, 0.0  ;;  %v3685_v12 = vmax.f32 %v3633_v42, 0.0 }
 0xf4c   :  { %v3684_v29 = vmax.f32 %v3584_v52, 0.0  ;;  %v3686_v16 = vmax.f32 %v3635_v44, 0.0 }
 0xf4d   :  { %v3715_v20 = vpack.c.bf16 %v3683_v38, %v3683_v38  ;;  %v3717_v34 = vpack.c.bf16 %v3685_v12, %v3685_v12 }
 0xf4e   :  { %v3716_v59 = vpack.c.bf16 %v3684_v29, %v3684_v29  ;;  %v3718_v53 = vpack.c.bf16 %v3686_v16, %v3686_v16 }
 0xf50   :  { %4107 = vmatprep.mubr.bf16.mxu0 %v3716_v59  ;;  %4155 = vmatprep.mubr.bf16.mxu1 %v3718_v53 }
 0xf53   :  { %4108 = vmatmul.mubr.bf16.gmra.mrb[172].mxu0 %v3715_v20  ;;  %4156 = vmatmul.mubr.bf16.gmra.mrb[180].mxu1 %v3717_v34 }
 0xf54   :  { %5096 = vmatprep.mubr.msk.f32.mxu0 %vm5322_vm0, %v5323_v4  ;;  %5113 = vmatprep.mubr.msk.f32.mxu1 %vm5322_vm0, %v5323_v4 }
 0xfee   :  { %v3813_v10 = vpop.f32.mrb[144].mxu0  ;;  %v3861_v61 = vpop.f32.mrb[152].mxu1 }
 0xfef   :  { %v3814_v54 = vadd.f32 %v4746_v45, %v3813_v10  ;;  %v3815_v7 = vpop.f32.mrb[145].mxu0  ;;  %v3863_v8 = vpop.f32.mrb[153].mxu1 }
 0xff0   :  { %v3816_v13 = vpop.f32.mrb[146].mxu0  ;;  %v3864_v57 = vpop.f32.mrb[154].mxu1 }
 0xff1   :  { %v3862_v9 = vadd.f32 %v3861_v61, %v3814_v54  ;;  %v3817_v17 = vadd.f32 %v4746_v45, %v3816_v13  ;;  %v3818_v36 = vpop.f32.mrb[147].mxu0  ;;  %v3866_v51 = vpop.f32.mrb[155].mxu1 }
 0xff3   :  { %v3865_v18 = vadd.f32 %v3864_v57, %v3817_v17 }
 0xff6   :  { %v3821_v55 = vpop.f32.mrb[148].mxu0  ;;  %v3869_v37 = vpop.f32.mrb[156].mxu1 }
 0xff7   :  { %v3822_v27 = vadd.f32 %v4746_v45, %v3821_v55  ;;  %v3823_v14 = vpop.f32.mrb[149].mxu0  ;;  %v3871_v15 = vpop.f32.mrb[157].mxu1 }
 0xff8   :  { %v3824_v19 = vpop.f32.mrb[150].mxu0  ;;  %v3872_v60 = vpop.f32.mrb[158].mxu1 }
 0xff9   :  { %v3870_v21 = vadd.f32 %v3869_v37, %v3822_v27  ;;  %v3825_v30 = vpop.f32.mrb[151].mxu0  ;;  %v3873_v40 = vpop.f32.mrb[159].mxu1 }
 0xffe   :  { %v3909_v31 = vpop.f32.mrb[152].mxu0  ;;  %v3957_v58 = vpop.f32.mrb[160].mxu1 }
 0xfff   :  { %v3910_v23 = vadd.f32 %v3909_v31, %v3862_v9  ;;  %v3911_v41 = vpop.f32.mrb[153].mxu0  ;;  %v3959_v26 = vpop.f32.mrb[161].mxu1 }
0x1000   :  { %v3912_v28 = vpop.f32.mrb[154].mxu0  ;;  %v3960_v33 = vpop.f32.mrb[162].mxu1 }
0x1001   :  { %v3958_v46 = vadd.f32 %v3957_v58, %v3910_v23  ;;  %v3913_v3 = vadd.f32 %v3912_v28, %v3865_v18  ;;  %v3914_v47 = vpop.f32.mrb[155].mxu0  ;;  %v3962_v48 = vpop.f32.mrb[163].mxu1 }
0x1003   :  { %v3961_v49 = vadd.f32 %v3960_v33, %v3913_v3 }
0x1006   :  { %v3917_v24 = vpop.f32.mrb[156].mxu0  ;;  %v3965_v39 = vpop.f32.mrb[164].mxu1 }
0x1007   :  { %v3918_v25 = vadd.f32 %v3917_v24, %v3870_v21  ;;  %v3919_v43 = vpop.f32.mrb[157].mxu0  ;;  %v3967_v0 = vpop.f32.mrb[165].mxu1 }
0x1008   :  { %v3920_v42 = vpop.f32.mrb[158].mxu0  ;;  %v3968_v50 = vpop.f32.mrb[166].mxu1 }
0x1009   :  { %v3966_v22 = vadd.f32 %v3965_v39, %v3918_v25  ;;  %v3921_v52 = vpop.f32.mrb[159].mxu0  ;;  %v3969_v44 = vpop.f32.mrb[167].mxu1 }
0x100e   :  { %v4005_v62 = vpop.f32.mrb[160].mxu0  ;;  %v4053_v63 = vpop.f32.mrb[168].mxu1 }
0x100f   :  { %v4006_v1 = vadd.f32 %v4005_v62, %v3958_v46  ;;  %v4007_v56 = vpop.f32.mrb[161].mxu0  ;;  %v4055_v29 = vpop.f32.mrb[169].mxu1 }
0x1010   :  { %v4008_v16 = vpop.f32.mrb[162].mxu0  ;;  %v4056_v38 = vpop.f32.mrb[170].mxu1 }
0x1011   :  { %v4054_v12 = vadd.f32 %v4053_v63, %v4006_v1  ;;  %v4009_v59 = vadd.f32 %v4008_v16, %v3961_v49  ;;  %v4010_v53 = vpop.f32.mrb[163].mxu0  ;;  %v4058_v20 = vpop.f32.mrb[171].mxu1 }
0x1013   :  { %v4057_v34 = vadd.f32 %v4056_v38, %v4009_v59 }
0x1016   :  { %v4013_v45 = vpop.f32.mrb[164].mxu0  ;;  %v4061_v10 = vpop.f32.mrb[172].mxu1 }
0x1017   :  { %v4014_v61 = vadd.f32 %v4013_v45, %v3966_v22  ;;  %v4015_v54 = vpop.f32.mrb[165].mxu0  ;;  %v4063_v7 = vpop.f32.mrb[173].mxu1 }
0x1018   :  { %v4016_v8 = vpop.f32.mrb[166].mxu0  ;;  %v4064_v13 = vpop.f32.mrb[174].mxu1  ;;  %v4763_v54 = vld [vmem:[%s6228_s2 + $0x5c] ss:$0 sm:$0xff] }
0x1019   :  { %v4062_v57 = vadd.f32 %v4061_v10, %v4014_v61  ;;  %v4017_v9 = vpop.f32.mrb[167].mxu0  ;;  %v4065_v17 = vpop.f32.mrb[175].mxu1 }
0x101a   :  { %v4764_v9 = vld [vmem:[%s6228_s2 + $0x5d] ss:$0 sm:$0xff] }
0x101e   :  { %v4101_v36 = vpop.f32.mrb[168].mxu0  ;;  %v4149_v51 = vpop.f32.mrb[176].mxu1 }
0x101f   :  { %v4102_v18 = vadd.f32 %v4101_v36, %v4054_v12  ;;  %v4103_v55 = vpop.f32.mrb[169].mxu0  ;;  %v4151_v37 = vpop.f32.mrb[177].mxu1  ;;  %v4221_v36 = vmul.u32 12, %v5680_v35 }
0x1020   :  { %v4104_v27 = vpop.f32.mrb[170].mxu0  ;;  %v4152_v14 = vpop.f32.mrb[178].mxu1 }
0x1021   :  { %v4150_v15 = vadd.f32 %v4149_v51, %v4102_v18  ;;  %v4105_v19 = vadd.f32 %v4104_v27, %v4057_v34  ;;  %v4106_v60 = vpop.f32.mrb[171].mxu0  ;;  %v4154_v21 = vpop.f32.mrb[179].mxu1  ;;  %vm4222_vm13 = vcmp.eq.s32.totalorder %v5465_v32, %v4221_v36 }
0x1022   :  { %v4298_v60 = vld [vmem:[%s6228_s2 + $0x60] sm:$0xff]  ;;  %v4299_v21 = vld [vmem:[%s6228_s2 + $0x68] sm:$0xff] }
0x1023   :  { %v4153_v30 = vadd.f32 %v4152_v14, %v4105_v19  ;;  %v4163_v40 = vadd.f32 %v4150_v15, %v5991_v5  ;;  %v4765_v19 = vsel %vm4222_vm13, 1.0, %v5323_v4 }
0x1025   :  { %v4166_v31 = vsel %vm170_vm2, %v4163_v40, 0.0  ;;  %v4164_v58 = vadd.f32 %v4153_v30, %v5993_v6  ;;  %v4300_v30 = vld [vmem:[%s6228_s2 + $0x70] sm:$0xff] }
0x1026   :  { %v4109_v23 = vpop.f32.mrb[172].mxu0  ;;  %v4157_v41 = vpop.f32.mrb[180].mxu1  ;;  %4167 = vadd.xlane.f32.xlu0 %v4166_v31  ;;  %v4767_v31 = vld [vmem:[%s6228_s2 + $0x80] ss:$0 sm:$0xff] }
0x1027   :  { %v4110_v26 = vadd.f32 %v4109_v23, %v4062_v57  ;;  %v4111_v28 = vpop.f32.mrb[173].mxu0  ;;  %v4159_v33 = vpop.f32.mrb[181].mxu1  ;;  %v4169_v46 = vsel %vm170_vm2, %v4164_v58, 0.0 }
0x1028   :  { %v4112_v3 = vpop.f32.mrb[174].mxu0  ;;  %v4160_v47 = vpop.f32.mrb[182].mxu1  ;;  %4170 = vadd.xlane.f32.xlu1 %v4169_v46 }
0x1029   :  { %v4158_v48 = vadd.f32 %v4157_v41, %v4110_v26  ;;  %v4113_v49 = vpop.f32.mrb[175].mxu0  ;;  %v4161_v24 = vpop.f32.mrb[183].mxu1  ;;  %v4769_v26 = vld [vmem:[%s6228_s2 + $0x81] ss:$0 sm:$0xff]  ;;  %v4771_v47 = vld [vmem:[%s6228_s2 + $0x82] ss:$0 sm:$0xff] }
0x102b   :  { %v4165_v5 = vadd.f32 %v4158_v48, %v6009_v11 }
0x102d   :  { %v4172_v39 = vsel %vm170_vm2, %v4165_v5, 0.0 }
0x102e   :  { %4173 = vadd.xlane.f32.xlu0 %v4172_v39 }
0x10b3   :  { %v4168_v6 = vpop.xlane.xlu0 %4167 }
0x10b4   :  { %v4175_v25 = vmul.f32 0.125, %v4168_v6 }
0x10b5   :  { %v4171_v43 = vpop.xlane.xlu1 %4170 }
0x10b6   :  { %v4178_v0 = vsub.f32 %v4163_v40, %v4175_v25  ;;  %v4176_v42 = vmul.f32 0.125, %v4171_v43  ;;  %v5151_v40 = vpack.c.bf16 %v4300_v30, %v4299_v21 }
0x10b8   :  { %v4179_v50 = vsub.f32 %v4164_v58, %v4176_v42  ;;  %v4181_v22 = vmul.f32 %v4178_v0, %v4178_v0 }
0x10ba   :  { %v4184_v52 = vsel %vm170_vm2, %v4181_v22, 0.0  ;;  %v4182_v44 = vmul.f32 %v4179_v50, %v4179_v50 }
0x10bb   :  { %4185 = vadd.xlane.f32.xlu1 %v4184_v52  ;;  %v4174_v62 = vpop.xlane.xlu0 %4173 }
0x10bc   :  { %v4177_v63 = vmul.f32 0.125, %v4174_v62  ;;  %v4187_v1 = vsel %vm170_vm2, %v4182_v44, 0.0 }
0x10bd   :  { %4188 = vadd.xlane.f32.xlu0 %v4187_v1 }
0x10be   :  { %v4180_v11 = vsub.f32 %v4165_v5, %v4177_v63 }
0x10c0   :  { %v4183_v56 = vmul.f32 %v4180_v11, %v4180_v11 }
0x10c2   :  { %v4190_v29 = vsel %vm170_vm2, %v4183_v56, 0.0 }
0x10c3   :  { %4191 = vadd.xlane.f32.xlu1 %v4190_v29 }
0x1148   :  { %v4186_v16 = vpop.xlane.xlu1 %4185 }
0x1149   :  { %v4193_v38 = vmul.f32 0.125, %v4186_v16 }
0x114a   :  { %v4189_v12 = vpop.xlane.xlu0 %4188 }
0x114b   :  { %v4196_v59 = vadd.f32 1e-05, %v4193_v38  ;;  %v4194_v53 = vmul.f32 0.125, %v4189_v12 }
0x114d   :  { %5291 = vrsqrt.f32 %v4196_v59  ;;  %v4197_v20 = vadd.f32 1e-05, %v4194_v53 }
0x114f   :  { %5293 = vrsqrt.f32 %v4197_v20 }
0x1150   :  { %v4192_v34 = vpop.xlane.xlu1 %4191 }
0x1151   :  { %v4195_v45 = vmul.f32 0.125, %v4192_v34 }
0x1153   :  { %v4198_v10 = vadd.f32 1e-05, %v4195_v45 }
0x1155   :  { %5295 = vrsqrt.f32 %v4198_v10 }
0x1157   :  { %v5292_v61 = vpop.eup %5291 }
0x1158   :  { %v4202_v7 = vmul.f32 %v5292_v61, %v4178_v0 }
0x1159   :  { %v5294_v8 = vpop.eup %5293 }
0x115a   :  { %v4203_v13 = vmul.f32 %v5294_v8, %v4179_v50  ;;  %v4209_v57 = vmul.f32 %v4763_v54, %v4202_v7 }
0x115c   :  { %v4210_v17 = vmul.f32 %v4763_v54, %v4203_v13  ;;  %v4216_v51 = vadd.f32 %v4764_v9, %v4209_v57 }
0x115e   :  { %v4217_v18 = vadd.f32 %v4764_v9, %v4210_v17 }
0x115f   :  { %v5296_v55 = vpop.eup %5295 }
0x1160   :  { %v5148_v37 = vpack.c.bf16 %v4217_v18, %v4216_v51  ;;  %v4204_v27 = vmul.f32 %v5296_v55, %v4180_v11 }
0x1162   :  { %5149 = vmatpush3.bf16.msra.mxu0 %v5148_v37  ;;  %v4211_v14 = vmul.f32 %v4763_v54, %v4204_v27 }
0x1163   :  { %5094 = vmatprep.subr.mxu0 %v5323_v4 }
0x1164   :  { %v4218_v15 = vadd.f32 %v4764_v9, %v4211_v14 }
0x1166   :  { %5095 = vmatpush3.msra.mxu0 %v4218_v15 }
0x1167   :  { %5097 = vmatmul.mubr.msk.f32.vlgmr.msra.gmra.mrb[176].mxu0 %vm442_vm9, %v4765_v19  ;;  %5099 = vmatprep.subr.mxu0 %v5323_v4 }
0x1168   :  { %5100 = vmatpush3.msra.mxu0 %v4298_v60  ;;  %5101 = vmatprep.mubr.msk.f32.mxu0 %vm5322_vm0, %v5323_v4 }
0x1169   :  { %5150 = vmatprep.subr.bf16.mxu0 %v5321_v2  ;;  %v4301_v2 = vld [vmem:[%s6228_s2 + $0x78] sm:$0xff] }
0x116a   :  { %5112 = vmatpush3.msra.mxu1 %v4301_v2 }
0x123a   :  { %v4294_v32 = vpop.f32.mrb[176].mxu0 }
0x123b   :  { %v5098_v35 = vpop.f32.mrb[177].mxu0  ;;  %5102 = vmatmul.mubr.msk.f32.vlgmr.msra.gmra.mrb[178].mxu0 %vm170_vm2, %v4294_v32 }
0x123c   :  { %5108 = vmatprep.mubr.msk.f32.mxu0 %vm5322_vm0, %v5323_v4  ;;  %5152 = vmatpush3.bf16.msra.mxu0 %v5151_v40 }
0x130e   :  { %v4378_v4 = vpop.f32.mrb[178].mxu0 }
0x130f   :  { %v4379_v58 = vadd.f32 %v4767_v31, %v4378_v4  ;;  %v5103_v23 = vpop.f32.mrb[179].mxu0 }
0x1311   :  { %v4382_v41 = vmax.f32 %v4379_v58, 0.0 }
0x1313   :  { %5109 = vmatmul.mubr.msk.f32.vlgmr.msra.gmra.mrb[180].mxu0 %vm58_vm1, %v4382_v41 }
0x13e6   :  { %v4456_v28 = vpop.f32.mrb[180].mxu0 }
0x13e7   :  { %v4457_v33 = vadd.f32 %v4769_v26, %v4456_v28  ;;  %v5110_v46 = vpop.f32.mrb[181].mxu0 }
0x13e9   :  { %v4460_v3 = vmax.f32 %v4457_v33, 0.0 }
0x13eb   :  { %5114 = vmatmul.mubr.msk.f32.vlgmr.msra.gmra.mrb[118].mxu1 %vm170_vm2, %v4460_v3 }
0x14be   :  { %v4534_v48 = vpop.f32.mrb[118].mxu1 }
0x14bf   :  { %v4535_v49 = vadd.f32 %v4771_v47, %v4534_v48  ;;  %v5115_v24 = vpop.f32.mrb[119].mxu1 }
0x14c1   :  { %4539 = vst.msk [vmem:[#allocation2] sm:$0x3] %vm4538_vm14, %v4535_v49 }
0x14c2   :  { %5308 = shalt.err (!%p5305_p4)
}
0x14c3   :  { %s5309_s30 = scalar_lea.hbm %s6231_s5, 32 }
0x14c4   :  { %p5310_p5 = scmp.ne.s32.totalorder %s6231_s5, %s5309_s30  ;;  %p5313_p6 = scmp.lt.u32.totalorder %s5309_s30, %s6231_s5 }
0x14c6   :  { %p5315_p7 = pnand %p5313_p6, %p5310_p5 }
0x14c8   :  { %5318 = shalt.err (!%p5315_p7)
}
0x14c9   :  { %4549 = dma.vmem_to_hbm [thread:$0]  %s4547_s26, 32, %s6231_s5, [#allocation3]  }
0x14ca   :  { %5319 = dma.done.wait [#allocation3], 32  }
0x14cb   :  { %5320 = vsyncadd [#allocation3], 4294967264 }
0x14cc   :  { %4553 = vsyncpa [#allocation3], 1 }

</bundles_post_ra>
